<compile_context>
chip_gen: v7x
topology: tpu7x:2x2x1
jax: 0.10.0
libtpu: 0.0.40
codegen_flags: <defaults>
</compile_context>

<pallas_src>
import jax
import jax.numpy as jnp
from jax.experimental import pallas as pl
from jax.experimental.pallas import tpu as pltpu


# ---------------------------------------------------------------- fused kernel

def connet_kernel(x_ref, w1_ref, b1_ref, w2_ref, b2_ref,
                  fw1_ref, fb1_ref, fw2_ref, fb2_ref,
                  fw3_ref, fb3_ref, fw4_ref, fb4_ref,
                  out_ref,
                  p1pad_ref, flat_ref):
    f32 = jnp.float32
    bf16 = jnp.bfloat16

    # tap order t = kh*2 + kw matches the torch (kh, kw) weight flattening
    shifts = [(kh, kw) for kh in range(2) for kw in range(2)]

    # ---- conv1: Conv2d(1,4,k=2,s=1,p=1) as unrolled VPU MACs ------------------
    # Layout (N, W, H): the long H axis (64..66) sits on lanes.  x_ref is the
    # zero-padded input (N, 6, 66) built in the wrapper.
    taps1 = [x_ref[:, kw:kw + 5, kh:kh + 65] for (kh, kw) in shifts]    # (N,5,65)

    p1pad_ref[...] = jnp.zeros(p1pad_ref.shape, f32)     # zero padding for conv2
    for co in range(4):
        acc = w1_ref[co, 0] * taps1[0]
        for t in range(1, 4):
            acc = acc + w1_ref[co, t] * taps1[t]
        # pool1: MaxPool2d(k=2,s=1) -> (N,4,64); conv1 bias added after the max
        p1 = jnp.maximum(jnp.maximum(acc[:, 0:4, 0:64], acc[:, 0:4, 1:65]),
                         jnp.maximum(acc[:, 1:5, 0:64], acc[:, 1:5, 1:65]))
        p1pad_ref[co, :, 1:5, 1:65] = p1 + b1_ref[0, co]

    # ---- conv2: Conv2d(4,8,k=2,s=2,p=1) + pool2: MaxPool2d(k=2,s=1) -----------
    # Evaluated as a stride-1 conv; stride-2 subsampling, pool-2 selection and
    # torch's NCHW flatten order are folded into the fc1 weight (pack_params).
    # ci is the OUTER loop so only that channel's 4 taps are live at a time.
    accs = [None] * 8
    for ci in range(4):
        taps2 = [p1pad_ref[ci, :, kw:kw + 5, kh:kh + 66]               # (N,5,66)
                 for (kh, kw) in shifts]
        for co in range(8):
            for t in range(4):
                term = w2_ref[co, ci * 4 + t] * taps2[t]
                accs[co] = term if accs[co] is None else accs[co] + term

    # pool2 over the stride-2 grid == max of four (+0/+2)-shifted slices; only
    # the w' in {0,2} sublane pair survives (the dead middle column is skipped).
    # Rows are 64 lanes wide, 64-aligned, and fully cover flat_ref -> no masked
    # partial stores and no zero-init (lane 63 of each slot is finite junk that
    # only hits zero rows of f1w).
    for co in range(8):
        acc = accs[co]
        bias = b2_ref[0, co]
        for w in range(2):
            a = 2 * w
            row = jnp.maximum(
                jnp.maximum(acc[:, a, 0:64], acc[:, a, 2:66]),
                jnp.maximum(acc[:, a + 2, 0:64], acc[:, a + 2, 2:66]))  # (N,64)
            off = (co * 2 + w) * 64
            flat_ref[:, off:off + 64] = row + bias

    # ---- fc stack: bf16 MXU matmuls with f32 accumulation; exact sigmoid ------
    def sigmoid(v):                      # exact (EUP exp + divide), kept in f32
        return 1.0 / (1.0 + jnp.exp(-v))

    h = flat_ref[...].astype(bf16)                                      # (N,1024)
    h = sigmoid(jnp.dot(h, fw1_ref[...], preferred_element_type=f32)
                + fb1_ref[...]).astype(bf16)
    h = sigmoid(jnp.dot(h, fw2_ref[...], preferred_element_type=f32)
                + fb2_ref[...]).astype(bf16)
    h = sigmoid(jnp.dot(h, fw3_ref[...], preferred_element_type=f32)
                + fb3_ref[...]).astype(bf16)
    out_ref[...] = (jnp.dot(h, fw4_ref[...], preferred_element_type=f32)
                    + fb4_ref[...])


# ---------------------------------------------------------------- wrapper

def connet_forward(x, p):
    n = x.shape[0]
    # NCHW (N,1,64,4) -> (N, W=4, H=64) with the long H axis on lanes, then
    # zero-pad by 1 for conv1 (padding=1).  ~3 KB; the only ops outside the kernel.
    xt = jnp.swapaxes(x.reshape(n, 64, 4), 1, 2)
    xpad = jnp.pad(xt, ((0, 0), (1, 1), (1, 1)))

    vmem = pl.BlockSpec(memory_space=pltpu.MemorySpace.VMEM)
    smem = pl.BlockSpec(memory_space=pltpu.MemorySpace.SMEM)

    # TODO(synk): for large batches (esp. v7x: 2 TCs, 64 MiB VMEM) add a batch
    # grid axis with dimension_semantics=("parallel",), per-tile BlockSpecs for
    # x/out (constant index_map for weights) and an explicit vmem_limit_bytes;
    # and evaluate conv2 only at stride-2 H positions (even/odd lane split) to
    # cut its VALU work ~4x.  At N=2 the kernel is launch/DMA bound so a grid
    # would only add per-step overhead.
    return pl.pallas_call(
        connet_kernel,
        out_shape=jax.ShapeDtypeStruct((n, 2), jnp.float32),
        in_specs=[vmem,                       # zero-padded x (N, 6, 66)
                  smem, smem, smem, smem,     # conv weights / biases (scalars)
                  vmem, vmem, vmem, vmem,     # fc1, fc2
                  vmem, vmem, vmem, vmem],    # fc3, fc4
        out_specs=vmem,
        scratch_shapes=[
            pltpu.VMEM((4, n, 6, 67), jnp.float32),   # zero-padded pool1 output
            pltpu.VMEM((n, 1024), jnp.float32),       # staged fc1 input
        ],
    )(xpad, p["c1w"], p["c1b"], p["c2w"], p["c2b"],
      p["f1w"], p["f1b"], p["f2w"], p["f2b"],
      p["f3w"], p["f3b"], p["f4w"], p["f4b"])


# ---------------------------------------------------------------- params

def init_torch_params(key):
    """Parameters in the original torch layouts / init distribution."""
    ks = jax.random.split(key, 12)

    def u(k, shape, fan_in):
        b = 1.0 / (fan_in ** 0.5)
        return jax.random.uniform(k, shape, jnp.float32, -b, b)

    return dict(
        c1w=u(ks[0], (4, 1, 2, 2), 4),   c1b=u(ks[1], (4,), 4),
        c2w=u(ks[2], (8, 4, 2, 2), 16),  c2b=u(ks[3], (8,), 16),
        f1w=u(ks[4], (128, 512), 512),   f1b=u(ks[5], (128,), 512),
        f2w=u(ks[6], (84, 128), 128),    f2b=u(ks[7], (84,), 128),
        f3w=u(ks[8], (48, 84), 84),      f3b=u(ks[9], (48,), 84),
        f4w=u(ks[10], (2, 48), 48),      f4b=u(ks[11], (2,), 48),
    )


def pack_params(tp):
    """Offline weight preprocessing into final in-kernel layouts (zero runtime cost)."""
    f32, bf16 = jnp.float32, jnp.bfloat16
    # conv weights -> (cout, taps); tap index = kh*2 + kw (+ ci*4 for conv2)
    c1w = tp["c1w"].reshape(4, 4).astype(f32)
    c1b = tp["c1b"].reshape(1, 4).astype(f32)
    c2w = tp["c2w"].reshape(8, 16).astype(f32)
    c2b = tp["c2b"].reshape(1, 8).astype(f32)

    # fc1: torch flat index k = c*64 + h*2 + w over the (8,32,2) NCHW view maps
    # to kernel flat column (c*2 + w)*64 + 2*h (dead middle pool-2 column dropped,
    # stride-2 subsample + pool-2 selection folded in).  Unmapped rows stay zero
    # so the junk odd / lane-63 slots contribute nothing.
    k = jnp.arange(512)
    c, rem = k // 64, k % 64
    h, w = rem // 2, rem % 2
    rows = (c * 2 + w) * 64 + 2 * h
    f1w = jnp.zeros((1024, 128), f32).at[rows].set(tp["f1w"].T).astype(bf16)
    f1b = tp["f1b"].reshape(1, 128).astype(f32)

    # fc2/fc3/fc4 zero-padded to 128 lanes; padded sigmoid(0)=0.5 activations
    # only ever multiply zero weight rows downstream, so the math stays exact.
    f2w = jnp.zeros((128, 128), f32).at[:, :84].set(tp["f2w"].T).astype(bf16)
    f2b = jnp.zeros((1, 128), f32).at[0, :84].set(tp["f2b"])
    f3w = jnp.zeros((128, 128), f32).at[:84, :48].set(tp["f3w"].T).astype(bf16)
    f3b = jnp.zeros((1, 128), f32).at[0, :48].set(tp["f3b"])
    f4w = jnp.zeros((128, 2), f32).at[:48, :].set(tp["f4w"].T).astype(bf16)
    f4b = tp["f4b"].reshape(1, 2).astype(f32)

    return dict(c1w=c1w, c1b=c1b, c2w=c2w, c2b=c2b,
                f1w=f1w, f1b=f1b, f2w=f2w, f2b=f2b,
                f3w=f3w, f3b=f3b, f4w=f4w, f4b=f4b)


# ---------------------------------------------------------------- reference

def reference_forward(x, tp):
    """Plain-JAX NCHW reference of the torch module, for an in-script self-check."""
    hi = jax.lax.Precision.HIGHEST

    def conv(v, w, b, stride, pad):
        o = jax.lax.conv_general_dilated(
            v, w, (stride, stride), [(pad, pad), (pad, pad)],
            dimension_numbers=("NCHW", "OIHW", "NCHW"), precision=hi)
        return o + b.reshape(1, -1, 1, 1)

    def pool(v):  # MaxPool2d(kernel_size=2, stride=1)
        return jnp.maximum(jnp.maximum(v[:, :, :-1, :-1], v[:, :, :-1, 1:]),
                           jnp.maximum(v[:, :, 1:, :-1], v[:, :, 1:, 1:]))

    def sig(v):
        return 1.0 / (1.0 + jnp.exp(-v))

    hact = pool(conv(x, tp["c1w"], tp["c1b"], 1, 1))
    hact = pool(conv(hact, tp["c2w"], tp["c2b"], 2, 1))
    hact = hact.reshape(x.shape[0], 512)
    hact = sig(jnp.dot(hact, tp["f1w"].T, precision=hi) + tp["f1b"])
    hact = sig(jnp.dot(hact, tp["f2w"].T, precision=hi) + tp["f2b"])
    hact = sig(jnp.dot(hact, tp["f3w"].T, precision=hi) + tp["f3b"])
    return jnp.dot(hact, tp["f4w"].T, precision=hi) + tp["f4b"]


# ---------------------------------------------------------------- main

if __name__ == "__main__":
    key = jax.random.PRNGKey(0)
    k_x, k_p = jax.random.split(key)
    x = jax.random.normal(k_x, (2, 1, 64, 4), dtype=jnp.float32)  # NCHW
    torch_params = init_torch_params(k_p)
    params = pack_params(torch_params)

    out = jax.jit(connet_forward)(x, params)
    out = jax.block_until_ready(out)
    assert out.shape == (2, 2), out.shape

    ref = reference_forward(x, torch_params)
    err = float(jnp.max(jnp.abs(out - ref)))
    assert err < 2e-2, f"mismatch vs reference: max abs err {err}"
    print("KERNEL_OK")
</pallas_src>

<mosaic_0001>
module attributes {stable_mosaic.version = 11 : i64} {
  func.func @connet_kernel(%arg0: memref<2x6x66xf32, #tpu.memory_space<vmem>>, %arg1: memref<4x4xf32, #tpu.memory_space<smem>>, %arg2: memref<1x4xf32, #tpu.memory_space<smem>>, %arg3: memref<8x16xf32, #tpu.memory_space<smem>>, %arg4: memref<1x8xf32, #tpu.memory_space<smem>>, %arg5: memref<1024x128xbf16, #tpu.memory_space<vmem>>, %arg6: memref<1x128xf32, #tpu.memory_space<vmem>>, %arg7: memref<128x128xbf16, #tpu.memory_space<vmem>>, %arg8: memref<1x128xf32, #tpu.memory_space<vmem>>, %arg9: memref<128x128xbf16, #tpu.memory_space<vmem>>, %arg10: memref<1x128xf32, #tpu.memory_space<vmem>>, %arg11: memref<128x2xbf16, #tpu.memory_space<vmem>>, %arg12: memref<1x2xf32, #tpu.memory_space<vmem>>, %arg13: memref<2x2xf32, #tpu.memory_space<vmem>>, %arg14: memref<4x2x6x67xf32, #tpu.memory_space<vmem>>, %arg15: memref<2x1024xf32, #tpu.memory_space<vmem>>) attributes {dimension_semantics = [], scalar_prefetch = 0 : i64, scratch_operands = 2 : i64, tpu.core_type = #tpu.core_type<tc>} {
    %c0 = arith.constant 0 : index
    %c0_0 = arith.constant 0 : index
    %c0_1 = arith.constant 0 : index
    %0 = vector.load %arg0[%c0, %c0_0, %c0_1] : memref<2x6x66xf32, #tpu.memory_space<vmem>>, vector<2x5x65xf32>
    %c0_2 = arith.constant 0 : index
    %c1 = arith.constant 1 : index
    %c0_3 = arith.constant 0 : index
    %1 = vector.load %arg0[%c0_2, %c1, %c0_3] : memref<2x6x66xf32, #tpu.memory_space<vmem>>, vector<2x5x65xf32>
    %c0_4 = arith.constant 0 : index
    %c0_5 = arith.constant 0 : index
    %c1_6 = arith.constant 1 : index
    %2 = vector.load %arg0[%c0_4, %c0_5, %c1_6] : memref<2x6x66xf32, #tpu.memory_space<vmem>>, vector<2x5x65xf32>
    %c0_7 = arith.constant 0 : index
    %c1_8 = arith.constant 1 : index
    %c1_9 = arith.constant 1 : index
    %3 = vector.load %arg0[%c0_7, %c1_8, %c1_9] : memref<2x6x66xf32, #tpu.memory_space<vmem>>, vector<2x5x65xf32>
    %cst = arith.constant 0.000000e+00 : f32
    %4 = vector.broadcast %cst : f32 to vector<4x2x6x67xf32>
    %c0_10 = arith.constant 0 : index
    %c0_11 = arith.constant 0 : index
    %c0_12 = arith.constant 0 : index
    %c0_13 = arith.constant 0 : index
    %5 = vector.load %arg14[%c0_10, %c0_11, %c0_12, %c0_13] : memref<4x2x6x67xf32, #tpu.memory_space<vmem>>, vector<4x2x6x67xf32>
    tpu.vector_store %arg14[%c0_10, %c0_11, %c0_12, %c0_13], %4 {strides = array<i32>} : memref<4x2x6x67xf32, #tpu.memory_space<vmem>>, vector<4x2x6x67xf32>,
    %c0_14 = arith.constant 0 : index
    %c0_15 = arith.constant 0 : index
    %6 = memref.load %arg1[%c0_14, %c0_15] : memref<4x4xf32, #tpu.memory_space<smem>>
    %7 = vector.broadcast %6 : f32 to vector<2x5x65xf32>
    %8 = arith.mulf %7, %0 : vector<2x5x65xf32>
    %c0_16 = arith.constant 0 : index
    %c1_17 = arith.constant 1 : index
    %9 = memref.load %arg1[%c0_16, %c1_17] : memref<4x4xf32, #tpu.memory_space<smem>>
    %10 = vector.broadcast %9 : f32 to vector<2x5x65xf32>
    %11 = arith.mulf %10, %1 : vector<2x5x65xf32>
    %12 = arith.addf %8, %11 : vector<2x5x65xf32>
    %c0_18 = arith.constant 0 : index
    %c2 = arith.constant 2 : index
    %13 = memref.load %arg1[%c0_18, %c2] : memref<4x4xf32, #tpu.memory_space<smem>>
    %14 = vector.broadcast %13 : f32 to vector<2x5x65xf32>
    %15 = arith.mulf %14, %2 : vector<2x5x65xf32>
    %16 = arith.addf %12, %15 : vector<2x5x65xf32>
    %c0_19 = arith.constant 0 : index
    %c3 = arith.constant 3 : index
    %17 = memref.load %arg1[%c0_19, %c3] : memref<4x4xf32, #tpu.memory_space<smem>>
    %18 = vector.broadcast %17 : f32 to vector<2x5x65xf32>
    %19 = arith.mulf %18, %3 : vector<2x5x65xf32>
    %20 = arith.addf %16, %19 : vector<2x5x65xf32>
    %21 = vector.extract_strided_slice %20 {offsets = [0, 0, 0], sizes = [2, 4, 64], strides = [1, 1, 1]} : vector<2x5x65xf32> to vector<2x4x64xf32>
    %22 = vector.extract_strided_slice %20 {offsets = [0, 0, 1], sizes = [2, 4, 64], strides = [1, 1, 1]} : vector<2x5x65xf32> to vector<2x4x64xf32>
    %23 = arith.maximumf %21, %22 : vector<2x4x64xf32>
    %24 = vector.extract_strided_slice %20 {offsets = [0, 1, 0], sizes = [2, 4, 64], strides = [1, 1, 1]} : vector<2x5x65xf32> to vector<2x4x64xf32>
    %25 = vector.extract_strided_slice %20 {offsets = [0, 1, 1], sizes = [2, 4, 64], strides = [1, 1, 1]} : vector<2x5x65xf32> to vector<2x4x64xf32>
    %26 = arith.maximumf %24, %25 : vector<2x4x64xf32>
    %27 = arith.maximumf %23, %26 : vector<2x4x64xf32>
    %c0_20 = arith.constant 0 : index
    %c0_21 = arith.constant 0 : index
    %28 = memref.load %arg2[%c0_20, %c0_21] : memref<1x4xf32, #tpu.memory_space<smem>>
    %29 = vector.broadcast %28 : f32 to vector<2x4x64xf32>
    %30 = arith.addf %27, %29 : vector<2x4x64xf32>
    %c0_22 = arith.constant 0 : index
    %c0_23 = arith.constant 0 : index
    %c1_24 = arith.constant 1 : index
    %c1_25 = arith.constant 1 : index
    %31 = vector.load %arg14[%c0_22, %c0_23, %c1_24, %c1_25] : memref<4x2x6x67xf32, #tpu.memory_space<vmem>>, vector<1x2x4x64xf32>
    %32 = vector.shape_cast %31 : vector<1x2x4x64xf32> to vector<2x4x64xf32>
    %33 = vector.shape_cast %30 : vector<2x4x64xf32> to vector<1x2x4x64xf32>
    tpu.vector_store %arg14[%c0_22, %c0_23, %c1_24, %c1_25], %33 {strides = array<i32>} : memref<4x2x6x67xf32, #tpu.memory_space<vmem>>, vector<1x2x4x64xf32>,
    %c1_26 = arith.constant 1 : index
    %c0_27 = arith.constant 0 : index
    %34 = memref.load %arg1[%c1_26, %c0_27] : memref<4x4xf32, #tpu.memory_space<smem>>
    %35 = vector.broadcast %34 : f32 to vector<2x5x65xf32>
    %36 = arith.mulf %35, %0 : vector<2x5x65xf32>
    %c1_28 = arith.constant 1 : index
    %c1_29 = arith.constant 1 : index
    %37 = memref.load %arg1[%c1_28, %c1_29] : memref<4x4xf32, #tpu.memory_space<smem>>
    %38 = vector.broadcast %37 : f32 to vector<2x5x65xf32>
    %39 = arith.mulf %38, %1 : vector<2x5x65xf32>
    %40 = arith.addf %36, %39 : vector<2x5x65xf32>
    %c1_30 = arith.constant 1 : index
    %c2_31 = arith.constant 2 : index
    %41 = memref.load %arg1[%c1_30, %c2_31] : memref<4x4xf32, #tpu.memory_space<smem>>
    %42 = vector.broadcast %41 : f32 to vector<2x5x65xf32>
    %43 = arith.mulf %42, %2 : vector<2x5x65xf32>
    %44 = arith.addf %40, %43 : vector<2x5x65xf32>
    %c1_32 = arith.constant 1 : index
    %c3_33 = arith.constant 3 : index
    %45 = memref.load %arg1[%c1_32, %c3_33] : memref<4x4xf32, #tpu.memory_space<smem>>
    %46 = vector.broadcast %45 : f32 to vector<2x5x65xf32>
    %47 = arith.mulf %46, %3 : vector<2x5x65xf32>
    %48 = arith.addf %44, %47 : vector<2x5x65xf32>
    %49 = vector.extract_strided_slice %48 {offsets = [0, 0, 0], sizes = [2, 4, 64], strides = [1, 1, 1]} : vector<2x5x65xf32> to vector<2x4x64xf32>
    %50 = vector.extract_strided_slice %48 {offsets = [0, 0, 1], sizes = [2, 4, 64], strides = [1, 1, 1]} : vector<2x5x65xf32> to vector<2x4x64xf32>
    %51 = arith.maximumf %49, %50 : vector<2x4x64xf32>
    %52 = vector.extract_strided_slice %48 {offsets = [0, 1, 0], sizes = [2, 4, 64], strides = [1, 1, 1]} : vector<2x5x65xf32> to vector<2x4x64xf32>
    %53 = vector.extract_strided_slice %48 {offsets = [0, 1, 1], sizes = [2, 4, 64], strides = [1, 1, 1]} : vector<2x5x65xf32> to vector<2x4x64xf32>
    %54 = arith.maximumf %52, %53 : vector<2x4x64xf32>
    %55 = arith.maximumf %51, %54 : vector<2x4x64xf32>
    %c0_34 = arith.constant 0 : index
    %c1_35 = arith.constant 1 : index
    %56 = memref.load %arg2[%c0_34, %c1_35] : memref<1x4xf32, #tpu.memory_space<smem>>
    %57 = vector.broadcast %56 : f32 to vector<2x4x64xf32>
    %58 = arith.addf %55, %57 : vector<2x4x64xf32>
    %c1_36 = arith.constant 1 : index
    %c0_37 = arith.constant 0 : index
    %c1_38 = arith.constant 1 : index
    %c1_39 = arith.constant 1 : index
    %59 = vector.load %arg14[%c1_36, %c0_37, %c1_38, %c1_39] : memref<4x2x6x67xf32, #tpu.memory_space<vmem>>, vector<1x2x4x64xf32>
    %60 = vector.shape_cast %59 : vector<1x2x4x64xf32> to vector<2x4x64xf32>
    %61 = vector.shape_cast %58 : vector<2x4x64xf32> to vector<1x2x4x64xf32>
    tpu.vector_store %arg14[%c1_36, %c0_37, %c1_38, %c1_39], %61 {strides = array<i32>} : memref<4x2x6x67xf32, #tpu.memory_space<vmem>>, vector<1x2x4x64xf32>,
    %c2_40 = arith.constant 2 : index
    %c0_41 = arith.constant 0 : index
    %62 = memref.load %arg1[%c2_40, %c0_41] : memref<4x4xf32, #tpu.memory_space<smem>>
    %63 = vector.broadcast %62 : f32 to vector<2x5x65xf32>
    %64 = arith.mulf %63, %0 : vector<2x5x65xf32>
    %c2_42 = arith.constant 2 : index
    %c1_43 = arith.constant 1 : index
    %65 = memref.load %arg1[%c2_42, %c1_43] : memref<4x4xf32, #tpu.memory_space<smem>>
    %66 = vector.broadcast %65 : f32 to vector<2x5x65xf32>
    %67 = arith.mulf %66, %1 : vector<2x5x65xf32>
    %68 = arith.addf %64, %67 : vector<2x5x65xf32>
    %c2_44 = arith.constant 2 : index
    %c2_45 = arith.constant 2 : index
    %69 = memref.load %arg1[%c2_44, %c2_45] : memref<4x4xf32, #tpu.memory_space<smem>>
    %70 = vector.broadcast %69 : f32 to vector<2x5x65xf32>
    %71 = arith.mulf %70, %2 : vector<2x5x65xf32>
    %72 = arith.addf %68, %71 : vector<2x5x65xf32>
    %c2_46 = arith.constant 2 : index
    %c3_47 = arith.constant 3 : index
    %73 = memref.load %arg1[%c2_46, %c3_47] : memref<4x4xf32, #tpu.memory_space<smem>>
    %74 = vector.broadcast %73 : f32 to vector<2x5x65xf32>
    %75 = arith.mulf %74, %3 : vector<2x5x65xf32>
    %76 = arith.addf %72, %75 : vector<2x5x65xf32>
    %77 = vector.extract_strided_slice %76 {offsets = [0, 0, 0], sizes = [2, 4, 64], strides = [1, 1, 1]} : vector<2x5x65xf32> to vector<2x4x64xf32>
    %78 = vector.extract_strided_slice %76 {offsets = [0, 0, 1], sizes = [2, 4, 64], strides = [1, 1, 1]} : vector<2x5x65xf32> to vector<2x4x64xf32>
    %79 = arith.maximumf %77, %78 : vector<2x4x64xf32>
    %80 = vector.extract_strided_slice %76 {offsets = [0, 1, 0], sizes = [2, 4, 64], strides = [1, 1, 1]} : vector<2x5x65xf32> to vector<2x4x64xf32>
    %81 = vector.extract_strided_slice %76 {offsets = [0, 1, 1], sizes = [2, 4, 64], strides = [1, 1, 1]} : vector<2x5x65xf32> to vector<2x4x64xf32>
    %82 = arith.maximumf %80, %81 : vector<2x4x64xf32>
    %83 = arith.maximumf %79, %82 : vector<2x4x64xf32>
    %c0_48 = arith.constant 0 : index
    %c2_49 = arith.constant 2 : index
    %84 = memref.load %arg2[%c0_48, %c2_49] : memref<1x4xf32, #tpu.memory_space<smem>>
    %85 = vector.broadcast %84 : f32 to vector<2x4x64xf32>
    %86 = arith.addf %83, %85 : vector<2x4x64xf32>
    %c2_50 = arith.constant 2 : index
    %c0_51 = arith.constant 0 : index
    %c1_52 = arith.constant 1 : index
    %c1_53 = arith.constant 1 : index
    %87 = vector.load %arg14[%c2_50, %c0_51, %c1_52, %c1_53] : memref<4x2x6x67xf32, #tpu.memory_space<vmem>>, vector<1x2x4x64xf32>
    %88 = vector.shape_cast %87 : vector<1x2x4x64xf32> to vector<2x4x64xf32>
    %89 = vector.shape_cast %86 : vector<2x4x64xf32> to vector<1x2x4x64xf32>
    tpu.vector_store %arg14[%c2_50, %c0_51, %c1_52, %c1_53], %89 {strides = array<i32>} : memref<4x2x6x67xf32, #tpu.memory_space<vmem>>, vector<1x2x4x64xf32>,
    %c3_54 = arith.constant 3 : index
    %c0_55 = arith.constant 0 : index
    %90 = memref.load %arg1[%c3_54, %c0_55] : memref<4x4xf32, #tpu.memory_space<smem>>
    %91 = vector.broadcast %90 : f32 to vector<2x5x65xf32>
    %92 = arith.mulf %91, %0 : vector<2x5x65xf32>
    %c3_56 = arith.constant 3 : index
    %c1_57 = arith.constant 1 : index
    %93 = memref.load %arg1[%c3_56, %c1_57] : memref<4x4xf32, #tpu.memory_space<smem>>
    %94 = vector.broadcast %93 : f32 to vector<2x5x65xf32>
    %95 = arith.mulf %94, %1 : vector<2x5x65xf32>
    %96 = arith.addf %92, %95 : vector<2x5x65xf32>
    %c3_58 = arith.constant 3 : index
    %c2_59 = arith.constant 2 : index
    %97 = memref.load %arg1[%c3_58, %c2_59] : memref<4x4xf32, #tpu.memory_space<smem>>
    %98 = vector.broadcast %97 : f32 to vector<2x5x65xf32>
    %99 = arith.mulf %98, %2 : vector<2x5x65xf32>
    %100 = arith.addf %96, %99 : vector<2x5x65xf32>
    %c3_60 = arith.constant 3 : index
    %c3_61 = arith.constant 3 : index
    %101 = memref.load %arg1[%c3_60, %c3_61] : memref<4x4xf32, #tpu.memory_space<smem>>
    %102 = vector.broadcast %101 : f32 to vector<2x5x65xf32>
    %103 = arith.mulf %102, %3 : vector<2x5x65xf32>
    %104 = arith.addf %100, %103 : vector<2x5x65xf32>
    %105 = vector.extract_strided_slice %104 {offsets = [0, 0, 0], sizes = [2, 4, 64], strides = [1, 1, 1]} : vector<2x5x65xf32> to vector<2x4x64xf32>
    %106 = vector.extract_strided_slice %104 {offsets = [0, 0, 1], sizes = [2, 4, 64], strides = [1, 1, 1]} : vector<2x5x65xf32> to vector<2x4x64xf32>
    %107 = arith.maximumf %105, %106 : vector<2x4x64xf32>
    %108 = vector.extract_strided_slice %104 {offsets = [0, 1, 0], sizes = [2, 4, 64], strides = [1, 1, 1]} : vector<2x5x65xf32> to vector<2x4x64xf32>
    %109 = vector.extract_strided_slice %104 {offsets = [0, 1, 1], sizes = [2, 4, 64], strides = [1, 1, 1]} : vector<2x5x65xf32> to vector<2x4x64xf32>
    %110 = arith.maximumf %108, %109 : vector<2x4x64xf32>
    %111 = arith.maximumf %107, %110 : vector<2x4x64xf32>
    %c0_62 = arith.constant 0 : index
    %c3_63 = arith.constant 3 : index
    %112 = memref.load %arg2[%c0_62, %c3_63] : memref<1x4xf32, #tpu.memory_space<smem>>
    %113 = vector.broadcast %112 : f32 to vector<2x4x64xf32>
    %114 = arith.addf %111, %113 : vector<2x4x64xf32>
    %c3_64 = arith.constant 3 : index
    %c0_65 = arith.constant 0 : index
    %c1_66 = arith.constant 1 : index
    %c1_67 = arith.constant 1 : index
    %115 = vector.load %arg14[%c3_64, %c0_65, %c1_66, %c1_67] : memref<4x2x6x67xf32, #tpu.memory_space<vmem>>, vector<1x2x4x64xf32>
    %116 = vector.shape_cast %115 : vector<1x2x4x64xf32> to vector<2x4x64xf32>
    %117 = vector.shape_cast %114 : vector<2x4x64xf32> to vector<1x2x4x64xf32>
    tpu.vector_store %arg14[%c3_64, %c0_65, %c1_66, %c1_67], %117 {strides = array<i32>} : memref<4x2x6x67xf32, #tpu.memory_space<vmem>>, vector<1x2x4x64xf32>,
    %c0_68 = arith.constant 0 : index
    %c0_69 = arith.constant 0 : index
    %c0_70 = arith.constant 0 : index
    %c0_71 = arith.constant 0 : index
    %118 = vector.load %arg14[%c0_68, %c0_69, %c0_70, %c0_71] : memref<4x2x6x67xf32, #tpu.memory_space<vmem>>, vector<1x2x5x66xf32>
    %119 = vector.shape_cast %118 : vector<1x2x5x66xf32> to vector<2x5x66xf32>
    %c0_72 = arith.constant 0 : index
    %c0_73 = arith.constant 0 : index
    %c1_74 = arith.constant 1 : index
    %c0_75 = arith.constant 0 : index
    %120 = vector.load %arg14[%c0_72, %c0_73, %c1_74, %c0_75] : memref<4x2x6x67xf32, #tpu.memory_space<vmem>>, vector<1x2x5x66xf32>
    %121 = vector.shape_cast %120 : vector<1x2x5x66xf32> to vector<2x5x66xf32>
    %c0_76 = arith.constant 0 : index
    %c0_77 = arith.constant 0 : index
    %c0_78 = arith.constant 0 : index
    %c1_79 = arith.constant 1 : index
    %122 = vector.load %arg14[%c0_76, %c0_77, %c0_78, %c1_79] : memref<4x2x6x67xf32, #tpu.memory_space<vmem>>, vector<1x2x5x66xf32>
    %123 = vector.shape_cast %122 : vector<1x2x5x66xf32> to vector<2x5x66xf32>
    %c0_80 = arith.constant 0 : index
    %c0_81 = arith.constant 0 : index
    %c1_82 = arith.constant 1 : index
    %c1_83 = arith.constant 1 : index
    %124 = vector.load %arg14[%c0_80, %c0_81, %c1_82, %c1_83] : memref<4x2x6x67xf32, #tpu.memory_space<vmem>>, vector<1x2x5x66xf32>
    %125 = vector.shape_cast %124 : vector<1x2x5x66xf32> to vector<2x5x66xf32>
    %c0_84 = arith.constant 0 : index
    %c0_85 = arith.constant 0 : index
    %126 = memref.load %arg3[%c0_84, %c0_85] : memref<8x16xf32, #tpu.memory_space<smem>>
    %127 = vector.broadcast %126 : f32 to vector<2x5x66xf32>
    %128 = arith.mulf %127, %119 : vector<2x5x66xf32>
    %c0_86 = arith.constant 0 : index
    %c1_87 = arith.constant 1 : index
    %129 = memref.load %arg3[%c0_86, %c1_87] : memref<8x16xf32, #tpu.memory_space<smem>>
    %130 = vector.broadcast %129 : f32 to vector<2x5x66xf32>
    %131 = arith.mulf %130, %121 : vector<2x5x66xf32>
    %132 = arith.addf %128, %131 : vector<2x5x66xf32>
    %c0_88 = arith.constant 0 : index
    %c2_89 = arith.constant 2 : index
    %133 = memref.load %arg3[%c0_88, %c2_89] : memref<8x16xf32, #tpu.memory_space<smem>>
    %134 = vector.broadcast %133 : f32 to vector<2x5x66xf32>
    %135 = arith.mulf %134, %123 : vector<2x5x66xf32>
    %136 = arith.addf %132, %135 : vector<2x5x66xf32>
    %c0_90 = arith.constant 0 : index
    %c3_91 = arith.constant 3 : index
    %137 = memref.load %arg3[%c0_90, %c3_91] : memref<8x16xf32, #tpu.memory_space<smem>>
    %138 = vector.broadcast %137 : f32 to vector<2x5x66xf32>
    %139 = arith.mulf %138, %125 : vector<2x5x66xf32>
    %140 = arith.addf %136, %139 : vector<2x5x66xf32>
    %c1_92 = arith.constant 1 : index
    %c0_93 = arith.constant 0 : index
    %141 = memref.load %arg3[%c1_92, %c0_93] : memref<8x16xf32, #tpu.memory_space<smem>>
    %142 = vector.broadcast %141 : f32 to vector<2x5x66xf32>
    %143 = arith.mulf %142, %119 : vector<2x5x66xf32>
    %c1_94 = arith.constant 1 : index
    %c1_95 = arith.constant 1 : index
    %144 = memref.load %arg3[%c1_94, %c1_95] : memref<8x16xf32, #tpu.memory_space<smem>>
    %145 = vector.broadcast %144 : f32 to vector<2x5x66xf32>
    %146 = arith.mulf %145, %121 : vector<2x5x66xf32>
    %147 = arith.addf %143, %146 : vector<2x5x66xf32>
    %c1_96 = arith.constant 1 : index
    %c2_97 = arith.constant 2 : index
    %148 = memref.load %arg3[%c1_96, %c2_97] : memref<8x16xf32, #tpu.memory_space<smem>>
    %149 = vector.broadcast %148 : f32 to vector<2x5x66xf32>
    %150 = arith.mulf %149, %123 : vector<2x5x66xf32>
    %151 = arith.addf %147, %150 : vector<2x5x66xf32>
    %c1_98 = arith.constant 1 : index
    %c3_99 = arith.constant 3 : index
    %152 = memref.load %arg3[%c1_98, %c3_99] : memref<8x16xf32, #tpu.memory_space<smem>>
    %153 = vector.broadcast %152 : f32 to vector<2x5x66xf32>
    %154 = arith.mulf %153, %125 : vector<2x5x66xf32>
    %155 = arith.addf %151, %154 : vector<2x5x66xf32>
    %c2_100 = arith.constant 2 : index
    %c0_101 = arith.constant 0 : index
    %156 = memref.load %arg3[%c2_100, %c0_101] : memref<8x16xf32, #tpu.memory_space<smem>>
    %157 = vector.broadcast %156 : f32 to vector<2x5x66xf32>
    %158 = arith.mulf %157, %119 : vector<2x5x66xf32>
    %c2_102 = arith.constant 2 : index
    %c1_103 = arith.constant 1 : index
    %159 = memref.load %arg3[%c2_102, %c1_103] : memref<8x16xf32, #tpu.memory_space<smem>>
    %160 = vector.broadcast %159 : f32 to vector<2x5x66xf32>
    %161 = arith.mulf %160, %121 : vector<2x5x66xf32>
    %162 = arith.addf %158, %161 : vector<2x5x66xf32>
    %c2_104 = arith.constant 2 : index
    %c2_105 = arith.constant 2 : index
    %163 = memref.load %arg3[%c2_104, %c2_105] : memref<8x16xf32, #tpu.memory_space<smem>>
    %164 = vector.broadcast %163 : f32 to vector<2x5x66xf32>
    %165 = arith.mulf %164, %123 : vector<2x5x66xf32>
    %166 = arith.addf %162, %165 : vector<2x5x66xf32>
    %c2_106 = arith.constant 2 : index
    %c3_107 = arith.constant 3 : index
    %167 = memref.load %arg3[%c2_106, %c3_107] : memref<8x16xf32, #tpu.memory_space<smem>>
    %168 = vector.broadcast %167 : f32 to vector<2x5x66xf32>
    %169 = arith.mulf %168, %125 : vector<2x5x66xf32>
    %170 = arith.addf %166, %169 : vector<2x5x66xf32>
    %c3_108 = arith.constant 3 : index
    %c0_109 = arith.constant 0 : index
    %171 = memref.load %arg3[%c3_108, %c0_109] : memref<8x16xf32, #tpu.memory_space<smem>>
    %172 = vector.broadcast %171 : f32 to vector<2x5x66xf32>
    %173 = arith.mulf %172, %119 : vector<2x5x66xf32>
    %c3_110 = arith.constant 3 : index
    %c1_111 = arith.constant 1 : index
    %174 = memref.load %arg3[%c3_110, %c1_111] : memref<8x16xf32, #tpu.memory_space<smem>>
    %175 = vector.broadcast %174 : f32 to vector<2x5x66xf32>
    %176 = arith.mulf %175, %121 : vector<2x5x66xf32>
    %177 = arith.addf %173, %176 : vector<2x5x66xf32>
    %c3_112 = arith.constant 3 : index
    %c2_113 = arith.constant 2 : index
    %178 = memref.load %arg3[%c3_112, %c2_113] : memref<8x16xf32, #tpu.memory_space<smem>>
    %179 = vector.broadcast %178 : f32 to vector<2x5x66xf32>
    %180 = arith.mulf %179, %123 : vector<2x5x66xf32>
    %181 = arith.addf %177, %180 : vector<2x5x66xf32>
    %c3_114 = arith.constant 3 : index
    %c3_115 = arith.constant 3 : index
    %182 = memref.load %arg3[%c3_114, %c3_115] : memref<8x16xf32, #tpu.memory_space<smem>>
    %183 = vector.broadcast %182 : f32 to vector<2x5x66xf32>
    %184 = arith.mulf %183, %125 : vector<2x5x66xf32>
    %185 = arith.addf %181, %184 : vector<2x5x66xf32>
    %c4 = arith.constant 4 : index
    %c0_116 = arith.constant 0 : index
    %186 = memref.load %arg3[%c4, %c0_116] : memref<8x16xf32, #tpu.memory_space<smem>>
    %187 = vector.broadcast %186 : f32 to vector<2x5x66xf32>
    %188 = arith.mulf %187, %119 : vector<2x5x66xf32>
    %c4_117 = arith.constant 4 : index
    %c1_118 = arith.constant 1 : index
    %189 = memref.load %arg3[%c4_117, %c1_118] : memref<8x16xf32, #tpu.memory_space<smem>>
    %190 = vector.broadcast %189 : f32 to vector<2x5x66xf32>
    %191 = arith.mulf %190, %121 : vector<2x5x66xf32>
    %192 = arith.addf %188, %191 : vector<2x5x66xf32>
    %c4_119 = arith.constant 4 : index
    %c2_120 = arith.constant 2 : index
    %193 = memref.load %arg3[%c4_119, %c2_120] : memref<8x16xf32, #tpu.memory_space<smem>>
    %194 = vector.broadcast %193 : f32 to vector<2x5x66xf32>
    %195 = arith.mulf %194, %123 : vector<2x5x66xf32>
    %196 = arith.addf %192, %195 : vector<2x5x66xf32>
    %c4_121 = arith.constant 4 : index
    %c3_122 = arith.constant 3 : index
    %197 = memref.load %arg3[%c4_121, %c3_122] : memref<8x16xf32, #tpu.memory_space<smem>>
    %198 = vector.broadcast %197 : f32 to vector<2x5x66xf32>
    %199 = arith.mulf %198, %125 : vector<2x5x66xf32>
    %200 = arith.addf %196, %199 : vector<2x5x66xf32>
    %c5 = arith.constant 5 : index
    %c0_123 = arith.constant 0 : index
    %201 = memref.load %arg3[%c5, %c0_123] : memref<8x16xf32, #tpu.memory_space<smem>>
    %202 = vector.broadcast %201 : f32 to vector<2x5x66xf32>
    %203 = arith.mulf %202, %119 : vector<2x5x66xf32>
    %c5_124 = arith.constant 5 : index
    %c1_125 = arith.constant 1 : index
    %204 = memref.load %arg3[%c5_124, %c1_125] : memref<8x16xf32, #tpu.memory_space<smem>>
    %205 = vector.broadcast %204 : f32 to vector<2x5x66xf32>
    %206 = arith.mulf %205, %121 : vector<2x5x66xf32>
    %207 = arith.addf %203, %206 : vector<2x5x66xf32>
    %c5_126 = arith.constant 5 : index
    %c2_127 = arith.constant 2 : index
    %208 = memref.load %arg3[%c5_126, %c2_127] : memref<8x16xf32, #tpu.memory_space<smem>>
    %209 = vector.broadcast %208 : f32 to vector<2x5x66xf32>
    %210 = arith.mulf %209, %123 : vector<2x5x66xf32>
    %211 = arith.addf %207, %210 : vector<2x5x66xf32>
    %c5_128 = arith.constant 5 : index
    %c3_129 = arith.constant 3 : index
    %212 = memref.load %arg3[%c5_128, %c3_129] : memref<8x16xf32, #tpu.memory_space<smem>>
    %213 = vector.broadcast %212 : f32 to vector<2x5x66xf32>
    %214 = arith.mulf %213, %125 : vector<2x5x66xf32>
    %215 = arith.addf %211, %214 : vector<2x5x66xf32>
    %c6 = arith.constant 6 : index
    %c0_130 = arith.constant 0 : index
    %216 = memref.load %arg3[%c6, %c0_130] : memref<8x16xf32, #tpu.memory_space<smem>>
    %217 = vector.broadcast %216 : f32 to vector<2x5x66xf32>
    %218 = arith.mulf %217, %119 : vector<2x5x66xf32>
    %c6_131 = arith.constant 6 : index
    %c1_132 = arith.constant 1 : index
    %219 = memref.load %arg3[%c6_131, %c1_132] : memref<8x16xf32, #tpu.memory_space<smem>>
    %220 = vector.broadcast %219 : f32 to vector<2x5x66xf32>
    %221 = arith.mulf %220, %121 : vector<2x5x66xf32>
    %222 = arith.addf %218, %221 : vector<2x5x66xf32>
    %c6_133 = arith.constant 6 : index
    %c2_134 = arith.constant 2 : index
    %223 = memref.load %arg3[%c6_133, %c2_134] : memref<8x16xf32, #tpu.memory_space<smem>>
    %224 = vector.broadcast %223 : f32 to vector<2x5x66xf32>
    %225 = arith.mulf %224, %123 : vector<2x5x66xf32>
    %226 = arith.addf %222, %225 : vector<2x5x66xf32>
    %c6_135 = arith.constant 6 : index
    %c3_136 = arith.constant 3 : index
    %227 = memref.load %arg3[%c6_135, %c3_136] : memref<8x16xf32, #tpu.memory_space<smem>>
    %228 = vector.broadcast %227 : f32 to vector<2x5x66xf32>
    %229 = arith.mulf %228, %125 : vector<2x5x66xf32>
    %230 = arith.addf %226, %229 : vector<2x5x66xf32>
    %c7 = arith.constant 7 : index
    %c0_137 = arith.constant 0 : index
    %231 = memref.load %arg3[%c7, %c0_137] : memref<8x16xf32, #tpu.memory_space<smem>>
    %232 = vector.broadcast %231 : f32 to vector<2x5x66xf32>
    %233 = arith.mulf %232, %119 : vector<2x5x66xf32>
    %c7_138 = arith.constant 7 : index
    %c1_139 = arith.constant 1 : index
    %234 = memref.load %arg3[%c7_138, %c1_139] : memref<8x16xf32, #tpu.memory_space<smem>>
    %235 = vector.broadcast %234 : f32 to vector<2x5x66xf32>
    %236 = arith.mulf %235, %121 : vector<2x5x66xf32>
    %237 = arith.addf %233, %236 : vector<2x5x66xf32>
    %c7_140 = arith.constant 7 : index
    %c2_141 = arith.constant 2 : index
    %238 = memref.load %arg3[%c7_140, %c2_141] : memref<8x16xf32, #tpu.memory_space<smem>>
    %239 = vector.broadcast %238 : f32 to vector<2x5x66xf32>
    %240 = arith.mulf %239, %123 : vector<2x5x66xf32>
    %241 = arith.addf %237, %240 : vector<2x5x66xf32>
    %c7_142 = arith.constant 7 : index
    %c3_143 = arith.constant 3 : index
    %242 = memref.load %arg3[%c7_142, %c3_143] : memref<8x16xf32, #tpu.memory_space<smem>>
    %243 = vector.broadcast %242 : f32 to vector<2x5x66xf32>
    %244 = arith.mulf %243, %125 : vector<2x5x66xf32>
    %245 = arith.addf %241, %244 : vector<2x5x66xf32>
    %c1_144 = arith.constant 1 : index
    %c0_145 = arith.constant 0 : index
    %c0_146 = arith.constant 0 : index
    %c0_147 = arith.constant 0 : index
    %246 = vector.load %arg14[%c1_144, %c0_145, %c0_146, %c0_147] : memref<4x2x6x67xf32, #tpu.memory_space<vmem>>, vector<1x2x5x66xf32>
    %247 = vector.shape_cast %246 : vector<1x2x5x66xf32> to vector<2x5x66xf32>
    %c1_148 = arith.constant 1 : index
    %c0_149 = arith.constant 0 : index
    %c1_150 = arith.constant 1 : index
    %c0_151 = arith.constant 0 : index
    %248 = vector.load %arg14[%c1_148, %c0_149, %c1_150, %c0_151] : memref<4x2x6x67xf32, #tpu.memory_space<vmem>>, vector<1x2x5x66xf32>
    %249 = vector.shape_cast %248 : vector<1x2x5x66xf32> to vector<2x5x66xf32>
    %c1_152 = arith.constant 1 : index
    %c0_153 = arith.constant 0 : index
    %c0_154 = arith.constant 0 : index
    %c1_155 = arith.constant 1 : index
    %250 = vector.load %arg14[%c1_152, %c0_153, %c0_154, %c1_155] : memref<4x2x6x67xf32, #tpu.memory_space<vmem>>, vector<1x2x5x66xf32>
    %251 = vector.shape_cast %250 : vector<1x2x5x66xf32> to vector<2x5x66xf32>
    %c1_156 = arith.constant 1 : index
    %c0_157 = arith.constant 0 : index
    %c1_158 = arith.constant 1 : index
    %c1_159 = arith.constant 1 : index
    %252 = vector.load %arg14[%c1_156, %c0_157, %c1_158, %c1_159] : memref<4x2x6x67xf32, #tpu.memory_space<vmem>>, vector<1x2x5x66xf32>
    %253 = vector.shape_cast %252 : vector<1x2x5x66xf32> to vector<2x5x66xf32>
    %c0_160 = arith.constant 0 : index
    %c4_161 = arith.constant 4 : index
    %254 = memref.load %arg3[%c0_160, %c4_161] : memref<8x16xf32, #tpu.memory_space<smem>>
    %255 = vector.broadcast %254 : f32 to vector<2x5x66xf32>
    %256 = arith.mulf %255, %247 : vector<2x5x66xf32>
    %257 = arith.addf %140, %256 : vector<2x5x66xf32>
    %c0_162 = arith.constant 0 : index
    %c5_163 = arith.constant 5 : index
    %258 = memref.load %arg3[%c0_162, %c5_163] : memref<8x16xf32, #tpu.memory_space<smem>>
    %259 = vector.broadcast %258 : f32 to vector<2x5x66xf32>
    %260 = arith.mulf %259, %249 : vector<2x5x66xf32>
    %261 = arith.addf %257, %260 : vector<2x5x66xf32>
    %c0_164 = arith.constant 0 : index
    %c6_165 = arith.constant 6 : index
    %262 = memref.load %arg3[%c0_164, %c6_165] : memref<8x16xf32, #tpu.memory_space<smem>>
    %263 = vector.broadcast %262 : f32 to vector<2x5x66xf32>
    %264 = arith.mulf %263, %251 : vector<2x5x66xf32>
    %265 = arith.addf %261, %264 : vector<2x5x66xf32>
    %c0_166 = arith.constant 0 : index
    %c7_167 = arith.constant 7 : index
    %266 = memref.load %arg3[%c0_166, %c7_167] : memref<8x16xf32, #tpu.memory_space<smem>>
    %267 = vector.broadcast %266 : f32 to vector<2x5x66xf32>
    %268 = arith.mulf %267, %253 : vector<2x5x66xf32>
    %269 = arith.addf %265, %268 : vector<2x5x66xf32>
    %c1_168 = arith.constant 1 : index
    %c4_169 = arith.constant 4 : index
    %270 = memref.load %arg3[%c1_168, %c4_169] : memref<8x16xf32, #tpu.memory_space<smem>>
    %271 = vector.broadcast %270 : f32 to vector<2x5x66xf32>
    %272 = arith.mulf %271, %247 : vector<2x5x66xf32>
    %273 = arith.addf %155, %272 : vector<2x5x66xf32>
    %c1_170 = arith.constant 1 : index
    %c5_171 = arith.constant 5 : index
    %274 = memref.load %arg3[%c1_170, %c5_171] : memref<8x16xf32, #tpu.memory_space<smem>>
    %275 = vector.broadcast %274 : f32 to vector<2x5x66xf32>
    %276 = arith.mulf %275, %249 : vector<2x5x66xf32>
    %277 = arith.addf %273, %276 : vector<2x5x66xf32>
    %c1_172 = arith.constant 1 : index
    %c6_173 = arith.constant 6 : index
    %278 = memref.load %arg3[%c1_172, %c6_173] : memref<8x16xf32, #tpu.memory_space<smem>>
    %279 = vector.broadcast %278 : f32 to vector<2x5x66xf32>
    %280 = arith.mulf %279, %251 : vector<2x5x66xf32>
    %281 = arith.addf %277, %280 : vector<2x5x66xf32>
    %c1_174 = arith.constant 1 : index
    %c7_175 = arith.constant 7 : index
    %282 = memref.load %arg3[%c1_174, %c7_175] : memref<8x16xf32, #tpu.memory_space<smem>>
    %283 = vector.broadcast %282 : f32 to vector<2x5x66xf32>
    %284 = arith.mulf %283, %253 : vector<2x5x66xf32>
    %285 = arith.addf %281, %284 : vector<2x5x66xf32>
    %c2_176 = arith.constant 2 : index
    %c4_177 = arith.constant 4 : index
    %286 = memref.load %arg3[%c2_176, %c4_177] : memref<8x16xf32, #tpu.memory_space<smem>>
    %287 = vector.broadcast %286 : f32 to vector<2x5x66xf32>
    %288 = arith.mulf %287, %247 : vector<2x5x66xf32>
    %289 = arith.addf %170, %288 : vector<2x5x66xf32>
    %c2_178 = arith.constant 2 : index
    %c5_179 = arith.constant 5 : index
    %290 = memref.load %arg3[%c2_178, %c5_179] : memref<8x16xf32, #tpu.memory_space<smem>>
    %291 = vector.broadcast %290 : f32 to vector<2x5x66xf32>
    %292 = arith.mulf %291, %249 : vector<2x5x66xf32>
    %293 = arith.addf %289, %292 : vector<2x5x66xf32>
    %c2_180 = arith.constant 2 : index
    %c6_181 = arith.constant 6 : index
    %294 = memref.load %arg3[%c2_180, %c6_181] : memref<8x16xf32, #tpu.memory_space<smem>>
    %295 = vector.broadcast %294 : f32 to vector<2x5x66xf32>
    %296 = arith.mulf %295, %251 : vector<2x5x66xf32>
    %297 = arith.addf %293, %296 : vector<2x5x66xf32>
    %c2_182 = arith.constant 2 : index
    %c7_183 = arith.constant 7 : index
    %298 = memref.load %arg3[%c2_182, %c7_183] : memref<8x16xf32, #tpu.memory_space<smem>>
    %299 = vector.broadcast %298 : f32 to vector<2x5x66xf32>
    %300 = arith.mulf %299, %253 : vector<2x5x66xf32>
    %301 = arith.addf %297, %300 : vector<2x5x66xf32>
    %c3_184 = arith.constant 3 : index
    %c4_185 = arith.constant 4 : index
    %302 = memref.load %arg3[%c3_184, %c4_185] : memref<8x16xf32, #tpu.memory_space<smem>>
    %303 = vector.broadcast %302 : f32 to vector<2x5x66xf32>
    %304 = arith.mulf %303, %247 : vector<2x5x66xf32>
    %305 = arith.addf %185, %304 : vector<2x5x66xf32>
    %c3_186 = arith.constant 3 : index
    %c5_187 = arith.constant 5 : index
    %306 = memref.load %arg3[%c3_186, %c5_187] : memref<8x16xf32, #tpu.memory_space<smem>>
    %307 = vector.broadcast %306 : f32 to vector<2x5x66xf32>
    %308 = arith.mulf %307, %249 : vector<2x5x66xf32>
    %309 = arith.addf %305, %308 : vector<2x5x66xf32>
    %c3_188 = arith.constant 3 : index
    %c6_189 = arith.constant 6 : index
    %310 = memref.load %arg3[%c3_188, %c6_189] : memref<8x16xf32, #tpu.memory_space<smem>>
    %311 = vector.broadcast %310 : f32 to vector<2x5x66xf32>
    %312 = arith.mulf %311, %251 : vector<2x5x66xf32>
    %313 = arith.addf %309, %312 : vector<2x5x66xf32>
    %c3_190 = arith.constant 3 : index
    %c7_191 = arith.constant 7 : index
    %314 = memref.load %arg3[%c3_190, %c7_191] : memref<8x16xf32, #tpu.memory_space<smem>>
    %315 = vector.broadcast %314 : f32 to vector<2x5x66xf32>
    %316 = arith.mulf %315, %253 : vector<2x5x66xf32>
    %317 = arith.addf %313, %316 : vector<2x5x66xf32>
    %c4_192 = arith.constant 4 : index
    %c4_193 = arith.constant 4 : index
    %318 = memref.load %arg3[%c4_192, %c4_193] : memref<8x16xf32, #tpu.memory_space<smem>>
    %319 = vector.broadcast %318 : f32 to vector<2x5x66xf32>
    %320 = arith.mulf %319, %247 : vector<2x5x66xf32>
    %321 = arith.addf %200, %320 : vector<2x5x66xf32>
    %c4_194 = arith.constant 4 : index
    %c5_195 = arith.constant 5 : index
    %322 = memref.load %arg3[%c4_194, %c5_195] : memref<8x16xf32, #tpu.memory_space<smem>>
    %323 = vector.broadcast %322 : f32 to vector<2x5x66xf32>
    %324 = arith.mulf %323, %249 : vector<2x5x66xf32>
    %325 = arith.addf %321, %324 : vector<2x5x66xf32>
    %c4_196 = arith.constant 4 : index
    %c6_197 = arith.constant 6 : index
    %326 = memref.load %arg3[%c4_196, %c6_197] : memref<8x16xf32, #tpu.memory_space<smem>>
    %327 = vector.broadcast %326 : f32 to vector<2x5x66xf32>
    %328 = arith.mulf %327, %251 : vector<2x5x66xf32>
    %329 = arith.addf %325, %328 : vector<2x5x66xf32>
    %c4_198 = arith.constant 4 : index
    %c7_199 = arith.constant 7 : index
    %330 = memref.load %arg3[%c4_198, %c7_199] : memref<8x16xf32, #tpu.memory_space<smem>>
    %331 = vector.broadcast %330 : f32 to vector<2x5x66xf32>
    %332 = arith.mulf %331, %253 : vector<2x5x66xf32>
    %333 = arith.addf %329, %332 : vector<2x5x66xf32>
    %c5_200 = arith.constant 5 : index
    %c4_201 = arith.constant 4 : index
    %334 = memref.load %arg3[%c5_200, %c4_201] : memref<8x16xf32, #tpu.memory_space<smem>>
    %335 = vector.broadcast %334 : f32 to vector<2x5x66xf32>
    %336 = arith.mulf %335, %247 : vector<2x5x66xf32>
    %337 = arith.addf %215, %336 : vector<2x5x66xf32>
    %c5_202 = arith.constant 5 : index
    %c5_203 = arith.constant 5 : index
    %338 = memref.load %arg3[%c5_202, %c5_203] : memref<8x16xf32, #tpu.memory_space<smem>>
    %339 = vector.broadcast %338 : f32 to vector<2x5x66xf32>
    %340 = arith.mulf %339, %249 : vector<2x5x66xf32>
    %341 = arith.addf %337, %340 : vector<2x5x66xf32>
    %c5_204 = arith.constant 5 : index
    %c6_205 = arith.constant 6 : index
    %342 = memref.load %arg3[%c5_204, %c6_205] : memref<8x16xf32, #tpu.memory_space<smem>>
    %343 = vector.broadcast %342 : f32 to vector<2x5x66xf32>
    %344 = arith.mulf %343, %251 : vector<2x5x66xf32>
    %345 = arith.addf %341, %344 : vector<2x5x66xf32>
    %c5_206 = arith.constant 5 : index
    %c7_207 = arith.constant 7 : index
    %346 = memref.load %arg3[%c5_206, %c7_207] : memref<8x16xf32, #tpu.memory_space<smem>>
    %347 = vector.broadcast %346 : f32 to vector<2x5x66xf32>
    %348 = arith.mulf %347, %253 : vector<2x5x66xf32>
    %349 = arith.addf %345, %348 : vector<2x5x66xf32>
    %c6_208 = arith.constant 6 : index
    %c4_209 = arith.constant 4 : index
    %350 = memref.load %arg3[%c6_208, %c4_209] : memref<8x16xf32, #tpu.memory_space<smem>>
    %351 = vector.broadcast %350 : f32 to vector<2x5x66xf32>
    %352 = arith.mulf %351, %247 : vector<2x5x66xf32>
    %353 = arith.addf %230, %352 : vector<2x5x66xf32>
    %c6_210 = arith.constant 6 : index
    %c5_211 = arith.constant 5 : index
    %354 = memref.load %arg3[%c6_210, %c5_211] : memref<8x16xf32, #tpu.memory_space<smem>>
    %355 = vector.broadcast %354 : f32 to vector<2x5x66xf32>
    %356 = arith.mulf %355, %249 : vector<2x5x66xf32>
    %357 = arith.addf %353, %356 : vector<2x5x66xf32>
    %c6_212 = arith.constant 6 : index
    %c6_213 = arith.constant 6 : index
    %358 = memref.load %arg3[%c6_212, %c6_213] : memref<8x16xf32, #tpu.memory_space<smem>>
    %359 = vector.broadcast %358 : f32 to vector<2x5x66xf32>
    %360 = arith.mulf %359, %251 : vector<2x5x66xf32>
    %361 = arith.addf %357, %360 : vector<2x5x66xf32>
    %c6_214 = arith.constant 6 : index
    %c7_215 = arith.constant 7 : index
    %362 = memref.load %arg3[%c6_214, %c7_215] : memref<8x16xf32, #tpu.memory_space<smem>>
    %363 = vector.broadcast %362 : f32 to vector<2x5x66xf32>
    %364 = arith.mulf %363, %253 : vector<2x5x66xf32>
    %365 = arith.addf %361, %364 : vector<2x5x66xf32>
    %c7_216 = arith.constant 7 : index
    %c4_217 = arith.constant 4 : index
    %366 = memref.load %arg3[%c7_216, %c4_217] : memref<8x16xf32, #tpu.memory_space<smem>>
    %367 = vector.broadcast %366 : f32 to vector<2x5x66xf32>
    %368 = arith.mulf %367, %247 : vector<2x5x66xf32>
    %369 = arith.addf %245, %368 : vector<2x5x66xf32>
    %c7_218 = arith.constant 7 : index
    %c5_219 = arith.constant 5 : index
    %370 = memref.load %arg3[%c7_218, %c5_219] : memref<8x16xf32, #tpu.memory_space<smem>>
    %371 = vector.broadcast %370 : f32 to vector<2x5x66xf32>
    %372 = arith.mulf %371, %249 : vector<2x5x66xf32>
    %373 = arith.addf %369, %372 : vector<2x5x66xf32>
    %c7_220 = arith.constant 7 : index
    %c6_221 = arith.constant 6 : index
    %374 = memref.load %arg3[%c7_220, %c6_221] : memref<8x16xf32, #tpu.memory_space<smem>>
    %375 = vector.broadcast %374 : f32 to vector<2x5x66xf32>
    %376 = arith.mulf %375, %251 : vector<2x5x66xf32>
    %377 = arith.addf %373, %376 : vector<2x5x66xf32>
    %c7_222 = arith.constant 7 : index
    %c7_223 = arith.constant 7 : index
    %378 = memref.load %arg3[%c7_222, %c7_223] : memref<8x16xf32, #tpu.memory_space<smem>>
    %379 = vector.broadcast %378 : f32 to vector<2x5x66xf32>
    %380 = arith.mulf %379, %253 : vector<2x5x66xf32>
    %381 = arith.addf %377, %380 : vector<2x5x66xf32>
    %c2_224 = arith.constant 2 : index
    %c0_225 = arith.constant 0 : index
    %c0_226 = arith.constant 0 : index
    %c0_227 = arith.constant 0 : index
    %382 = vector.load %arg14[%c2_224, %c0_225, %c0_226, %c0_227] : memref<4x2x6x67xf32, #tpu.memory_space<vmem>>, vector<1x2x5x66xf32>
    %383 = vector.shape_cast %382 : vector<1x2x5x66xf32> to vector<2x5x66xf32>
    %c2_228 = arith.constant 2 : index
    %c0_229 = arith.constant 0 : index
    %c1_230 = arith.constant 1 : index
    %c0_231 = arith.constant 0 : index
    %384 = vector.load %arg14[%c2_228, %c0_229, %c1_230, %c0_231] : memref<4x2x6x67xf32, #tpu.memory_space<vmem>>, vector<1x2x5x66xf32>
    %385 = vector.shape_cast %384 : vector<1x2x5x66xf32> to vector<2x5x66xf32>
    %c2_232 = arith.constant 2 : index
    %c0_233 = arith.constant 0 : index
    %c0_234 = arith.constant 0 : index
    %c1_235 = arith.constant 1 : index
    %386 = vector.load %arg14[%c2_232, %c0_233, %c0_234, %c1_235] : memref<4x2x6x67xf32, #tpu.memory_space<vmem>>, vector<1x2x5x66xf32>
    %387 = vector.shape_cast %386 : vector<1x2x5x66xf32> to vector<2x5x66xf32>
    %c2_236 = arith.constant 2 : index
    %c0_237 = arith.constant 0 : index
    %c1_238 = arith.constant 1 : index
    %c1_239 = arith.constant 1 : index
    %388 = vector.load %arg14[%c2_236, %c0_237, %c1_238, %c1_239] : memref<4x2x6x67xf32, #tpu.memory_space<vmem>>, vector<1x2x5x66xf32>
    %389 = vector.shape_cast %388 : vector<1x2x5x66xf32> to vector<2x5x66xf32>
    %c0_240 = arith.constant 0 : index
    %c8 = arith.constant 8 : index
    %390 = memref.load %arg3[%c0_240, %c8] : memref<8x16xf32, #tpu.memory_space<smem>>
    %391 = vector.broadcast %390 : f32 to vector<2x5x66xf32>
    %392 = arith.mulf %391, %383 : vector<2x5x66xf32>
    %393 = arith.addf %269, %392 : vector<2x5x66xf32>
    %c0_241 = arith.constant 0 : index
    %c9 = arith.constant 9 : index
    %394 = memref.load %arg3[%c0_241, %c9] : memref<8x16xf32, #tpu.memory_space<smem>>
    %395 = vector.broadcast %394 : f32 to vector<2x5x66xf32>
    %396 = arith.mulf %395, %385 : vector<2x5x66xf32>
    %397 = arith.addf %393, %396 : vector<2x5x66xf32>
    %c0_242 = arith.constant 0 : index
    %c10 = arith.constant 10 : index
    %398 = memref.load %arg3[%c0_242, %c10] : memref<8x16xf32, #tpu.memory_space<smem>>
    %399 = vector.broadcast %398 : f32 to vector<2x5x66xf32>
    %400 = arith.mulf %399, %387 : vector<2x5x66xf32>
    %401 = arith.addf %397, %400 : vector<2x5x66xf32>
    %c0_243 = arith.constant 0 : index
    %c11 = arith.constant 11 : index
    %402 = memref.load %arg3[%c0_243, %c11] : memref<8x16xf32, #tpu.memory_space<smem>>
    %403 = vector.broadcast %402 : f32 to vector<2x5x66xf32>
    %404 = arith.mulf %403, %389 : vector<2x5x66xf32>
    %405 = arith.addf %401, %404 : vector<2x5x66xf32>
    %c1_244 = arith.constant 1 : index
    %c8_245 = arith.constant 8 : index
    %406 = memref.load %arg3[%c1_244, %c8_245] : memref<8x16xf32, #tpu.memory_space<smem>>
    %407 = vector.broadcast %406 : f32 to vector<2x5x66xf32>
    %408 = arith.mulf %407, %383 : vector<2x5x66xf32>
    %409 = arith.addf %285, %408 : vector<2x5x66xf32>
    %c1_246 = arith.constant 1 : index
    %c9_247 = arith.constant 9 : index
    %410 = memref.load %arg3[%c1_246, %c9_247] : memref<8x16xf32, #tpu.memory_space<smem>>
    %411 = vector.broadcast %410 : f32 to vector<2x5x66xf32>
    %412 = arith.mulf %411, %385 : vector<2x5x66xf32>
    %413 = arith.addf %409, %412 : vector<2x5x66xf32>
    %c1_248 = arith.constant 1 : index
    %c10_249 = arith.constant 10 : index
    %414 = memref.load %arg3[%c1_248, %c10_249] : memref<8x16xf32, #tpu.memory_space<smem>>
    %415 = vector.broadcast %414 : f32 to vector<2x5x66xf32>
    %416 = arith.mulf %415, %387 : vector<2x5x66xf32>
    %417 = arith.addf %413, %416 : vector<2x5x66xf32>
    %c1_250 = arith.constant 1 : index
    %c11_251 = arith.constant 11 : index
    %418 = memref.load %arg3[%c1_250, %c11_251] : memref<8x16xf32, #tpu.memory_space<smem>>
    %419 = vector.broadcast %418 : f32 to vector<2x5x66xf32>
    %420 = arith.mulf %419, %389 : vector<2x5x66xf32>
    %421 = arith.addf %417, %420 : vector<2x5x66xf32>
    %c2_252 = arith.constant 2 : index
    %c8_253 = arith.constant 8 : index
    %422 = memref.load %arg3[%c2_252, %c8_253] : memref<8x16xf32, #tpu.memory_space<smem>>
    %423 = vector.broadcast %422 : f32 to vector<2x5x66xf32>
    %424 = arith.mulf %423, %383 : vector<2x5x66xf32>
    %425 = arith.addf %301, %424 : vector<2x5x66xf32>
    %c2_254 = arith.constant 2 : index
    %c9_255 = arith.constant 9 : index
    %426 = memref.load %arg3[%c2_254, %c9_255] : memref<8x16xf32, #tpu.memory_space<smem>>
    %427 = vector.broadcast %426 : f32 to vector<2x5x66xf32>
    %428 = arith.mulf %427, %385 : vector<2x5x66xf32>
    %429 = arith.addf %425, %428 : vector<2x5x66xf32>
    %c2_256 = arith.constant 2 : index
    %c10_257 = arith.constant 10 : index
    %430 = memref.load %arg3[%c2_256, %c10_257] : memref<8x16xf32, #tpu.memory_space<smem>>
    %431 = vector.broadcast %430 : f32 to vector<2x5x66xf32>
    %432 = arith.mulf %431, %387 : vector<2x5x66xf32>
    %433 = arith.addf %429, %432 : vector<2x5x66xf32>
    %c2_258 = arith.constant 2 : index
    %c11_259 = arith.constant 11 : index
    %434 = memref.load %arg3[%c2_258, %c11_259] : memref<8x16xf32, #tpu.memory_space<smem>>
    %435 = vector.broadcast %434 : f32 to vector<2x5x66xf32>
    %436 = arith.mulf %435, %389 : vector<2x5x66xf32>
    %437 = arith.addf %433, %436 : vector<2x5x66xf32>
    %c3_260 = arith.constant 3 : index
    %c8_261 = arith.constant 8 : index
    %438 = memref.load %arg3[%c3_260, %c8_261] : memref<8x16xf32, #tpu.memory_space<smem>>
    %439 = vector.broadcast %438 : f32 to vector<2x5x66xf32>
    %440 = arith.mulf %439, %383 : vector<2x5x66xf32>
    %441 = arith.addf %317, %440 : vector<2x5x66xf32>
    %c3_262 = arith.constant 3 : index
    %c9_263 = arith.constant 9 : index
    %442 = memref.load %arg3[%c3_262, %c9_263] : memref<8x16xf32, #tpu.memory_space<smem>>
    %443 = vector.broadcast %442 : f32 to vector<2x5x66xf32>
    %444 = arith.mulf %443, %385 : vector<2x5x66xf32>
    %445 = arith.addf %441, %444 : vector<2x5x66xf32>
    %c3_264 = arith.constant 3 : index
    %c10_265 = arith.constant 10 : index
    %446 = memref.load %arg3[%c3_264, %c10_265] : memref<8x16xf32, #tpu.memory_space<smem>>
    %447 = vector.broadcast %446 : f32 to vector<2x5x66xf32>
    %448 = arith.mulf %447, %387 : vector<2x5x66xf32>
    %449 = arith.addf %445, %448 : vector<2x5x66xf32>
    %c3_266 = arith.constant 3 : index
    %c11_267 = arith.constant 11 : index
    %450 = memref.load %arg3[%c3_266, %c11_267] : memref<8x16xf32, #tpu.memory_space<smem>>
    %451 = vector.broadcast %450 : f32 to vector<2x5x66xf32>
    %452 = arith.mulf %451, %389 : vector<2x5x66xf32>
    %453 = arith.addf %449, %452 : vector<2x5x66xf32>
    %c4_268 = arith.constant 4 : index
    %c8_269 = arith.constant 8 : index
    %454 = memref.load %arg3[%c4_268, %c8_269] : memref<8x16xf32, #tpu.memory_space<smem>>
    %455 = vector.broadcast %454 : f32 to vector<2x5x66xf32>
    %456 = arith.mulf %455, %383 : vector<2x5x66xf32>
    %457 = arith.addf %333, %456 : vector<2x5x66xf32>
    %c4_270 = arith.constant 4 : index
    %c9_271 = arith.constant 9 : index
    %458 = memref.load %arg3[%c4_270, %c9_271] : memref<8x16xf32, #tpu.memory_space<smem>>
    %459 = vector.broadcast %458 : f32 to vector<2x5x66xf32>
    %460 = arith.mulf %459, %385 : vector<2x5x66xf32>
    %461 = arith.addf %457, %460 : vector<2x5x66xf32>
    %c4_272 = arith.constant 4 : index
    %c10_273 = arith.constant 10 : index
    %462 = memref.load %arg3[%c4_272, %c10_273] : memref<8x16xf32, #tpu.memory_space<smem>>
    %463 = vector.broadcast %462 : f32 to vector<2x5x66xf32>
    %464 = arith.mulf %463, %387 : vector<2x5x66xf32>
    %465 = arith.addf %461, %464 : vector<2x5x66xf32>
    %c4_274 = arith.constant 4 : index
    %c11_275 = arith.constant 11 : index
    %466 = memref.load %arg3[%c4_274, %c11_275] : memref<8x16xf32, #tpu.memory_space<smem>>
    %467 = vector.broadcast %466 : f32 to vector<2x5x66xf32>
    %468 = arith.mulf %467, %389 : vector<2x5x66xf32>
    %469 = arith.addf %465, %468 : vector<2x5x66xf32>
    %c5_276 = arith.constant 5 : index
    %c8_277 = arith.constant 8 : index
    %470 = memref.load %arg3[%c5_276, %c8_277] : memref<8x16xf32, #tpu.memory_space<smem>>
    %471 = vector.broadcast %470 : f32 to vector<2x5x66xf32>
    %472 = arith.mulf %471, %383 : vector<2x5x66xf32>
    %473 = arith.addf %349, %472 : vector<2x5x66xf32>
    %c5_278 = arith.constant 5 : index
    %c9_279 = arith.constant 9 : index
    %474 = memref.load %arg3[%c5_278, %c9_279] : memref<8x16xf32, #tpu.memory_space<smem>>
    %475 = vector.broadcast %474 : f32 to vector<2x5x66xf32>
    %476 = arith.mulf %475, %385 : vector<2x5x66xf32>
    %477 = arith.addf %473, %476 : vector<2x5x66xf32>
    %c5_280 = arith.constant 5 : index
    %c10_281 = arith.constant 10 : index
    %478 = memref.load %arg3[%c5_280, %c10_281] : memref<8x16xf32, #tpu.memory_space<smem>>
    %479 = vector.broadcast %478 : f32 to vector<2x5x66xf32>
    %480 = arith.mulf %479, %387 : vector<2x5x66xf32>
    %481 = arith.addf %477, %480 : vector<2x5x66xf32>
    %c5_282 = arith.constant 5 : index
    %c11_283 = arith.constant 11 : index
    %482 = memref.load %arg3[%c5_282, %c11_283] : memref<8x16xf32, #tpu.memory_space<smem>>
    %483 = vector.broadcast %482 : f32 to vector<2x5x66xf32>
    %484 = arith.mulf %483, %389 : vector<2x5x66xf32>
    %485 = arith.addf %481, %484 : vector<2x5x66xf32>
    %c6_284 = arith.constant 6 : index
    %c8_285 = arith.constant 8 : index
    %486 = memref.load %arg3[%c6_284, %c8_285] : memref<8x16xf32, #tpu.memory_space<smem>>
    %487 = vector.broadcast %486 : f32 to vector<2x5x66xf32>
    %488 = arith.mulf %487, %383 : vector<2x5x66xf32>
    %489 = arith.addf %365, %488 : vector<2x5x66xf32>
    %c6_286 = arith.constant 6 : index
    %c9_287 = arith.constant 9 : index
    %490 = memref.load %arg3[%c6_286, %c9_287] : memref<8x16xf32, #tpu.memory_space<smem>>
    %491 = vector.broadcast %490 : f32 to vector<2x5x66xf32>
    %492 = arith.mulf %491, %385 : vector<2x5x66xf32>
    %493 = arith.addf %489, %492 : vector<2x5x66xf32>
    %c6_288 = arith.constant 6 : index
    %c10_289 = arith.constant 10 : index
    %494 = memref.load %arg3[%c6_288, %c10_289] : memref<8x16xf32, #tpu.memory_space<smem>>
    %495 = vector.broadcast %494 : f32 to vector<2x5x66xf32>
    %496 = arith.mulf %495, %387 : vector<2x5x66xf32>
    %497 = arith.addf %493, %496 : vector<2x5x66xf32>
    %c6_290 = arith.constant 6 : index
    %c11_291 = arith.constant 11 : index
    %498 = memref.load %arg3[%c6_290, %c11_291] : memref<8x16xf32, #tpu.memory_space<smem>>
    %499 = vector.broadcast %498 : f32 to vector<2x5x66xf32>
    %500 = arith.mulf %499, %389 : vector<2x5x66xf32>
    %501 = arith.addf %497, %500 : vector<2x5x66xf32>
    %c7_292 = arith.constant 7 : index
    %c8_293 = arith.constant 8 : index
    %502 = memref.load %arg3[%c7_292, %c8_293] : memref<8x16xf32, #tpu.memory_space<smem>>
    %503 = vector.broadcast %502 : f32 to vector<2x5x66xf32>
    %504 = arith.mulf %503, %383 : vector<2x5x66xf32>
    %505 = arith.addf %381, %504 : vector<2x5x66xf32>
    %c7_294 = arith.constant 7 : index
    %c9_295 = arith.constant 9 : index
    %506 = memref.load %arg3[%c7_294, %c9_295] : memref<8x16xf32, #tpu.memory_space<smem>>
    %507 = vector.broadcast %506 : f32 to vector<2x5x66xf32>
    %508 = arith.mulf %507, %385 : vector<2x5x66xf32>
    %509 = arith.addf %505, %508 : vector<2x5x66xf32>
    %c7_296 = arith.constant 7 : index
    %c10_297 = arith.constant 10 : index
    %510 = memref.load %arg3[%c7_296, %c10_297] : memref<8x16xf32, #tpu.memory_space<smem>>
    %511 = vector.broadcast %510 : f32 to vector<2x5x66xf32>
    %512 = arith.mulf %511, %387 : vector<2x5x66xf32>
    %513 = arith.addf %509, %512 : vector<2x5x66xf32>
    %c7_298 = arith.constant 7 : index
    %c11_299 = arith.constant 11 : index
    %514 = memref.load %arg3[%c7_298, %c11_299] : memref<8x16xf32, #tpu.memory_space<smem>>
    %515 = vector.broadcast %514 : f32 to vector<2x5x66xf32>
    %516 = arith.mulf %515, %389 : vector<2x5x66xf32>
    %517 = arith.addf %513, %516 : vector<2x5x66xf32>
    %c3_300 = arith.constant 3 : index
    %c0_301 = arith.constant 0 : index
    %c0_302 = arith.constant 0 : index
    %c0_303 = arith.constant 0 : index
    %518 = vector.load %arg14[%c3_300, %c0_301, %c0_302, %c0_303] : memref<4x2x6x67xf32, #tpu.memory_space<vmem>>, vector<1x2x5x66xf32>
    %519 = vector.shape_cast %518 : vector<1x2x5x66xf32> to vector<2x5x66xf32>
    %c3_304 = arith.constant 3 : index
    %c0_305 = arith.constant 0 : index
    %c1_306 = arith.constant 1 : index
    %c0_307 = arith.constant 0 : index
    %520 = vector.load %arg14[%c3_304, %c0_305, %c1_306, %c0_307] : memref<4x2x6x67xf32, #tpu.memory_space<vmem>>, vector<1x2x5x66xf32>
    %521 = vector.shape_cast %520 : vector<1x2x5x66xf32> to vector<2x5x66xf32>
    %c3_308 = arith.constant 3 : index
    %c0_309 = arith.constant 0 : index
    %c0_310 = arith.constant 0 : index
    %c1_311 = arith.constant 1 : index
    %522 = vector.load %arg14[%c3_308, %c0_309, %c0_310, %c1_311] : memref<4x2x6x67xf32, #tpu.memory_space<vmem>>, vector<1x2x5x66xf32>
    %523 = vector.shape_cast %522 : vector<1x2x5x66xf32> to vector<2x5x66xf32>
    %c3_312 = arith.constant 3 : index
    %c0_313 = arith.constant 0 : index
    %c1_314 = arith.constant 1 : index
    %c1_315 = arith.constant 1 : index
    %524 = vector.load %arg14[%c3_312, %c0_313, %c1_314, %c1_315] : memref<4x2x6x67xf32, #tpu.memory_space<vmem>>, vector<1x2x5x66xf32>
    %525 = vector.shape_cast %524 : vector<1x2x5x66xf32> to vector<2x5x66xf32>
    %c0_316 = arith.constant 0 : index
    %c12 = arith.constant 12 : index
    %526 = memref.load %arg3[%c0_316, %c12] : memref<8x16xf32, #tpu.memory_space<smem>>
    %527 = vector.broadcast %526 : f32 to vector<2x5x66xf32>
    %528 = arith.mulf %527, %519 : vector<2x5x66xf32>
    %529 = arith.addf %405, %528 : vector<2x5x66xf32>
    %c0_317 = arith.constant 0 : index
    %c13 = arith.constant 13 : index
    %530 = memref.load %arg3[%c0_317, %c13] : memref<8x16xf32, #tpu.memory_space<smem>>
    %531 = vector.broadcast %530 : f32 to vector<2x5x66xf32>
    %532 = arith.mulf %531, %521 : vector<2x5x66xf32>
    %533 = arith.addf %529, %532 : vector<2x5x66xf32>
    %c0_318 = arith.constant 0 : index
    %c14 = arith.constant 14 : index
    %534 = memref.load %arg3[%c0_318, %c14] : memref<8x16xf32, #tpu.memory_space<smem>>
    %535 = vector.broadcast %534 : f32 to vector<2x5x66xf32>
    %536 = arith.mulf %535, %523 : vector<2x5x66xf32>
    %537 = arith.addf %533, %536 : vector<2x5x66xf32>
    %c0_319 = arith.constant 0 : index
    %c15 = arith.constant 15 : index
    %538 = memref.load %arg3[%c0_319, %c15] : memref<8x16xf32, #tpu.memory_space<smem>>
    %539 = vector.broadcast %538 : f32 to vector<2x5x66xf32>
    %540 = arith.mulf %539, %525 : vector<2x5x66xf32>
    %541 = arith.addf %537, %540 : vector<2x5x66xf32>
    %c1_320 = arith.constant 1 : index
    %c12_321 = arith.constant 12 : index
    %542 = memref.load %arg3[%c1_320, %c12_321] : memref<8x16xf32, #tpu.memory_space<smem>>
    %543 = vector.broadcast %542 : f32 to vector<2x5x66xf32>
    %544 = arith.mulf %543, %519 : vector<2x5x66xf32>
    %545 = arith.addf %421, %544 : vector<2x5x66xf32>
    %c1_322 = arith.constant 1 : index
    %c13_323 = arith.constant 13 : index
    %546 = memref.load %arg3[%c1_322, %c13_323] : memref<8x16xf32, #tpu.memory_space<smem>>
    %547 = vector.broadcast %546 : f32 to vector<2x5x66xf32>
    %548 = arith.mulf %547, %521 : vector<2x5x66xf32>
    %549 = arith.addf %545, %548 : vector<2x5x66xf32>
    %c1_324 = arith.constant 1 : index
    %c14_325 = arith.constant 14 : index
    %550 = memref.load %arg3[%c1_324, %c14_325] : memref<8x16xf32, #tpu.memory_space<smem>>
    %551 = vector.broadcast %550 : f32 to vector<2x5x66xf32>
    %552 = arith.mulf %551, %523 : vector<2x5x66xf32>
    %553 = arith.addf %549, %552 : vector<2x5x66xf32>
    %c1_326 = arith.constant 1 : index
    %c15_327 = arith.constant 15 : index
    %554 = memref.load %arg3[%c1_326, %c15_327] : memref<8x16xf32, #tpu.memory_space<smem>>
    %555 = vector.broadcast %554 : f32 to vector<2x5x66xf32>
    %556 = arith.mulf %555, %525 : vector<2x5x66xf32>
    %557 = arith.addf %553, %556 : vector<2x5x66xf32>
    %c2_328 = arith.constant 2 : index
    %c12_329 = arith.constant 12 : index
    %558 = memref.load %arg3[%c2_328, %c12_329] : memref<8x16xf32, #tpu.memory_space<smem>>
    %559 = vector.broadcast %558 : f32 to vector<2x5x66xf32>
    %560 = arith.mulf %559, %519 : vector<2x5x66xf32>
    %561 = arith.addf %437, %560 : vector<2x5x66xf32>
    %c2_330 = arith.constant 2 : index
    %c13_331 = arith.constant 13 : index
    %562 = memref.load %arg3[%c2_330, %c13_331] : memref<8x16xf32, #tpu.memory_space<smem>>
    %563 = vector.broadcast %562 : f32 to vector<2x5x66xf32>
    %564 = arith.mulf %563, %521 : vector<2x5x66xf32>
    %565 = arith.addf %561, %564 : vector<2x5x66xf32>
    %c2_332 = arith.constant 2 : index
    %c14_333 = arith.constant 14 : index
    %566 = memref.load %arg3[%c2_332, %c14_333] : memref<8x16xf32, #tpu.memory_space<smem>>
    %567 = vector.broadcast %566 : f32 to vector<2x5x66xf32>
    %568 = arith.mulf %567, %523 : vector<2x5x66xf32>
    %569 = arith.addf %565, %568 : vector<2x5x66xf32>
    %c2_334 = arith.constant 2 : index
    %c15_335 = arith.constant 15 : index
    %570 = memref.load %arg3[%c2_334, %c15_335] : memref<8x16xf32, #tpu.memory_space<smem>>
    %571 = vector.broadcast %570 : f32 to vector<2x5x66xf32>
    %572 = arith.mulf %571, %525 : vector<2x5x66xf32>
    %573 = arith.addf %569, %572 : vector<2x5x66xf32>
    %c3_336 = arith.constant 3 : index
    %c12_337 = arith.constant 12 : index
    %574 = memref.load %arg3[%c3_336, %c12_337] : memref<8x16xf32, #tpu.memory_space<smem>>
    %575 = vector.broadcast %574 : f32 to vector<2x5x66xf32>
    %576 = arith.mulf %575, %519 : vector<2x5x66xf32>
    %577 = arith.addf %453, %576 : vector<2x5x66xf32>
    %c3_338 = arith.constant 3 : index
    %c13_339 = arith.constant 13 : index
    %578 = memref.load %arg3[%c3_338, %c13_339] : memref<8x16xf32, #tpu.memory_space<smem>>
    %579 = vector.broadcast %578 : f32 to vector<2x5x66xf32>
    %580 = arith.mulf %579, %521 : vector<2x5x66xf32>
    %581 = arith.addf %577, %580 : vector<2x5x66xf32>
    %c3_340 = arith.constant 3 : index
    %c14_341 = arith.constant 14 : index
    %582 = memref.load %arg3[%c3_340, %c14_341] : memref<8x16xf32, #tpu.memory_space<smem>>
    %583 = vector.broadcast %582 : f32 to vector<2x5x66xf32>
    %584 = arith.mulf %583, %523 : vector<2x5x66xf32>
    %585 = arith.addf %581, %584 : vector<2x5x66xf32>
    %c3_342 = arith.constant 3 : index
    %c15_343 = arith.constant 15 : index
    %586 = memref.load %arg3[%c3_342, %c15_343] : memref<8x16xf32, #tpu.memory_space<smem>>
    %587 = vector.broadcast %586 : f32 to vector<2x5x66xf32>
    %588 = arith.mulf %587, %525 : vector<2x5x66xf32>
    %589 = arith.addf %585, %588 : vector<2x5x66xf32>
    %c4_344 = arith.constant 4 : index
    %c12_345 = arith.constant 12 : index
    %590 = memref.load %arg3[%c4_344, %c12_345] : memref<8x16xf32, #tpu.memory_space<smem>>
    %591 = vector.broadcast %590 : f32 to vector<2x5x66xf32>
    %592 = arith.mulf %591, %519 : vector<2x5x66xf32>
    %593 = arith.addf %469, %592 : vector<2x5x66xf32>
    %c4_346 = arith.constant 4 : index
    %c13_347 = arith.constant 13 : index
    %594 = memref.load %arg3[%c4_346, %c13_347] : memref<8x16xf32, #tpu.memory_space<smem>>
    %595 = vector.broadcast %594 : f32 to vector<2x5x66xf32>
    %596 = arith.mulf %595, %521 : vector<2x5x66xf32>
    %597 = arith.addf %593, %596 : vector<2x5x66xf32>
    %c4_348 = arith.constant 4 : index
    %c14_349 = arith.constant 14 : index
    %598 = memref.load %arg3[%c4_348, %c14_349] : memref<8x16xf32, #tpu.memory_space<smem>>
    %599 = vector.broadcast %598 : f32 to vector<2x5x66xf32>
    %600 = arith.mulf %599, %523 : vector<2x5x66xf32>
    %601 = arith.addf %597, %600 : vector<2x5x66xf32>
    %c4_350 = arith.constant 4 : index
    %c15_351 = arith.constant 15 : index
    %602 = memref.load %arg3[%c4_350, %c15_351] : memref<8x16xf32, #tpu.memory_space<smem>>
    %603 = vector.broadcast %602 : f32 to vector<2x5x66xf32>
    %604 = arith.mulf %603, %525 : vector<2x5x66xf32>
    %605 = arith.addf %601, %604 : vector<2x5x66xf32>
    %c5_352 = arith.constant 5 : index
    %c12_353 = arith.constant 12 : index
    %606 = memref.load %arg3[%c5_352, %c12_353] : memref<8x16xf32, #tpu.memory_space<smem>>
    %607 = vector.broadcast %606 : f32 to vector<2x5x66xf32>
    %608 = arith.mulf %607, %519 : vector<2x5x66xf32>
    %609 = arith.addf %485, %608 : vector<2x5x66xf32>
    %c5_354 = arith.constant 5 : index
    %c13_355 = arith.constant 13 : index
    %610 = memref.load %arg3[%c5_354, %c13_355] : memref<8x16xf32, #tpu.memory_space<smem>>
    %611 = vector.broadcast %610 : f32 to vector<2x5x66xf32>
    %612 = arith.mulf %611, %521 : vector<2x5x66xf32>
    %613 = arith.addf %609, %612 : vector<2x5x66xf32>
    %c5_356 = arith.constant 5 : index
    %c14_357 = arith.constant 14 : index
    %614 = memref.load %arg3[%c5_356, %c14_357] : memref<8x16xf32, #tpu.memory_space<smem>>
    %615 = vector.broadcast %614 : f32 to vector<2x5x66xf32>
    %616 = arith.mulf %615, %523 : vector<2x5x66xf32>
    %617 = arith.addf %613, %616 : vector<2x5x66xf32>
    %c5_358 = arith.constant 5 : index
    %c15_359 = arith.constant 15 : index
    %618 = memref.load %arg3[%c5_358, %c15_359] : memref<8x16xf32, #tpu.memory_space<smem>>
    %619 = vector.broadcast %618 : f32 to vector<2x5x66xf32>
    %620 = arith.mulf %619, %525 : vector<2x5x66xf32>
    %621 = arith.addf %617, %620 : vector<2x5x66xf32>
    %c6_360 = arith.constant 6 : index
    %c12_361 = arith.constant 12 : index
    %622 = memref.load %arg3[%c6_360, %c12_361] : memref<8x16xf32, #tpu.memory_space<smem>>
    %623 = vector.broadcast %622 : f32 to vector<2x5x66xf32>
    %624 = arith.mulf %623, %519 : vector<2x5x66xf32>
    %625 = arith.addf %501, %624 : vector<2x5x66xf32>
    %c6_362 = arith.constant 6 : index
    %c13_363 = arith.constant 13 : index
    %626 = memref.load %arg3[%c6_362, %c13_363] : memref<8x16xf32, #tpu.memory_space<smem>>
    %627 = vector.broadcast %626 : f32 to vector<2x5x66xf32>
    %628 = arith.mulf %627, %521 : vector<2x5x66xf32>
    %629 = arith.addf %625, %628 : vector<2x5x66xf32>
    %c6_364 = arith.constant 6 : index
    %c14_365 = arith.constant 14 : index
    %630 = memref.load %arg3[%c6_364, %c14_365] : memref<8x16xf32, #tpu.memory_space<smem>>
    %631 = vector.broadcast %630 : f32 to vector<2x5x66xf32>
    %632 = arith.mulf %631, %523 : vector<2x5x66xf32>
    %633 = arith.addf %629, %632 : vector<2x5x66xf32>
    %c6_366 = arith.constant 6 : index
    %c15_367 = arith.constant 15 : index
    %634 = memref.load %arg3[%c6_366, %c15_367] : memref<8x16xf32, #tpu.memory_space<smem>>
    %635 = vector.broadcast %634 : f32 to vector<2x5x66xf32>
    %636 = arith.mulf %635, %525 : vector<2x5x66xf32>
    %637 = arith.addf %633, %636 : vector<2x5x66xf32>
    %c7_368 = arith.constant 7 : index
    %c12_369 = arith.constant 12 : index
    %638 = memref.load %arg3[%c7_368, %c12_369] : memref<8x16xf32, #tpu.memory_space<smem>>
    %639 = vector.broadcast %638 : f32 to vector<2x5x66xf32>
    %640 = arith.mulf %639, %519 : vector<2x5x66xf32>
    %641 = arith.addf %517, %640 : vector<2x5x66xf32>
    %c7_370 = arith.constant 7 : index
    %c13_371 = arith.constant 13 : index
    %642 = memref.load %arg3[%c7_370, %c13_371] : memref<8x16xf32, #tpu.memory_space<smem>>
    %643 = vector.broadcast %642 : f32 to vector<2x5x66xf32>
    %644 = arith.mulf %643, %521 : vector<2x5x66xf32>
    %645 = arith.addf %641, %644 : vector<2x5x66xf32>
    %c7_372 = arith.constant 7 : index
    %c14_373 = arith.constant 14 : index
    %646 = memref.load %arg3[%c7_372, %c14_373] : memref<8x16xf32, #tpu.memory_space<smem>>
    %647 = vector.broadcast %646 : f32 to vector<2x5x66xf32>
    %648 = arith.mulf %647, %523 : vector<2x5x66xf32>
    %649 = arith.addf %645, %648 : vector<2x5x66xf32>
    %c7_374 = arith.constant 7 : index
    %c15_375 = arith.constant 15 : index
    %650 = memref.load %arg3[%c7_374, %c15_375] : memref<8x16xf32, #tpu.memory_space<smem>>
    %651 = vector.broadcast %650 : f32 to vector<2x5x66xf32>
    %652 = arith.mulf %651, %525 : vector<2x5x66xf32>
    %653 = arith.addf %649, %652 : vector<2x5x66xf32>
    %c0_376 = arith.constant 0 : index
    %c0_377 = arith.constant 0 : index
    %654 = memref.load %arg4[%c0_376, %c0_377] : memref<1x8xf32, #tpu.memory_space<smem>>
    %655 = vector.extract_strided_slice %541 {offsets = [0, 0, 0], sizes = [2, 1, 64], strides = [1, 1, 1]} : vector<2x5x66xf32> to vector<2x1x64xf32>
    %656 = vector.shape_cast %655 : vector<2x1x64xf32> to vector<2x64xf32>
    %657 = vector.extract_strided_slice %541 {offsets = [0, 0, 2], sizes = [2, 1, 64], strides = [1, 1, 1]} : vector<2x5x66xf32> to vector<2x1x64xf32>
    %658 = vector.shape_cast %657 : vector<2x1x64xf32> to vector<2x64xf32>
    %659 = arith.maximumf %656, %658 : vector<2x64xf32>
    %660 = vector.extract_strided_slice %541 {offsets = [0, 2, 0], sizes = [2, 1, 64], strides = [1, 1, 1]} : vector<2x5x66xf32> to vector<2x1x64xf32>
    %661 = vector.shape_cast %660 : vector<2x1x64xf32> to vector<2x64xf32>
    %662 = vector.extract_strided_slice %541 {offsets = [0, 2, 2], sizes = [2, 1, 64], strides = [1, 1, 1]} : vector<2x5x66xf32> to vector<2x1x64xf32>
    %663 = vector.shape_cast %662 : vector<2x1x64xf32> to vector<2x64xf32>
    %664 = arith.maximumf %661, %663 : vector<2x64xf32>
    %665 = arith.maximumf %659, %664 : vector<2x64xf32>
    %666 = vector.broadcast %654 : f32 to vector<2x64xf32>
    %667 = arith.addf %665, %666 : vector<2x64xf32>
    %c0_378 = arith.constant 0 : index
    %c0_379 = arith.constant 0 : index
    %668 = vector.load %arg15[%c0_378, %c0_379] : memref<2x1024xf32, #tpu.memory_space<vmem>>, vector<2x64xf32>
    tpu.vector_store %arg15[%c0_378, %c0_379], %667 {strides = array<i32>} : memref<2x1024xf32, #tpu.memory_space<vmem>>, vector<2x64xf32>,
    %669 = vector.extract_strided_slice %541 {offsets = [0, 2, 0], sizes = [2, 1, 64], strides = [1, 1, 1]} : vector<2x5x66xf32> to vector<2x1x64xf32>
    %670 = vector.shape_cast %669 : vector<2x1x64xf32> to vector<2x64xf32>
    %671 = vector.extract_strided_slice %541 {offsets = [0, 2, 2], sizes = [2, 1, 64], strides = [1, 1, 1]} : vector<2x5x66xf32> to vector<2x1x64xf32>
    %672 = vector.shape_cast %671 : vector<2x1x64xf32> to vector<2x64xf32>
    %673 = arith.maximumf %670, %672 : vector<2x64xf32>
    %674 = vector.extract_strided_slice %541 {offsets = [0, 4, 0], sizes = [2, 1, 64], strides = [1, 1, 1]} : vector<2x5x66xf32> to vector<2x1x64xf32>
    %675 = vector.shape_cast %674 : vector<2x1x64xf32> to vector<2x64xf32>
    %676 = vector.extract_strided_slice %541 {offsets = [0, 4, 2], sizes = [2, 1, 64], strides = [1, 1, 1]} : vector<2x5x66xf32> to vector<2x1x64xf32>
    %677 = vector.shape_cast %676 : vector<2x1x64xf32> to vector<2x64xf32>
    %678 = arith.maximumf %675, %677 : vector<2x64xf32>
    %679 = arith.maximumf %673, %678 : vector<2x64xf32>
    %680 = vector.broadcast %654 : f32 to vector<2x64xf32>
    %681 = arith.addf %679, %680 : vector<2x64xf32>
    %c0_380 = arith.constant 0 : index
    %c64 = arith.constant 64 : index
    %682 = vector.load %arg15[%c0_380, %c64] : memref<2x1024xf32, #tpu.memory_space<vmem>>, vector<2x64xf32>
    tpu.vector_store %arg15[%c0_380, %c64], %681 {strides = array<i32>} : memref<2x1024xf32, #tpu.memory_space<vmem>>, vector<2x64xf32>,
    %c0_381 = arith.constant 0 : index
    %c1_382 = arith.constant 1 : index
    %683 = memref.load %arg4[%c0_381, %c1_382] : memref<1x8xf32, #tpu.memory_space<smem>>
    %684 = vector.extract_strided_slice %557 {offsets = [0, 0, 0], sizes = [2, 1, 64], strides = [1, 1, 1]} : vector<2x5x66xf32> to vector<2x1x64xf32>
    %685 = vector.shape_cast %684 : vector<2x1x64xf32> to vector<2x64xf32>
    %686 = vector.extract_strided_slice %557 {offsets = [0, 0, 2], sizes = [2, 1, 64], strides = [1, 1, 1]} : vector<2x5x66xf32> to vector<2x1x64xf32>
    %687 = vector.shape_cast %686 : vector<2x1x64xf32> to vector<2x64xf32>
    %688 = arith.maximumf %685, %687 : vector<2x64xf32>
    %689 = vector.extract_strided_slice %557 {offsets = [0, 2, 0], sizes = [2, 1, 64], strides = [1, 1, 1]} : vector<2x5x66xf32> to vector<2x1x64xf32>
    %690 = vector.shape_cast %689 : vector<2x1x64xf32> to vector<2x64xf32>
    %691 = vector.extract_strided_slice %557 {offsets = [0, 2, 2], sizes = [2, 1, 64], strides = [1, 1, 1]} : vector<2x5x66xf32> to vector<2x1x64xf32>
    %692 = vector.shape_cast %691 : vector<2x1x64xf32> to vector<2x64xf32>
    %693 = arith.maximumf %690, %692 : vector<2x64xf32>
    %694 = arith.maximumf %688, %693 : vector<2x64xf32>
    %695 = vector.broadcast %683 : f32 to vector<2x64xf32>
    %696 = arith.addf %694, %695 : vector<2x64xf32>
    %c0_383 = arith.constant 0 : index
    %c128 = arith.constant 128 : index
    %697 = vector.load %arg15[%c0_383, %c128] : memref<2x1024xf32, #tpu.memory_space<vmem>>, vector<2x64xf32>
    tpu.vector_store %arg15[%c0_383, %c128], %696 {strides = array<i32>} : memref<2x1024xf32, #tpu.memory_space<vmem>>, vector<2x64xf32>,
    %698 = vector.extract_strided_slice %557 {offsets = [0, 2, 0], sizes = [2, 1, 64], strides = [1, 1, 1]} : vector<2x5x66xf32> to vector<2x1x64xf32>
    %699 = vector.shape_cast %698 : vector<2x1x64xf32> to vector<2x64xf32>
    %700 = vector.extract_strided_slice %557 {offsets = [0, 2, 2], sizes = [2, 1, 64], strides = [1, 1, 1]} : vector<2x5x66xf32> to vector<2x1x64xf32>
    %701 = vector.shape_cast %700 : vector<2x1x64xf32> to vector<2x64xf32>
    %702 = arith.maximumf %699, %701 : vector<2x64xf32>
    %703 = vector.extract_strided_slice %557 {offsets = [0, 4, 0], sizes = [2, 1, 64], strides = [1, 1, 1]} : vector<2x5x66xf32> to vector<2x1x64xf32>
    %704 = vector.shape_cast %703 : vector<2x1x64xf32> to vector<2x64xf32>
    %705 = vector.extract_strided_slice %557 {offsets = [0, 4, 2], sizes = [2, 1, 64], strides = [1, 1, 1]} : vector<2x5x66xf32> to vector<2x1x64xf32>
    %706 = vector.shape_cast %705 : vector<2x1x64xf32> to vector<2x64xf32>
    %707 = arith.maximumf %704, %706 : vector<2x64xf32>
    %708 = arith.maximumf %702, %707 : vector<2x64xf32>
    %709 = vector.broadcast %683 : f32 to vector<2x64xf32>
    %710 = arith.addf %708, %709 : vector<2x64xf32>
    %c0_384 = arith.constant 0 : index
    %c192 = arith.constant 192 : index
    %711 = vector.load %arg15[%c0_384, %c192] : memref<2x1024xf32, #tpu.memory_space<vmem>>, vector<2x64xf32>
    tpu.vector_store %arg15[%c0_384, %c192], %710 {strides = array<i32>} : memref<2x1024xf32, #tpu.memory_space<vmem>>, vector<2x64xf32>,
    %c0_385 = arith.constant 0 : index
    %c2_386 = arith.constant 2 : index
    %712 = memref.load %arg4[%c0_385, %c2_386] : memref<1x8xf32, #tpu.memory_space<smem>>
    %713 = vector.extract_strided_slice %573 {offsets = [0, 0, 0], sizes = [2, 1, 64], strides = [1, 1, 1]} : vector<2x5x66xf32> to vector<2x1x64xf32>
    %714 = vector.shape_cast %713 : vector<2x1x64xf32> to vector<2x64xf32>
    %715 = vector.extract_strided_slice %573 {offsets = [0, 0, 2], sizes = [2, 1, 64], strides = [1, 1, 1]} : vector<2x5x66xf32> to vector<2x1x64xf32>
    %716 = vector.shape_cast %715 : vector<2x1x64xf32> to vector<2x64xf32>
    %717 = arith.maximumf %714, %716 : vector<2x64xf32>
    %718 = vector.extract_strided_slice %573 {offsets = [0, 2, 0], sizes = [2, 1, 64], strides = [1, 1, 1]} : vector<2x5x66xf32> to vector<2x1x64xf32>
    %719 = vector.shape_cast %718 : vector<2x1x64xf32> to vector<2x64xf32>
    %720 = vector.extract_strided_slice %573 {offsets = [0, 2, 2], sizes = [2, 1, 64], strides = [1, 1, 1]} : vector<2x5x66xf32> to vector<2x1x64xf32>
    %721 = vector.shape_cast %720 : vector<2x1x64xf32> to vector<2x64xf32>
    %722 = arith.maximumf %719, %721 : vector<2x64xf32>
    %723 = arith.maximumf %717, %722 : vector<2x64xf32>
    %724 = vector.broadcast %712 : f32 to vector<2x64xf32>
    %725 = arith.addf %723, %724 : vector<2x64xf32>
    %c0_387 = arith.constant 0 : index
    %c256 = arith.constant 256 : index
    %726 = vector.load %arg15[%c0_387, %c256] : memref<2x1024xf32, #tpu.memory_space<vmem>>, vector<2x64xf32>
    tpu.vector_store %arg15[%c0_387, %c256], %725 {strides = array<i32>} : memref<2x1024xf32, #tpu.memory_space<vmem>>, vector<2x64xf32>,
    %727 = vector.extract_strided_slice %573 {offsets = [0, 2, 0], sizes = [2, 1, 64], strides = [1, 1, 1]} : vector<2x5x66xf32> to vector<2x1x64xf32>
    %728 = vector.shape_cast %727 : vector<2x1x64xf32> to vector<2x64xf32>
    %729 = vector.extract_strided_slice %573 {offsets = [0, 2, 2], sizes = [2, 1, 64], strides = [1, 1, 1]} : vector<2x5x66xf32> to vector<2x1x64xf32>
    %730 = vector.shape_cast %729 : vector<2x1x64xf32> to vector<2x64xf32>
    %731 = arith.maximumf %728, %730 : vector<2x64xf32>
    %732 = vector.extract_strided_slice %573 {offsets = [0, 4, 0], sizes = [2, 1, 64], strides = [1, 1, 1]} : vector<2x5x66xf32> to vector<2x1x64xf32>
    %733 = vector.shape_cast %732 : vector<2x1x64xf32> to vector<2x64xf32>
    %734 = vector.extract_strided_slice %573 {offsets = [0, 4, 2], sizes = [2, 1, 64], strides = [1, 1, 1]} : vector<2x5x66xf32> to vector<2x1x64xf32>
    %735 = vector.shape_cast %734 : vector<2x1x64xf32> to vector<2x64xf32>
    %736 = arith.maximumf %733, %735 : vector<2x64xf32>
    %737 = arith.maximumf %731, %736 : vector<2x64xf32>
    %738 = vector.broadcast %712 : f32 to vector<2x64xf32>
    %739 = arith.addf %737, %738 : vector<2x64xf32>
    %c0_388 = arith.constant 0 : index
    %c320 = arith.constant 320 : index
    %740 = vector.load %arg15[%c0_388, %c320] : memref<2x1024xf32, #tpu.memory_space<vmem>>, vector<2x64xf32>
    tpu.vector_store %arg15[%c0_388, %c320], %739 {strides = array<i32>} : memref<2x1024xf32, #tpu.memory_space<vmem>>, vector<2x64xf32>,
    %c0_389 = arith.constant 0 : index
    %c3_390 = arith.constant 3 : index
    %741 = memref.load %arg4[%c0_389, %c3_390] : memref<1x8xf32, #tpu.memory_space<smem>>
    %742 = vector.extract_strided_slice %589 {offsets = [0, 0, 0], sizes = [2, 1, 64], strides = [1, 1, 1]} : vector<2x5x66xf32> to vector<2x1x64xf32>
    %743 = vector.shape_cast %742 : vector<2x1x64xf32> to vector<2x64xf32>
    %744 = vector.extract_strided_slice %589 {offsets = [0, 0, 2], sizes = [2, 1, 64], strides = [1, 1, 1]} : vector<2x5x66xf32> to vector<2x1x64xf32>
    %745 = vector.shape_cast %744 : vector<2x1x64xf32> to vector<2x64xf32>
    %746 = arith.maximumf %743, %745 : vector<2x64xf32>
    %747 = vector.extract_strided_slice %589 {offsets = [0, 2, 0], sizes = [2, 1, 64], strides = [1, 1, 1]} : vector<2x5x66xf32> to vector<2x1x64xf32>
    %748 = vector.shape_cast %747 : vector<2x1x64xf32> to vector<2x64xf32>
    %749 = vector.extract_strided_slice %589 {offsets = [0, 2, 2], sizes = [2, 1, 64], strides = [1, 1, 1]} : vector<2x5x66xf32> to vector<2x1x64xf32>
    %750 = vector.shape_cast %749 : vector<2x1x64xf32> to vector<2x64xf32>
    %751 = arith.maximumf %748, %750 : vector<2x64xf32>
    %752 = arith.maximumf %746, %751 : vector<2x64xf32>
    %753 = vector.broadcast %741 : f32 to vector<2x64xf32>
    %754 = arith.addf %752, %753 : vector<2x64xf32>
    %c0_391 = arith.constant 0 : index
    %c384 = arith.constant 384 : index
    %755 = vector.load %arg15[%c0_391, %c384] : memref<2x1024xf32, #tpu.memory_space<vmem>>, vector<2x64xf32>
    tpu.vector_store %arg15[%c0_391, %c384], %754 {strides = array<i32>} : memref<2x1024xf32, #tpu.memory_space<vmem>>, vector<2x64xf32>,
    %756 = vector.extract_strided_slice %589 {offsets = [0, 2, 0], sizes = [2, 1, 64], strides = [1, 1, 1]} : vector<2x5x66xf32> to vector<2x1x64xf32>
    %757 = vector.shape_cast %756 : vector<2x1x64xf32> to vector<2x64xf32>
    %758 = vector.extract_strided_slice %589 {offsets = [0, 2, 2], sizes = [2, 1, 64], strides = [1, 1, 1]} : vector<2x5x66xf32> to vector<2x1x64xf32>
    %759 = vector.shape_cast %758 : vector<2x1x64xf32> to vector<2x64xf32>
    %760 = arith.maximumf %757, %759 : vector<2x64xf32>
    %761 = vector.extract_strided_slice %589 {offsets = [0, 4, 0], sizes = [2, 1, 64], strides = [1, 1, 1]} : vector<2x5x66xf32> to vector<2x1x64xf32>
    %762 = vector.shape_cast %761 : vector<2x1x64xf32> to vector<2x64xf32>
    %763 = vector.extract_strided_slice %589 {offsets = [0, 4, 2], sizes = [2, 1, 64], strides = [1, 1, 1]} : vector<2x5x66xf32> to vector<2x1x64xf32>
    %764 = vector.shape_cast %763 : vector<2x1x64xf32> to vector<2x64xf32>
    %765 = arith.maximumf %762, %764 : vector<2x64xf32>
    %766 = arith.maximumf %760, %765 : vector<2x64xf32>
    %767 = vector.broadcast %741 : f32 to vector<2x64xf32>
    %768 = arith.addf %766, %767 : vector<2x64xf32>
    %c0_392 = arith.constant 0 : index
    %c448 = arith.constant 448 : index
    %769 = vector.load %arg15[%c0_392, %c448] : memref<2x1024xf32, #tpu.memory_space<vmem>>, vector<2x64xf32>
    tpu.vector_store %arg15[%c0_392, %c448], %768 {strides = array<i32>} : memref<2x1024xf32, #tpu.memory_space<vmem>>, vector<2x64xf32>,
    %c0_393 = arith.constant 0 : index
    %c4_394 = arith.constant 4 : index
    %770 = memref.load %arg4[%c0_393, %c4_394] : memref<1x8xf32, #tpu.memory_space<smem>>
    %771 = vector.extract_strided_slice %605 {offsets = [0, 0, 0], sizes = [2, 1, 64], strides = [1, 1, 1]} : vector<2x5x66xf32> to vector<2x1x64xf32>
    %772 = vector.shape_cast %771 : vector<2x1x64xf32> to vector<2x64xf32>
    %773 = vector.extract_strided_slice %605 {offsets = [0, 0, 2], sizes = [2, 1, 64], strides = [1, 1, 1]} : vector<2x5x66xf32> to vector<2x1x64xf32>
    %774 = vector.shape_cast %773 : vector<2x1x64xf32> to vector<2x64xf32>
    %775 = arith.maximumf %772, %774 : vector<2x64xf32>
    %776 = vector.extract_strided_slice %605 {offsets = [0, 2, 0], sizes = [2, 1, 64], strides = [1, 1, 1]} : vector<2x5x66xf32> to vector<2x1x64xf32>
    %777 = vector.shape_cast %776 : vector<2x1x64xf32> to vector<2x64xf32>
    %778 = vector.extract_strided_slice %605 {offsets = [0, 2, 2], sizes = [2, 1, 64], strides = [1, 1, 1]} : vector<2x5x66xf32> to vector<2x1x64xf32>
    %779 = vector.shape_cast %778 : vector<2x1x64xf32> to vector<2x64xf32>
    %780 = arith.maximumf %777, %779 : vector<2x64xf32>
    %781 = arith.maximumf %775, %780 : vector<2x64xf32>
    %782 = vector.broadcast %770 : f32 to vector<2x64xf32>
    %783 = arith.addf %781, %782 : vector<2x64xf32>
    %c0_395 = arith.constant 0 : index
    %c512 = arith.constant 512 : index
    %784 = vector.load %arg15[%c0_395, %c512] : memref<2x1024xf32, #tpu.memory_space<vmem>>, vector<2x64xf32>
    tpu.vector_store %arg15[%c0_395, %c512], %783 {strides = array<i32>} : memref<2x1024xf32, #tpu.memory_space<vmem>>, vector<2x64xf32>,
    %785 = vector.extract_strided_slice %605 {offsets = [0, 2, 0], sizes = [2, 1, 64], strides = [1, 1, 1]} : vector<2x5x66xf32> to vector<2x1x64xf32>
    %786 = vector.shape_cast %785 : vector<2x1x64xf32> to vector<2x64xf32>
    %787 = vector.extract_strided_slice %605 {offsets = [0, 2, 2], sizes = [2, 1, 64], strides = [1, 1, 1]} : vector<2x5x66xf32> to vector<2x1x64xf32>
    %788 = vector.shape_cast %787 : vector<2x1x64xf32> to vector<2x64xf32>
    %789 = arith.maximumf %786, %788 : vector<2x64xf32>
    %790 = vector.extract_strided_slice %605 {offsets = [0, 4, 0], sizes = [2, 1, 64], strides = [1, 1, 1]} : vector<2x5x66xf32> to vector<2x1x64xf32>
    %791 = vector.shape_cast %790 : vector<2x1x64xf32> to vector<2x64xf32>
    %792 = vector.extract_strided_slice %605 {offsets = [0, 4, 2], sizes = [2, 1, 64], strides = [1, 1, 1]} : vector<2x5x66xf32> to vector<2x1x64xf32>
    %793 = vector.shape_cast %792 : vector<2x1x64xf32> to vector<2x64xf32>
    %794 = arith.maximumf %791, %793 : vector<2x64xf32>
    %795 = arith.maximumf %789, %794 : vector<2x64xf32>
    %796 = vector.broadcast %770 : f32 to vector<2x64xf32>
    %797 = arith.addf %795, %796 : vector<2x64xf32>
    %c0_396 = arith.constant 0 : index
    %c576 = arith.constant 576 : index
    %798 = vector.load %arg15[%c0_396, %c576] : memref<2x1024xf32, #tpu.memory_space<vmem>>, vector<2x64xf32>
    tpu.vector_store %arg15[%c0_396, %c576], %797 {strides = array<i32>} : memref<2x1024xf32, #tpu.memory_space<vmem>>, vector<2x64xf32>,
    %c0_397 = arith.constant 0 : index
    %c5_398 = arith.constant 5 : index
    %799 = memref.load %arg4[%c0_397, %c5_398] : memref<1x8xf32, #tpu.memory_space<smem>>
    %800 = vector.extract_strided_slice %621 {offsets = [0, 0, 0], sizes = [2, 1, 64], strides = [1, 1, 1]} : vector<2x5x66xf32> to vector<2x1x64xf32>
    %801 = vector.shape_cast %800 : vector<2x1x64xf32> to vector<2x64xf32>
    %802 = vector.extract_strided_slice %621 {offsets = [0, 0, 2], sizes = [2, 1, 64], strides = [1, 1, 1]} : vector<2x5x66xf32> to vector<2x1x64xf32>
    %803 = vector.shape_cast %802 : vector<2x1x64xf32> to vector<2x64xf32>
    %804 = arith.maximumf %801, %803 : vector<2x64xf32>
    %805 = vector.extract_strided_slice %621 {offsets = [0, 2, 0], sizes = [2, 1, 64], strides = [1, 1, 1]} : vector<2x5x66xf32> to vector<2x1x64xf32>
    %806 = vector.shape_cast %805 : vector<2x1x64xf32> to vector<2x64xf32>
    %807 = vector.extract_strided_slice %621 {offsets = [0, 2, 2], sizes = [2, 1, 64], strides = [1, 1, 1]} : vector<2x5x66xf32> to vector<2x1x64xf32>
    %808 = vector.shape_cast %807 : vector<2x1x64xf32> to vector<2x64xf32>
    %809 = arith.maximumf %806, %808 : vector<2x64xf32>
    %810 = arith.maximumf %804, %809 : vector<2x64xf32>
    %811 = vector.broadcast %799 : f32 to vector<2x64xf32>
    %812 = arith.addf %810, %811 : vector<2x64xf32>
    %c0_399 = arith.constant 0 : index
    %c640 = arith.constant 640 : index
    %813 = vector.load %arg15[%c0_399, %c640] : memref<2x1024xf32, #tpu.memory_space<vmem>>, vector<2x64xf32>
    tpu.vector_store %arg15[%c0_399, %c640], %812 {strides = array<i32>} : memref<2x1024xf32, #tpu.memory_space<vmem>>, vector<2x64xf32>,
    %814 = vector.extract_strided_slice %621 {offsets = [0, 2, 0], sizes = [2, 1, 64], strides = [1, 1, 1]} : vector<2x5x66xf32> to vector<2x1x64xf32>
    %815 = vector.shape_cast %814 : vector<2x1x64xf32> to vector<2x64xf32>
    %816 = vector.extract_strided_slice %621 {offsets = [0, 2, 2], sizes = [2, 1, 64], strides = [1, 1, 1]} : vector<2x5x66xf32> to vector<2x1x64xf32>
    %817 = vector.shape_cast %816 : vector<2x1x64xf32> to vector<2x64xf32>
    %818 = arith.maximumf %815, %817 : vector<2x64xf32>
    %819 = vector.extract_strided_slice %621 {offsets = [0, 4, 0], sizes = [2, 1, 64], strides = [1, 1, 1]} : vector<2x5x66xf32> to vector<2x1x64xf32>
    %820 = vector.shape_cast %819 : vector<2x1x64xf32> to vector<2x64xf32>
    %821 = vector.extract_strided_slice %621 {offsets = [0, 4, 2], sizes = [2, 1, 64], strides = [1, 1, 1]} : vector<2x5x66xf32> to vector<2x1x64xf32>
    %822 = vector.shape_cast %821 : vector<2x1x64xf32> to vector<2x64xf32>
    %823 = arith.maximumf %820, %822 : vector<2x64xf32>
    %824 = arith.maximumf %818, %823 : vector<2x64xf32>
    %825 = vector.broadcast %799 : f32 to vector<2x64xf32>
    %826 = arith.addf %824, %825 : vector<2x64xf32>
    %c0_400 = arith.constant 0 : index
    %c704 = arith.constant 704 : index
    %827 = vector.load %arg15[%c0_400, %c704] : memref<2x1024xf32, #tpu.memory_space<vmem>>, vector<2x64xf32>
    tpu.vector_store %arg15[%c0_400, %c704], %826 {strides = array<i32>} : memref<2x1024xf32, #tpu.memory_space<vmem>>, vector<2x64xf32>,
    %c0_401 = arith.constant 0 : index
    %c6_402 = arith.constant 6 : index
    %828 = memref.load %arg4[%c0_401, %c6_402] : memref<1x8xf32, #tpu.memory_space<smem>>
    %829 = vector.extract_strided_slice %637 {offsets = [0, 0, 0], sizes = [2, 1, 64], strides = [1, 1, 1]} : vector<2x5x66xf32> to vector<2x1x64xf32>
    %830 = vector.shape_cast %829 : vector<2x1x64xf32> to vector<2x64xf32>
    %831 = vector.extract_strided_slice %637 {offsets = [0, 0, 2], sizes = [2, 1, 64], strides = [1, 1, 1]} : vector<2x5x66xf32> to vector<2x1x64xf32>
    %832 = vector.shape_cast %831 : vector<2x1x64xf32> to vector<2x64xf32>
    %833 = arith.maximumf %830, %832 : vector<2x64xf32>
    %834 = vector.extract_strided_slice %637 {offsets = [0, 2, 0], sizes = [2, 1, 64], strides = [1, 1, 1]} : vector<2x5x66xf32> to vector<2x1x64xf32>
    %835 = vector.shape_cast %834 : vector<2x1x64xf32> to vector<2x64xf32>
    %836 = vector.extract_strided_slice %637 {offsets = [0, 2, 2], sizes = [2, 1, 64], strides = [1, 1, 1]} : vector<2x5x66xf32> to vector<2x1x64xf32>
    %837 = vector.shape_cast %836 : vector<2x1x64xf32> to vector<2x64xf32>
    %838 = arith.maximumf %835, %837 : vector<2x64xf32>
    %839 = arith.maximumf %833, %838 : vector<2x64xf32>
    %840 = vector.broadcast %828 : f32 to vector<2x64xf32>
    %841 = arith.addf %839, %840 : vector<2x64xf32>
    %c0_403 = arith.constant 0 : index
    %c768 = arith.constant 768 : index
    %842 = vector.load %arg15[%c0_403, %c768] : memref<2x1024xf32, #tpu.memory_space<vmem>>, vector<2x64xf32>
    tpu.vector_store %arg15[%c0_403, %c768], %841 {strides = array<i32>} : memref<2x1024xf32, #tpu.memory_space<vmem>>, vector<2x64xf32>,
    %843 = vector.extract_strided_slice %637 {offsets = [0, 2, 0], sizes = [2, 1, 64], strides = [1, 1, 1]} : vector<2x5x66xf32> to vector<2x1x64xf32>
    %844 = vector.shape_cast %843 : vector<2x1x64xf32> to vector<2x64xf32>
    %845 = vector.extract_strided_slice %637 {offsets = [0, 2, 2], sizes = [2, 1, 64], strides = [1, 1, 1]} : vector<2x5x66xf32> to vector<2x1x64xf32>
    %846 = vector.shape_cast %845 : vector<2x1x64xf32> to vector<2x64xf32>
    %847 = arith.maximumf %844, %846 : vector<2x64xf32>
    %848 = vector.extract_strided_slice %637 {offsets = [0, 4, 0], sizes = [2, 1, 64], strides = [1, 1, 1]} : vector<2x5x66xf32> to vector<2x1x64xf32>
    %849 = vector.shape_cast %848 : vector<2x1x64xf32> to vector<2x64xf32>
    %850 = vector.extract_strided_slice %637 {offsets = [0, 4, 2], sizes = [2, 1, 64], strides = [1, 1, 1]} : vector<2x5x66xf32> to vector<2x1x64xf32>
    %851 = vector.shape_cast %850 : vector<2x1x64xf32> to vector<2x64xf32>
    %852 = arith.maximumf %849, %851 : vector<2x64xf32>
    %853 = arith.maximumf %847, %852 : vector<2x64xf32>
    %854 = vector.broadcast %828 : f32 to vector<2x64xf32>
    %855 = arith.addf %853, %854 : vector<2x64xf32>
    %c0_404 = arith.constant 0 : index
    %c832 = arith.constant 832 : index
    %856 = vector.load %arg15[%c0_404, %c832] : memref<2x1024xf32, #tpu.memory_space<vmem>>, vector<2x64xf32>
    tpu.vector_store %arg15[%c0_404, %c832], %855 {strides = array<i32>} : memref<2x1024xf32, #tpu.memory_space<vmem>>, vector<2x64xf32>,
    %c0_405 = arith.constant 0 : index
    %c7_406 = arith.constant 7 : index
    %857 = memref.load %arg4[%c0_405, %c7_406] : memref<1x8xf32, #tpu.memory_space<smem>>
    %858 = vector.extract_strided_slice %653 {offsets = [0, 0, 0], sizes = [2, 1, 64], strides = [1, 1, 1]} : vector<2x5x66xf32> to vector<2x1x64xf32>
    %859 = vector.shape_cast %858 : vector<2x1x64xf32> to vector<2x64xf32>
    %860 = vector.extract_strided_slice %653 {offsets = [0, 0, 2], sizes = [2, 1, 64], strides = [1, 1, 1]} : vector<2x5x66xf32> to vector<2x1x64xf32>
    %861 = vector.shape_cast %860 : vector<2x1x64xf32> to vector<2x64xf32>
    %862 = arith.maximumf %859, %861 : vector<2x64xf32>
    %863 = vector.extract_strided_slice %653 {offsets = [0, 2, 0], sizes = [2, 1, 64], strides = [1, 1, 1]} : vector<2x5x66xf32> to vector<2x1x64xf32>
    %864 = vector.shape_cast %863 : vector<2x1x64xf32> to vector<2x64xf32>
    %865 = vector.extract_strided_slice %653 {offsets = [0, 2, 2], sizes = [2, 1, 64], strides = [1, 1, 1]} : vector<2x5x66xf32> to vector<2x1x64xf32>
    %866 = vector.shape_cast %865 : vector<2x1x64xf32> to vector<2x64xf32>
    %867 = arith.maximumf %864, %866 : vector<2x64xf32>
    %868 = arith.maximumf %862, %867 : vector<2x64xf32>
    %869 = vector.broadcast %857 : f32 to vector<2x64xf32>
    %870 = arith.addf %868, %869 : vector<2x64xf32>
    %c0_407 = arith.constant 0 : index
    %c896 = arith.constant 896 : index
    %871 = vector.load %arg15[%c0_407, %c896] : memref<2x1024xf32, #tpu.memory_space<vmem>>, vector<2x64xf32>
    tpu.vector_store %arg15[%c0_407, %c896], %870 {strides = array<i32>} : memref<2x1024xf32, #tpu.memory_space<vmem>>, vector<2x64xf32>,
    %872 = vector.extract_strided_slice %653 {offsets = [0, 2, 0], sizes = [2, 1, 64], strides = [1, 1, 1]} : vector<2x5x66xf32> to vector<2x1x64xf32>
    %873 = vector.shape_cast %872 : vector<2x1x64xf32> to vector<2x64xf32>
    %874 = vector.extract_strided_slice %653 {offsets = [0, 2, 2], sizes = [2, 1, 64], strides = [1, 1, 1]} : vector<2x5x66xf32> to vector<2x1x64xf32>
    %875 = vector.shape_cast %874 : vector<2x1x64xf32> to vector<2x64xf32>
    %876 = arith.maximumf %873, %875 : vector<2x64xf32>
    %877 = vector.extract_strided_slice %653 {offsets = [0, 4, 0], sizes = [2, 1, 64], strides = [1, 1, 1]} : vector<2x5x66xf32> to vector<2x1x64xf32>
    %878 = vector.shape_cast %877 : vector<2x1x64xf32> to vector<2x64xf32>
    %879 = vector.extract_strided_slice %653 {offsets = [0, 4, 2], sizes = [2, 1, 64], strides = [1, 1, 1]} : vector<2x5x66xf32> to vector<2x1x64xf32>
    %880 = vector.shape_cast %879 : vector<2x1x64xf32> to vector<2x64xf32>
    %881 = arith.maximumf %878, %880 : vector<2x64xf32>
    %882 = arith.maximumf %876, %881 : vector<2x64xf32>
    %883 = vector.broadcast %857 : f32 to vector<2x64xf32>
    %884 = arith.addf %882, %883 : vector<2x64xf32>
    %c0_408 = arith.constant 0 : index
    %c960 = arith.constant 960 : index
    %885 = vector.load %arg15[%c0_408, %c960] : memref<2x1024xf32, #tpu.memory_space<vmem>>, vector<2x64xf32>
    tpu.vector_store %arg15[%c0_408, %c960], %884 {strides = array<i32>} : memref<2x1024xf32, #tpu.memory_space<vmem>>, vector<2x64xf32>,
    %c0_409 = arith.constant 0 : index
    %c0_410 = arith.constant 0 : index
    %886 = vector.load %arg15[%c0_409, %c0_410] : memref<2x1024xf32, #tpu.memory_space<vmem>>, vector<2x1024xf32>
    %887 = arith.truncf %886 : vector<2x1024xf32> to vector<2x1024xbf16>
    %c0_411 = arith.constant 0 : index
    %c0_412 = arith.constant 0 : index
    %888 = vector.load %arg5[%c0_411, %c0_412] : memref<1024x128xbf16, #tpu.memory_space<vmem>>, vector<1024x128xbf16>
    %cst_413 = arith.constant dense<0.000000e+00> : vector<2x128xf32>
    %889 = tpu.matmul %887, %888, %cst_413 {dimension_numbers = #tpu.dot_dimension_numbers<[1], [0], [0], [1], [0, 0, 1, 1], [], []>} : vector<2x1024xbf16>, vector<1024x128xbf16>, vector<2x128xf32> -> vector<2x128xf32>
    %c0_414 = arith.constant 0 : index
    %c0_415 = arith.constant 0 : index
    %890 = vector.load %arg6[%c0_414, %c0_415] : memref<1x128xf32, #tpu.memory_space<vmem>>, vector<1x128xf32>
    %891 = vector.broadcast %890 : vector<1x128xf32> to vector<2x128xf32>
    %892 = arith.addf %889, %891 : vector<2x128xf32>
    %cst_416 = arith.constant 0.000000e+00 : f32
    %893 = vector.broadcast %cst_416 : f32 to vector<2x128xf32>
    %894 = arith.subf %893, %892 : vector<2x128xf32>
    %895 = math.exp %894 : vector<2x128xf32>
    %cst_417 = arith.constant 1.000000e+00 : f32
    %896 = vector.broadcast %cst_417 : f32 to vector<2x128xf32>
    %897 = arith.addf %896, %895 : vector<2x128xf32>
    %cst_418 = arith.constant 1.000000e+00 : f32
    %898 = vector.broadcast %cst_418 : f32 to vector<2x128xf32>
    %899 = arith.divf %898, %897 : vector<2x128xf32>
    %900 = arith.truncf %899 : vector<2x128xf32> to vector<2x128xbf16>
    %c0_419 = arith.constant 0 : index
    %c0_420 = arith.constant 0 : index
    %901 = vector.load %arg7[%c0_419, %c0_420] : memref<128x128xbf16, #tpu.memory_space<vmem>>, vector<128x128xbf16>
    %cst_421 = arith.constant dense<0.000000e+00> : vector<2x128xf32>
    %902 = tpu.matmul %900, %901, %cst_421 {dimension_numbers = #tpu.dot_dimension_numbers<[1], [0], [0], [1], [0, 0, 1, 1], [], []>} : vector<2x128xbf16>, vector<128x128xbf16>, vector<2x128xf32> -> vector<2x128xf32>
    %c0_422 = arith.constant 0 : index
    %c0_423 = arith.constant 0 : index
    %903 = vector.load %arg8[%c0_422, %c0_423] : memref<1x128xf32, #tpu.memory_space<vmem>>, vector<1x128xf32>
    %904 = vector.broadcast %903 : vector<1x128xf32> to vector<2x128xf32>
    %905 = arith.addf %902, %904 : vector<2x128xf32>
    %cst_424 = arith.constant 0.000000e+00 : f32
    %906 = vector.broadcast %cst_424 : f32 to vector<2x128xf32>
    %907 = arith.subf %906, %905 : vector<2x128xf32>
    %908 = math.exp %907 : vector<2x128xf32>
    %cst_425 = arith.constant 1.000000e+00 : f32
    %909 = vector.broadcast %cst_425 : f32 to vector<2x128xf32>
    %910 = arith.addf %909, %908 : vector<2x128xf32>
    %cst_426 = arith.constant 1.000000e+00 : f32
    %911 = vector.broadcast %cst_426 : f32 to vector<2x128xf32>
    %912 = arith.divf %911, %910 : vector<2x128xf32>
    %913 = arith.truncf %912 : vector<2x128xf32> to vector<2x128xbf16>
    %c0_427 = arith.constant 0 : index
    %c0_428 = arith.constant 0 : index
    %914 = vector.load %arg9[%c0_427, %c0_428] : memref<128x128xbf16, #tpu.memory_space<vmem>>, vector<128x128xbf16>
    %cst_429 = arith.constant dense<0.000000e+00> : vector<2x128xf32>
    %915 = tpu.matmul %913, %914, %cst_429 {dimension_numbers = #tpu.dot_dimension_numbers<[1], [0], [0], [1], [0, 0, 1, 1], [], []>} : vector<2x128xbf16>, vector<128x128xbf16>, vector<2x128xf32> -> vector<2x128xf32>
    %c0_430 = arith.constant 0 : index
    %c0_431 = arith.constant 0 : index
    %916 = vector.load %arg10[%c0_430, %c0_431] : memref<1x128xf32, #tpu.memory_space<vmem>>, vector<1x128xf32>
    %917 = vector.broadcast %916 : vector<1x128xf32> to vector<2x128xf32>
    %918 = arith.addf %915, %917 : vector<2x128xf32>
    %cst_432 = arith.constant 0.000000e+00 : f32
    %919 = vector.broadcast %cst_432 : f32 to vector<2x128xf32>
    %920 = arith.subf %919, %918 : vector<2x128xf32>
    %921 = math.exp %920 : vector<2x128xf32>
    %cst_433 = arith.constant 1.000000e+00 : f32
    %922 = vector.broadcast %cst_433 : f32 to vector<2x128xf32>
    %923 = arith.addf %922, %921 : vector<2x128xf32>
    %cst_434 = arith.constant 1.000000e+00 : f32
    %924 = vector.broadcast %cst_434 : f32 to vector<2x128xf32>
    %925 = arith.divf %924, %923 : vector<2x128xf32>
    %926 = arith.truncf %925 : vector<2x128xf32> to vector<2x128xbf16>
    %c0_435 = arith.constant 0 : index
    %c0_436 = arith.constant 0 : index
    %927 = vector.load %arg11[%c0_435, %c0_436] : memref<128x2xbf16, #tpu.memory_space<vmem>>, vector<128x2xbf16>
    %cst_437 = arith.constant dense<0.000000e+00> : vector<2x2xf32>
    %928 = tpu.matmul %926, %927, %cst_437 {dimension_numbers = #tpu.dot_dimension_numbers<[1], [0], [0], [1], [0, 0, 1, 1], [], []>} : vector<2x128xbf16>, vector<128x2xbf16>, vector<2x2xf32> -> vector<2x2xf32>
    %c0_438 = arith.constant 0 : index
    %c0_439 = arith.constant 0 : index
    %929 = vector.load %arg12[%c0_438, %c0_439] : memref<1x2xf32, #tpu.memory_space<vmem>>, vector<1x2xf32>
    %930 = vector.broadcast %929 : vector<1x2xf32> to vector<2x2xf32>
    %931 = arith.addf %928, %930 : vector<2x2xf32>
    %c0_440 = arith.constant 0 : index
    %c0_441 = arith.constant 0 : index
    %932 = vector.load %arg13[%c0_440, %c0_441] : memref<2x2xf32, #tpu.memory_space<vmem>>, vector<2x2xf32>
    tpu.vector_store %arg13[%c0_440, %c0_441], %931 {strides = array<i32>} : memref<2x2xf32, #tpu.memory_space<vmem>>, vector<2x2xf32>,
    return
  }
}

</mosaic_0001>

<bundles_post_ra>
// kernel: connet_forward.1
= control target key start
LH: loop header
LB: loop body
LE: loop exit
PB: predicated region body
PF: predicated region fallthrough
CT: control target
= control target key end

     0   :  { %18 = vsyncpa [#allocation7], 0  ;;  %s5731_s0 = inlined_call_operand.vmem [shape: f32[2,6,66], index: 0, kind: input, shape index: {}]   ;;  %s5732_s1 = inlined_call_operand.hbm [shape: f32[4,4], index: 1, kind: input, shape index: {}]   ;;  %s5733_s2 = inlined_call_operand.vmem [shape: f32[1,4], index: 2, kind: input, shape index: {}]   ;;  %s5734_s3 = inlined_call_operand.hbm [shape: f32[8,16], index: 3, kind: input, shape index: {}]   ;;  %s5735_s4 = inlined_call_operand.vmem [shape: f32[1,8], index: 4, kind: input, shape index: {}]   ;;  %s5736_s5 = inlined_call_operand.hbm [shape: bf16[1024,128], index: 5, kind: input, shape index: {}]   ;;  %s5737_s6 = inlined_call_operand.hbm [shape: f32[1,128], index: 6, kind: input, shape index: {}]   ;;  %s5738_s7 = inlined_call_operand.vmem [shape: bf16[128,128], index: 7, kind: input, shape index: {}]   ;;  %s5739_s8 = inlined_call_operand.hbm [shape: f32[1,128], index: 8, kind: input, shape index: {}]   ;;  %s5740_s9 = inlined_call_operand.vmem [shape: bf16[128,128], index: 9, kind: input, shape index: {}]   ;;  %s5741_s10 = inlined_call_operand.hbm [shape: f32[1,128], index: 10, kind: input, shape index: {}]   ;;  %s5742_s11 = inlined_call_operand.vmem [shape: bf16[128,2], index: 11, kind: input, shape index: {}]   ;;  %s5743_s12 = inlined_call_operand.vmem [shape: f32[1,2], index: 12, kind: input, shape index: {}]   ;;  %s5744_s13 = inlined_call_operand.hbm [shape: f32[2,2], index: 13, kind: output, shape index: {}]  }
   0x1   :  { %19 = vsyncpa [#allocation8], 0 }
   0x2   :  { %20 = vsyncpa [#allocation11], 0 }
   0x3   :  { %21 = vsyncpa [#allocation13], 0 }
   0x4   :  { %22 = vsyncpa [#allocation5], 0 }
   0x5   :  { %23 = vsyncpa [#allocation16], 0 }
   0x6   :  { %24 = vsyncpa [#allocation19], 0 }
   0x7   :  { %25 = vsyncpa [#allocation6], 0  ;;  %s4035_s25 = smov [#allocation15]   ;;  %s42_s29 = sshll.u32 %s5733_s2, 4  ;;  %s4125_s29 = int_to_ptr.vmem [resolvable:$true] %s42_s29 }
   0x8   :  { %s82_s26 = sshll.u32 %s4035_s25, 4  ;;  %s3865_s15 = scalar_lea.hbm %s5737_s6, 16  ;;  %s83_s26 = int_to_ptr.vmem [resolvable:$true] %s82_s26 }
   0x9   :  { %p3866_p0 = scmp.ne.s32.totalorder %s5737_s6, %s3865_s15  ;;  %p3869_p1 = scmp.lt.u32.totalorder %s3865_s15, %s5737_s6 }
   0xb   :  { %p3871_p2 = pnand %p3869_p1, %p3866_p0 }
   0xd   :  { %3874 = shalt.err (!%p3871_p2)
}
   0xe   :  { %s3875_s20 = scalar_lea.vmem %s83_s26, 16  ;;  %s3879_s2 = scalar_lea.vmem %s83_s26, 32 }
   0xf   :  { %p3876_p3 = scmp.ne.s32.totalorder %s83_s26, %s3875_s20  ;;  %p3880_p4 = scmp.lt.s32.totalorder %s83_s26, %s83_s26 }
  0x10   :  { %p3881_p5 = scmp.lt.s32.totalorder %s3879_s2, %s3875_s20 }
  0x12   :  { %p3882_p6 = por %p3881_p5, %p3880_p4 }
  0x14   :  { %p3883_p7 = pnand %p3882_p6, %p3876_p3 }
  0x16   :  { %3886 = shalt.err (!%p3883_p7)
}
  0x17   :  { %85 = dma.hbm_to_vmem [thread:$0]  %s5737_s6, 16, %s83_s26, [#allocation16]  }
  0x18   :  { %s3887_s25 = scalar_lea.hbm %s5732_s1, 64 }
  0x19   :  { %p3888_p8 = scmp.ne.s32.totalorder %s5732_s1, %s3887_s25  ;;  %p3891_p9 = scmp.lt.u32.totalorder %s3887_s25, %s5732_s1 }
  0x1b   :  { %p3893_p10 = pnand %p3891_p9, %p3888_p8 }
  0x1d   :  { %3896 = shalt.err (!%p3893_p10)
}
  0x1e   :  { %s4036_s15 = smov [#allocation4]   ;;  %s3897_s6 = scalar_lea.vmem %s4125_s29, 16 }
  0x1f   :  { %35 = dma.hbm_to_smem %s5732_s1, 64, %s4036_s15, [#allocation7]  }
  0x20   :  { %p3898_p11 = scmp.ne.s32.totalorder %s4125_s29, %s3897_s6  ;;  %p3902_p12 = scmp.lt.s32.totalorder %s4125_s29, %s4125_s29 }
  0x21   :  { %p3903_p13 = scmp.lt.s32.totalorder %s3897_s6, %s3897_s6 }
  0x23   :  { %p3904_p0 = por %p3903_p13, %p3902_p12 }
  0x25   :  { %p3905_p1 = pnand %p3904_p0, %p3898_p11 }
  0x27   :  { %3908 = shalt.err (!%p3905_p1)
}
  0x28   :  { %s4037_s26 = smov [#allocation9]   ;;  %s3909_s20 = scalar_lea.hbm %s5734_s3, 128 }
  0x29   :  { %45 = dma.vmem_to_smem %s4125_s29, 16, %s4037_s26, [#allocation8]  }
  0x2a   :  { %p3910_p2 = scmp.ne.s32.totalorder %s5734_s3, %s3909_s20  ;;  %p3913_p3 = scmp.lt.u32.totalorder %s3909_s20, %s5734_s3 }
  0x2c   :  { %p3915_p4 = pnand %p3913_p3, %p3910_p2 }
  0x2e   :  { %3918 = shalt.err (!%p3915_p4)
}
  0x2f   :  { %s4038_s23 = smov [#allocation10]   ;;  %s60_s28 = sshll.u32 %s5735_s4, 4  ;;  %s61_s28 = int_to_ptr.vmem [resolvable:$true] %s60_s28 }
  0x30   :  { %53 = dma.hbm_to_smem %s5734_s3, 128, %s4038_s23, [#allocation11]  }
  0x31   :  { %s3919_s30 = scalar_lea.vmem %s61_s28, 16  ;;  %p3924_p6 = scmp.lt.s32.totalorder %s61_s28, %s61_s28 }
  0x32   :  { %p3920_p5 = scmp.ne.s32.totalorder %s61_s28, %s3919_s30  ;;  %p3925_p7 = scmp.lt.s32.totalorder %s3919_s30, %s3919_s30 }
  0x34   :  { %p3926_p8 = por %p3925_p7, %p3924_p6 }
  0x36   :  { %p3927_p9 = pnand %p3926_p8, %p3920_p5 }
  0x38   :  { %3930 = shalt.err (!%p3927_p9)
}
  0x39   :  { %s4039_s14 = smov [#allocation12]   ;;  %s4040_s15 = smov [#allocation14]  }
  0x3a   :  { %63 = dma.vmem_to_smem %s61_s28, 16, %s4039_s14, [#allocation13]  }
  0x3b   :  { %s69_s16 = sshll.u32 %s4040_s15, 4  ;;  %s3931_s3 = scalar_lea.hbm %s5736_s5, 8192  ;;  %s70_s16 = int_to_ptr.vmem [resolvable:$true] %s69_s16 }
  0x3c   :  { %p3932_p10 = scmp.ne.s32.totalorder %s5736_s5, %s3931_s3  ;;  %p3935_p11 = scmp.lt.u32.totalorder %s3931_s3, %s5736_s5 }
  0x3e   :  { %p3937_p12 = pnand %p3935_p11, %p3932_p10 }
  0x40   :  { %3940 = shalt.err (!%p3937_p12)
}
  0x41   :  { %s3941_s20 = scalar_lea.vmem %s70_s16, 8192  ;;  %p3946_p0 = scmp.lt.s32.totalorder %s70_s16, %s70_s16 }
  0x42   :  { %p3942_p13 = scmp.ne.s32.totalorder %s70_s16, %s3941_s20  ;;  %p3947_p1 = scmp.lt.s32.totalorder %s3941_s20, %s3941_s20 }
  0x44   :  { %p3948_p2 = por %p3947_p1, %p3946_p0 }
  0x46   :  { %p3949_p3 = pnand %p3948_p2, %p3942_p13 }
  0x48   :  { %3952 = shalt.err (!%p3949_p3)
}
  0x49   :  { %s4041_s2 = smov 64   ;;  %s4042_s21 = smov 4  }
  0x4a   :  { %75 = dma.hbm_to_vmem [thread:$0]  %s5736_s5, 8192, %s70_s16, [#allocation5], %s4041_s2, %s4041_s2, %s4042_s21  }
  0x4b   :  { %s4043_s23 = smov [#allocation17]   ;;  %s4044_s25 = smov [#allocation18]  }
  0x4c   :  { %s94_s24 = sshll.u32 %s4043_s23, 4  ;;  %s106_s29 = sshll.u32 %s4044_s25, 4  ;;  %s95_s24 = int_to_ptr.vmem [resolvable:$true] %s94_s24  ;;  %s107_s29 = int_to_ptr.vmem [resolvable:$true] %s106_s29 }
  0x4d   :  { %s3953_s30 = scalar_lea.hbm %s5739_s8, 16 }
  0x4e   :  { %p3954_p4 = scmp.ne.s32.totalorder %s5739_s8, %s3953_s30  ;;  %p3957_p5 = scmp.lt.u32.totalorder %s3953_s30, %s5739_s8 }
  0x50   :  { %p3959_p6 = pnand %p3957_p5, %p3954_p4 }
  0x52   :  { %3962 = shalt.err (!%p3959_p6)
}
  0x53   :  { %s3963_s5 = scalar_lea.vmem %s95_s24, 16  ;;  %s3967_s16 = scalar_lea.vmem %s95_s24, 32 }
  0x54   :  { %p3964_p7 = scmp.ne.s32.totalorder %s95_s24, %s3963_s5  ;;  %p3968_p8 = scmp.lt.s32.totalorder %s95_s24, %s95_s24 }
  0x55   :  { %p3969_p9 = scmp.lt.s32.totalorder %s3967_s16, %s3963_s5 }
  0x57   :  { %p3970_p10 = por %p3969_p9, %p3968_p8 }
  0x59   :  { %p3971_p11 = pnand %p3970_p10, %p3964_p7 }
  0x5b   :  { %3974 = shalt.err (!%p3971_p11)
}
  0x5c   :  { %97 = dma.hbm_to_vmem [thread:$0]  %s5739_s8, 16, %s95_s24, [#allocation16]  }
  0x5d   :  { %s3975_s19 = scalar_lea.hbm %s5741_s10, 16 }
  0x5e   :  { %p3976_p12 = scmp.ne.s32.totalorder %s5741_s10, %s3975_s19  ;;  %p3979_p13 = scmp.lt.u32.totalorder %s3975_s19, %s5741_s10 }
  0x60   :  { %p3981_p0 = pnand %p3979_p13, %p3976_p12 }
  0x62   :  { %3984 = shalt.err (!%p3981_p0)
}
  0x63   :  { %s3985_s23 = scalar_lea.vmem %s107_s29, 16  ;;  %s3989_s25 = scalar_lea.vmem %s107_s29, 32 }
  0x64   :  { %p3986_p1 = scmp.ne.s32.totalorder %s107_s29, %s3985_s23  ;;  %p3990_p2 = scmp.lt.s32.totalorder %s107_s29, %s107_s29 }
  0x65   :  { %p3991_p3 = scmp.lt.s32.totalorder %s3989_s25, %s3985_s23 }
  0x67   :  { %p3992_p4 = por %p3991_p3, %p3990_p2 }
  0x69   :  { %p3993_p5 = pnand %p3992_p4, %p3986_p1 }
  0x6b   :  { %3996 = shalt.err (!%p3993_p5)
}
  0x6c   :  { %109 = dma.hbm_to_vmem [thread:$0]  %s5741_s10, 16, %s107_s29, [#allocation19]  }
  0x6d   :  { %4019 = dma.done.wait [#allocation7], 64  }
  0x6e   :  { %4020 = vsyncadd [#allocation7], 4294967232 }
  0x6f   :  { %4021 = dma.done.wait [#allocation8], 16  }
  0x70   :  { %4022 = vsyncadd [#allocation8], 4294967280 }
  0x71   :  { %4023 = dma.done.wait [#allocation11], 128  }
  0x72   :  { %4024 = vsyncadd [#allocation11], 4294967168 }
  0x73   :  { %4025 = dma.done.wait [#allocation13], 16  }
  0x74   :  { %4026 = vsyncadd [#allocation13], 4294967280 }
  0x75   :  { %4027 = dma.done.wait [#allocation5], 8192  }
  0x76   :  { %4028 = vsyncadd [#allocation5], 4294959104 }
  0x77   :  { %4029 = dma.done.wait [#allocation16], 32  }
  0x78   :  { %4030 = vsyncadd [#allocation16], 4294967264 }
  0x79   :  { %4031 = dma.done.wait [#allocation19], 16  }
  0x7a   :  { %4032 = vsyncadd [#allocation19], 4294967280 }
  0x7b   :  { %138 = sfence }
  0x7c   :  { %s3317_s27 = sld [smem:[#allocation4 + $0x3]]  ;;  %s3316_s28 = sld [smem:[#allocation4 + $0x2]]  ;;  %v4212_v0 = vld [vmem:[%s5731_s0 + $0x9] sm:$0x1f]  ;;  %v4228_v2 = vld [vmem:[%s5731_s0 + $0x1] sm:$0x1f] }
  0x7d   :  { %s3320_s10 = sld [smem:[#allocation4 + $0x82]]  ;;  %s4214_s29 = sld [smem:[#allocation4 + $0x83]]  ;;  %v4219_v1 = vld [vmem:[%s5731_s0 + $0x8] sm:$0x1f]  ;;  %v4237_v3 = vld [vmem:[%s5731_s0] sm:$0x1f] }
  0x7e   :  { %s4221_s6 = sld [smem:[#allocation4 + $0x102]]  ;;  %s4223_s5 = sld [smem:[#allocation4 + $0x103]]  ;;  %vm144_vm0 = vcmask 545792   ;;  %vm221_vm1 = vcmask 527368   ;;  %vm1760_vm2 = vcmask 1041409   ;;  %vm1762_vm3 = vcmask 1043459  }
  0x7f   :  { %s4230_s26 = sld [smem:[#allocation4 + $0x182]]  ;;  %s4232_s18 = sld [smem:[#allocation4 + $0x183]]  ;;  %vm1764_vm4 = vcmask 1045509   ;;  %vm1766_vm5 = vcmask 1047559   ;;  %vm1769_vm6 = vcmask 517120   ;;  %vm1783_vm7 = vcmask 1041920  }
  0x80   :  { %s153_s20 = sld [smem:[#allocation4]]  ;;  %s3315_s21 = sld [smem:[#allocation4 + $0x1]]  ;;  %vm4050_vm8 = vmmov 0   ;;  %vm3292_vm9 = vcmask 9216  }
  0x81   :  { %s4239_s1 = sld [smem:[#allocation4 + $0x80]]  ;;  %s4241_s22 = sld [smem:[#allocation4 + $0x81]] }
  0x82   :  { %v178_v4 = vstv %s3317_s27  ;;  %v164_v6 = vstv %s3316_s28  ;;  %s4244_s23 = sld [smem:[#allocation4 + $0x100]]  ;;  %s4246_s25 = sld [smem:[#allocation4 + $0x101]] }
  0x83   :  { %v180_v5 = vmul.f32 %v178_v4, %v4212_v0  ;;  %v166_v7 = vmul.f32 %v164_v6, %v4219_v1  ;;  %s4045_s8 = smov 127   ;;  %v179_v8 = vmul.f32 %v178_v4, %v4228_v2  ;;  %v235_v9 = vstv %s3320_s10  ;;  %s4256_s0 = sld [smem:[#allocation4 + $0x180]] }
  0x84   :  { %v165_v10 = vmul.f32 %v164_v6, %v4237_v3  ;;  %v249_v11 = vstv %s4214_s29  ;;  %v236_v12 = vmul.f32 %v235_v9, %v4237_v3  ;;  %v237_v13 = vmul.f32 %v235_v9, %v4219_v1  ;;  %s4258_s24 = sld [smem:[#allocation4 + $0x181]]  ;;  %s209_s27 = sld [smem:[#allocation9]] }
  0x85   :  { %185 = vrot.lane.b32.xlu1 %v180_v5, %s4045_s8  ;;  %171 = vrot.lane.b32.xlu0 %v166_v7, %s4045_s8  ;;  %v250_v15 = vmul.f32 %v249_v11, %v4228_v2  ;;  %v251_v16 = vmul.f32 %v249_v11, %v4212_v0  ;;  %v306_v31 = vstv %s4221_s6  ;;  %v320_v49 = vstv %s4223_s5  ;;  %s3322_s28 = sld [smem:[#allocation9 + $0x1]]  ;;  %s4047_s30 = smov 1  }
  0x86   :  { %v154_v14 = vstv %s153_s20  ;;  %v158_v17 = vstv %s3315_s21  ;;  %v307_v45 = vmul.f32 %v306_v31, %v4237_v3  ;;  %v308_v48 = vmul.f32 %v306_v31, %v4219_v1  ;;  %s3327_s14 = sld [smem:[#allocation9 + $0x2]]  ;;  %s3332_s10 = sld [smem:[#allocation9 + $0x3]] }
  0x87   :  { %v156_v18 = vmul.f32 %v154_v14, %v4219_v1  ;;  %v160_v19 = vmul.f32 %v158_v17, %v4212_v0  ;;  %v159_v20 = vmul.f32 %v158_v17, %v4228_v2  ;;  %v155_v21 = vmul.f32 %v154_v14, %v4237_v3  ;;  %s4334_s29 = sld [smem:[#allocation10 + $0x2]]  ;;  %s4338_s17 = sld [smem:[#allocation10]] }
  0x88   :  { %v225_v22 = vstv %s4239_s1  ;;  %v229_v23 = vstv %s4241_s22  ;;  %v296_v26 = vstv %s4244_s23  ;;  %v300_v33 = vstv %s4246_s25  ;;  %s4336_s15 = sld [smem:[#allocation10 + $0x82]]  ;;  %s4340_s6 = sld [smem:[#allocation10 + $0x1]] }
  0x89   :  { %183 = vrot.lane.b32.xlu1 %v179_v8, %s4045_s8  ;;  %169 = vrot.lane.b32.xlu0 %v165_v10, %s4045_s8  ;;  %v226_v24 = vmul.f32 %v225_v22, %v4237_v3  ;;  %v227_v25 = vmul.f32 %v225_v22, %v4219_v1  ;;  %v162_v27 = vadd.f32 %v160_v19, %v156_v18  ;;  %v367_v39 = vstv %s4256_s0  ;;  %s4342_s5 = sld [smem:[#allocation10 + $0x80]]  ;;  %s4344_s16 = sld [smem:[#allocation10 + $0x81]] }
  0x8a   :  { %v161_v28 = vadd.f32 %v159_v20, %v155_v21  ;;  %v230_v29 = vmul.f32 %v229_v23, %v4228_v2  ;;  %v231_v30 = vmul.f32 %v229_v23, %v4212_v0  ;;  %v297_v32 = vmul.f32 %v296_v26, %v4237_v3  ;;  %s4347_s3 = sld [smem:[#allocation10 + $0x100]]  ;;  %s4353_s4 = sld [smem:[#allocation10 + $0x182]] }
  0x8b   :  { %v298_v34 = vmul.f32 %v296_v26, %v4219_v1  ;;  %v301_v37 = vmul.f32 %v300_v33, %v4228_v2  ;;  %v302_v38 = vmul.f32 %v300_v33, %v4212_v0  ;;  %v371_v40 = vstv %s4258_s24  ;;  %s4358_s19 = sld [smem:[#allocation10 + $0x3]]  ;;  %s4360_s20 = sld [smem:[#allocation10 + $0x180]] }
  0x8c   :  { %v232_v35 = vadd.f32 %v230_v29, %v226_v24  ;;  %v233_v36 = vadd.f32 %v231_v30, %v227_v25  ;;  %v368_v43 = vmul.f32 %v367_v39, %v4237_v3  ;;  %v372_v44 = vmul.f32 %v371_v40, %v4228_v2  ;;  %s4362_s21 = sld [smem:[#allocation10 + $0x181]]  ;;  %s4374_s1 = sld [smem:[#allocation10 + $0x83]] }
  0x8d   :  { %240 = vrot.lane.b32.xlu1 %v236_v12, %s4045_s8  ;;  %242 = vrot.lane.b32.xlu0 %v237_v13, %s4045_s8  ;;  %v303_v41 = vadd.f32 %v301_v37, %v297_v32  ;;  %v304_v42 = vadd.f32 %v302_v38, %v298_v34  ;;  %v369_v46 = vmul.f32 %v367_v39, %v4219_v1  ;;  %v377_v54 = vstv %s4230_s26  ;;  %s4349_s26 = sld [smem:[#allocation10 + $0x101]]  ;;  %s4395_s22 = sld [smem:[#allocation10 + $0x103]] }
  0x8e   :  { %v373_v47 = vmul.f32 %v371_v40, %v4212_v0  ;;  %v374_v50 = vadd.f32 %v372_v44, %v368_v43  ;;  %v321_v52 = vmul.f32 %v320_v49, %v4228_v2  ;;  %v322_v53 = vmul.f32 %v320_v49, %v4212_v0  ;;  %s4412_s23 = sld [smem:[#allocation10 + $0x183]]  ;;  %s4448_s25 = sld [smem:[#allocation10 + $0x86]] }
  0x8f   :  { %v378_v55 = vmul.f32 %v377_v54, %v4237_v3  ;;  %v379_v56 = vmul.f32 %v377_v54, %v4219_v1  ;;  %v391_v57 = vstv %s4232_s18  ;;  %v4046_v25 = vmov 0.0   ;;  %s4351_s18 = sld [smem:[#allocation10 + $0x102]]  ;;  %s4450_s0 = sld [smem:[#allocation10 + $0x6]] }
  0x90   :  { %v375_v51 = vadd.f32 %v373_v47, %v369_v46  ;;  %v392_v58 = vmul.f32 %v391_v57, %v4228_v2  ;;  %v393_v59 = vmul.f32 %v391_v57, %v4212_v0  ;;  %146 = vst.msk [vmem:[#allocation2 + $0x8] sm:$0x3f] %vm144_vm0, %v4046_v25  ;;  %145 = vst.msk [vmem:[#allocation2] sm:$0x3f] %vm144_vm0, %v4046_v25  ;;  %v210_v33 = vstv %s209_s27  ;;  %s4460_s24 = sld [smem:[#allocation10 + $0x186]] }
  0x91   :  { %254 = vrot.lane.b32.xlu1 %v250_v15, %s4045_s8  ;;  %256 = vrot.lane.b32.xlu0 %v251_v16, %s4045_s8  ;;  %147 = vst.msk [vmem:[#allocation2 + $0x10] sm:$0x3f] %vm144_vm0, %v4046_v25  ;;  %148 = vst.msk [vmem:[#allocation2 + $0x18] sm:$0x3f] %vm144_vm0, %v4046_v25  ;;  %v281_v46 = vstv %s3322_s28  ;;  %v352_v57 = vstv %s3327_s14  ;;  %s4462_s27 = sld [smem:[#allocation10 + $0x106]]  ;;  %s4472_s28 = sld [smem:[#allocation10 + $0x7]] }
  0x92   :  { %149 = vst.msk [vmem:[#allocation2 + $0x20] sm:$0x3f] %vm144_vm0, %v4046_v25  ;;  %150 = vst.msk [vmem:[#allocation2 + $0x28] sm:$0x3f] %vm144_vm0, %v4046_v25  ;;  %s4491_s14 = sld [smem:[#allocation10 + $0x107]] }
  0x93   :  { %151 = vst.msk [vmem:[#allocation2 + $0x30] sm:$0x3f] %vm144_vm0, %v4046_v25  ;;  %152 = vst.msk [vmem:[#allocation2 + $0x38] sm:$0x3f] %vm144_vm0, %v4046_v25 }
  0x95   :  { %311 = vrot.lane.b32.xlu1 %v307_v45, %s4045_s8  ;;  %313 = vrot.lane.b32.xlu0 %v308_v48, %s4045_s8 }
  0x99   :  { %325 = vrot.lane.b32.xlu1 %v321_v52, %s4045_s8  ;;  %327 = vrot.lane.b32.xlu0 %v322_v53, %s4045_s8 }
  0x9d   :  { %382 = vrot.lane.b32.xlu1 %v378_v55, %s4045_s8  ;;  %384 = vrot.lane.b32.xlu0 %v379_v56, %s4045_s8 }
  0xa1   :  { %396 = vrot.lane.b32.xlu1 %v392_v58, %s4045_s8  ;;  %398 = vrot.lane.b32.xlu0 %v393_v59, %s4045_s8 }
  0xf7   :  { %v186_v60 = vpop.permute.xlu1 %185  ;;  %v172_v61 = vpop.permute.xlu0 %171 }
  0xf8   :  { %v176_v62 = vadd.f32 %v172_v61, %v162_v27 }
  0xfa   :  { %v190_v63 = vadd.f32 %v186_v60, %v176_v62 }
  0xfb   :  { %v184_v3 = vpop.permute.xlu1 %183  ;;  %v170_v4 = vpop.permute.xlu0 %169 }
  0xfc   :  { %v175_v1 = vadd.f32 %v170_v4, %v161_v28  ;;  %195 = vrot.lane.b32.xlu0 %v190_v63, %s4045_s8 }
  0xfe   :  { %v189_v5 = vadd.f32 %v184_v3, %v175_v1 }
  0xff   :  { %v241_v6 = vpop.permute.xlu1 %240  ;;  %v243_v7 = vpop.permute.xlu0 %242 }
 0x100   :  { %v246_v2 = vadd.f32 %v241_v6, %v232_v35  ;;  %v247_v8 = vadd.f32 %v243_v7, %v233_v36  ;;  %193 = vrot.lane.b32.xlu1 %v189_v5, %s4045_s8  ;;  %v423_v6 = vstv %s3332_s10  ;;  %s4495_s10 = sld [smem:[#allocation10 + $0x187]] }
 0x103   :  { %v255_v0 = vpop.permute.xlu1 %254  ;;  %v257_v10 = vpop.permute.xlu0 %256 }
 0x104   :  { %v260_v9 = vadd.f32 %v255_v0, %v246_v2  ;;  %v261_v11 = vadd.f32 %v257_v10, %v247_v8 }
 0x106   :  { %264 = vrot.lane.b32.xlu1 %v260_v9, %s4045_s8  ;;  %266 = vrot.lane.b32.xlu0 %v261_v11, %s4045_s8 }
 0x107   :  { %v312_v12 = vpop.permute.xlu1 %311  ;;  %v314_v14 = vpop.permute.xlu0 %313 }
 0x108   :  { %v317_v13 = vadd.f32 %v312_v12, %v303_v41  ;;  %v318_v15 = vadd.f32 %v314_v14, %v304_v42  ;;  %v490_v12 = vstv %s4336_s15  ;;  %s4501_s15 = sld [smem:[#allocation10 + $0x201]] }
 0x10b   :  { %v326_v16 = vpop.permute.xlu1 %325  ;;  %v328_v18 = vpop.permute.xlu0 %327 }
 0x10c   :  { %v331_v17 = vadd.f32 %v326_v16, %v317_v13  ;;  %v332_v19 = vadd.f32 %v328_v18, %v318_v15  ;;  %v442_v15 = vstv %s4338_s17  ;;  %v446_v16 = vstv %s4340_s6  ;;  %s4503_s17 = sld [smem:[#allocation10 + $0x280]]  ;;  %s4506_s6 = sld [smem:[#allocation10 + $0x281]] }
 0x10d   :  { %v484_v18 = vstv %s4344_s16  ;;  %s4512_s16 = sld [smem:[#allocation10 + $0x301]] }
 0x10e   :  { %335 = vrot.lane.b32.xlu1 %v331_v17, %s4045_s8  ;;  %337 = vrot.lane.b32.xlu0 %v332_v19, %s4045_s8 }
 0x10f   :  { %v383_v20 = vpop.permute.xlu1 %382  ;;  %v385_v22 = vpop.permute.xlu0 %384 }
 0x110   :  { %v388_v21 = vadd.f32 %v383_v20, %v374_v50  ;;  %v389_v23 = vadd.f32 %v385_v22, %v375_v51  ;;  %v518_v22 = vstv %s4347_s3  ;;  %s4514_s3 = sld [smem:[#allocation10 + $0x380]] }
 0x113   :  { %v397_v24 = vpop.permute.xlu1 %396  ;;  %v399_v27 = vpop.permute.xlu0 %398 }
 0x114   :  { %v402_v26 = vadd.f32 %v397_v24, %v388_v21  ;;  %v403_v28 = vadd.f32 %v399_v27, %v389_v23  ;;  %v522_v23 = vstv %s4349_s26  ;;  %v566_v27 = vstv %s4353_s4  ;;  %s4516_s26 = sld [smem:[#allocation10 + $0x381]]  ;;  %s4546_s4 = sld [smem:[#allocation10 + $0xa]] }
 0x116   :  { %406 = vrot.lane.b32.xlu1 %v402_v26, %s4045_s8  ;;  %408 = vrot.lane.b32.xlu0 %v403_v28, %s4045_s8 }
 0x16e   :  { %v196_v29 = vpop.permute.xlu0 %195 }
 0x16f   :  { %v200_v30 = vmax.f32 %v190_v63, %v196_v29 }
 0x171   :  { %v204_v31 = vrot.slane %v200_v30, 1 }
 0x172   :  { %v194_v32 = vpop.permute.xlu1 %193 }
 0x173   :  { %v208_v34 = vmax.f32 %v200_v30, %v204_v31  ;;  %v199_v35 = vmax.f32 %v189_v5, %v194_v32 }
 0x175   :  { %v203_v36 = vrot.slane %v199_v35, 1  ;;  %v212_v37 = vadd.f32 %v210_v33, %v208_v34 }
 0x177   :  { %v207_v38 = vmax.f32 %v199_v35, %v203_v36  ;;  %217 = vrot.lane.b32.xlu0 %v212_v37, %s4047_s30  ;;  %v466_v37 = vstv %s4358_s19  ;;  %s4566_s19 = sld [smem:[#allocation10 + $0x18a]] }
 0x178   :  { %v265_v39 = vpop.permute.xlu1 %264  ;;  %v267_v40 = vpop.permute.xlu0 %266 }
 0x179   :  { %v270_v41 = vmax.f32 %v260_v9, %v265_v39  ;;  %v271_v42 = vmax.f32 %v261_v11, %v267_v40  ;;  %v211_v43 = vadd.f32 %v210_v33, %v207_v38  ;;  %v452_v11 = vstv %s4334_s29  ;;  %s4497_s29 = sld [smem:[#allocation10 + $0x200]] }
 0x17a   :  { %v556_v38 = vstv %s4360_s20  ;;  %s4568_s20 = sld [smem:[#allocation10 + $0x10a]] }
 0x17b   :  { %v274_v44 = vrot.slane %v270_v41, 1  ;;  %v275_v45 = vrot.slane %v271_v42, 1  ;;  %215 = vrot.lane.b32.xlu1 %v211_v43, %s4047_s30  ;;  %v560_v43 = vstv %s4362_s21  ;;  %s4590_s21 = sld [smem:[#allocation10 + $0xb]] }
 0x17d   :  { %v278_v47 = vmax.f32 %v270_v41, %v274_v44  ;;  %v279_v48 = vmax.f32 %v271_v42, %v275_v45 }
 0x17f   :  { %v282_v49 = vadd.f32 %v281_v46, %v278_v47  ;;  %v283_v51 = vadd.f32 %v281_v46, %v279_v48  ;;  %v504_v47 = vstv %s4374_s1  ;;  %s4600_s1 = sld [smem:[#allocation10 + $0x8b]] }
 0x180   :  { %v336_v50 = vpop.permute.xlu1 %335  ;;  %v338_v52 = vpop.permute.xlu0 %337 }
 0x181   :  { %v341_v53 = vmax.f32 %v331_v17, %v336_v50  ;;  %286 = vrot.lane.b32.xlu1 %v282_v49, %s4047_s30  ;;  %v342_v54 = vmax.f32 %v332_v19, %v338_v52  ;;  %288 = vrot.lane.b32.xlu0 %v283_v51, %s4047_s30  ;;  %v480_v17 = vstv %s4342_s5  ;;  %s4508_s5 = sld [smem:[#allocation10 + $0x300]] }
 0x183   :  { %v345_v55 = vrot.slane %v341_v53, 1  ;;  %v346_v56 = vrot.slane %v342_v54, 1 }
 0x185   :  { %v349_v58 = vmax.f32 %v341_v53, %v345_v55  ;;  %v350_v59 = vmax.f32 %v342_v54, %v346_v56 }
 0x187   :  { %v353_v60 = vadd.f32 %v352_v57, %v349_v58  ;;  %v354_v62 = vadd.f32 %v352_v57, %v350_v59  ;;  %v542_v57 = vstv %s4395_s22  ;;  %s4611_s22 = sld [smem:[#allocation10 + $0x10b]] }
 0x188   :  { %v407_v61 = vpop.permute.xlu1 %406  ;;  %v409_v63 = vpop.permute.xlu0 %408 }
 0x189   :  { %v412_v3 = vmax.f32 %v402_v26, %v407_v61  ;;  %357 = vrot.lane.b32.xlu1 %v353_v60, %s4047_s30  ;;  %v413_v4 = vmax.f32 %v403_v28, %v409_v63  ;;  %359 = vrot.lane.b32.xlu0 %v354_v62, %s4047_s30  ;;  %v528_v26 = vstv %s4351_s18  ;;  %s4544_s18 = sld [smem:[#allocation10 + $0x8a]] }
 0x18b   :  { %v416_v1 = vrot.slane %v412_v3, 1  ;;  %v417_v5 = vrot.slane %v413_v4, 1 }
 0x18d   :  { %v420_v2 = vmax.f32 %v412_v3, %v416_v1  ;;  %v421_v7 = vmax.f32 %v413_v4, %v417_v5  ;;  %v580_v3 = vstv %s4412_s23  ;;  %s3411_s23 = sld [smem:[#allocation10 + $0x18b]] }
 0x18f   :  { %v424_v8 = vadd.f32 %v423_v6, %v420_v2  ;;  %v425_v0 = vadd.f32 %v423_v6, %v421_v7 }
 0x191   :  { %428 = vrot.lane.b32.xlu1 %v424_v8, %s4047_s30  ;;  %430 = vrot.lane.b32.xlu0 %v425_v0, %s4047_s30  ;;  %s4480_s30 = sld [smem:[#allocation10 + $0x87]] }
 0x1e9   :  { %v218_v9 = vpop.permute.xlu0 %217 }
 0x1ea   :  { %223 = vst.msk [vmem:[#allocation2 + $0x9] sm:$0xf] %vm221_vm1, %v218_v9 }
 0x1ed   :  { %v216_v10 = vpop.permute.xlu1 %215 }
 0x1ee   :  { %222 = vst.msk [vmem:[#allocation2 + $0x1] sm:$0xf] %vm221_vm1, %v216_v10 }
 0x1f1   :  { %v4364_v13 = vld [vmem:[#allocation2 + $0x8] sm:$0x1f] }
 0x1f2   :  { %v4366_v14 = vld [vmem:[#allocation2 + $0x9] sm:$0x1f]  ;;  %v454_v20 = vmul.f32 %v452_v11, %v4364_v13  ;;  %v492_v21 = vmul.f32 %v490_v12, %v4364_v13  ;;  %v444_v28 = vmul.f32 %v442_v15, %v4364_v13  ;;  %v482_v30 = vmul.f32 %v480_v17, %v4364_v13 }
 0x1f3   :  { %v287_v19 = vpop.permute.xlu1 %286  ;;  %v289_v24 = vpop.permute.xlu0 %288  ;;  %v448_v29 = vmul.f32 %v446_v16, %v4366_v14  ;;  %v486_v31 = vmul.f32 %v484_v18, %v4366_v14  ;;  %v520_v32 = vmul.f32 %v518_v22, %v4364_v13  ;;  %v524_v33 = vmul.f32 %v522_v23, %v4366_v14 }
 0x1f4   :  { %293 = vst.msk [vmem:[#allocation2 + $0x11] sm:$0xf] %vm221_vm1, %v287_v19  ;;  %294 = vst.msk [vmem:[#allocation2 + $0x19] sm:$0xf] %vm221_vm1, %v289_v24  ;;  %459 = vrot.lane.b32.xlu0 %v454_v20, %s4045_s8  ;;  %497 = vrot.lane.b32.xlu1 %v492_v21, %s4045_s8  ;;  %v530_v34 = vmul.f32 %v528_v26, %v4364_v13  ;;  %v568_v35 = vmul.f32 %v566_v27, %v4364_v13  ;;  %v882_v21 = vstv %s4460_s24  ;;  %s4641_s24 = sld [smem:[#allocation10 + $0x18e]] }
 0x1f5   :  { %v4392_v36 = vld [vmem:[#allocation2] sm:$0x1f]  ;;  %v4402_v40 = vadd.f32 %v448_v29, %v444_v28  ;;  %v4404_v41 = vadd.f32 %v486_v31, %v482_v30  ;;  %v4406_v42 = vadd.f32 %v524_v33, %v520_v32  ;;  %v468_v45 = vmul.f32 %v466_v37, %v4366_v14 }
 0x1f6   :  { %v4398_v39 = vld [vmem:[#allocation2 + $0x1] sm:$0x1f]  ;;  %v453_v46 = vmul.f32 %v452_v11, %v4392_v36  ;;  %v558_v49 = vmul.f32 %v556_v38, %v4364_v13  ;;  %v562_v50 = vmul.f32 %v560_v43, %v4366_v14  ;;  %v443_v52 = vmul.f32 %v442_v15, %v4392_v36 }
 0x1f7   :  { %v447_v51 = vmul.f32 %v446_v16, %v4398_v39  ;;  %v481_v53 = vmul.f32 %v480_v17, %v4392_v36  ;;  %v485_v54 = vmul.f32 %v484_v18, %v4398_v39  ;;  %v506_v55 = vmul.f32 %v504_v47, %v4366_v14 }
 0x1f8   :  { %535 = vrot.lane.b32.xlu0 %v530_v34, %s4045_s8  ;;  %573 = vrot.lane.b32.xlu1 %v568_v35, %s4045_s8  ;;  %v491_v56 = vmul.f32 %v490_v12, %v4392_v36  ;;  %v4427_v58 = vadd.f32 %v562_v50, %v558_v49  ;;  %v544_v62 = vmul.f32 %v542_v57, %v4366_v14  ;;  %v802_v17 = vstv %s4448_s25  ;;  %s4633_s25 = sld [smem:[#allocation10 + $0x8e]] }
 0x1f9   :  { %v4429_v59 = vadd.f32 %v447_v51, %v443_v52  ;;  %v4433_v60 = vadd.f32 %v485_v54, %v481_v53  ;;  %v529_v63 = vmul.f32 %v528_v26, %v4392_v36  ;;  %v519_v1 = vmul.f32 %v518_v22, %v4392_v36 }
 0x1fa   :  { %v523_v5 = vmul.f32 %v522_v23, %v4398_v39  ;;  %v557_v6 = vmul.f32 %v556_v38, %v4392_v36  ;;  %v561_v2 = vmul.f32 %v560_v43, %v4398_v39  ;;  %v582_v7 = vmul.f32 %v580_v3, %v4366_v14 }
 0x1fb   :  { %v358_v44 = vpop.permute.xlu1 %357  ;;  %v360_v48 = vpop.permute.xlu0 %359  ;;  %v567_v8 = vmul.f32 %v566_v27, %v4392_v36  ;;  %v505_v10 = vmul.f32 %v504_v47, %v4398_v39  ;;  %v467_v11 = vmul.f32 %v466_v37, %v4398_v39  ;;  %v581_v12 = vmul.f32 %v580_v3, %v4398_v39  ;;  %v4468_v16 = vld [vmem:[#allocation2 + $0x18] sm:$0x1f]  ;;  %v4488_v27 = vld [vmem:[#allocation2 + $0x10] sm:$0x1f] }
 0x1fc   :  { %364 = vst.msk [vmem:[#allocation2 + $0x21] sm:$0xf] %vm221_vm1, %v358_v44  ;;  %365 = vst.msk [vmem:[#allocation2 + $0x29] sm:$0xf] %vm221_vm1, %v360_v48  ;;  %473 = vrot.lane.b32.xlu1 %v468_v45, %s4045_s8  ;;  %457 = vrot.lane.b32.xlu0 %v453_v46, %s4045_s8  ;;  %v4452_v0 = vadd.f32 %v523_v5, %v519_v1  ;;  %v4454_v9 = vadd.f32 %v561_v2, %v557_v6  ;;  %v762_v18 = vstv %s4450_s0  ;;  %v4486_v26 = vld [vmem:[#allocation2 + $0x19] sm:$0x1f] }
 0x1fd   :  { %v543_v15 = vmul.f32 %v542_v57, %v4398_v39  ;;  %v804_v19 = vmul.f32 %v802_v17, %v4468_v16  ;;  %v764_v20 = vmul.f32 %v762_v18, %v4468_v16  ;;  %v842_v22 = vstv %s4462_s27  ;;  %v4542_v57 = vld [vmem:[#allocation2 + $0x11] sm:$0x1f]  ;;  %s4635_s0 = sld [smem:[#allocation10 + $0xe]] }
 0x1fe   :  { %v884_v23 = vmul.f32 %v882_v21, %v4468_v16  ;;  %v844_v24 = vmul.f32 %v842_v22, %v4468_v16  ;;  %v776_v28 = vstv %s4472_s28  ;;  %v763_v30 = vmul.f32 %v762_v18, %v4488_v27  ;;  %s4643_s27 = sld [smem:[#allocation10 + $0x10e]]  ;;  %s4653_s28 = sld [smem:[#allocation10 + $0xf]] }
 0x1ff   :  { %v778_v29 = vmul.f32 %v776_v28, %v4486_v26  ;;  %v816_v31 = vstv %s4480_s30  ;;  %v803_v33 = vmul.f32 %v802_v17, %v4488_v27  ;;  %v856_v34 = vstv %s4491_s14  ;;  %s4661_s30 = sld [smem:[#allocation10 + $0x8f]] }
 0x200   :  { %511 = vrot.lane.b32.xlu1 %v506_v55, %s4045_s8  ;;  %495 = vrot.lane.b32.xlu0 %v491_v56, %s4045_s8  ;;  %v818_v32 = vmul.f32 %v816_v31, %v4486_v26  ;;  %v858_v35 = vmul.f32 %v856_v34, %v4486_v26  ;;  %v843_v37 = vmul.f32 %v842_v22, %v4488_v27  ;;  %v896_v38 = vstv %s4495_s10  ;;  %s4672_s14 = sld [smem:[#allocation10 + $0x10f]] }
 0x201   :  { %v594_v43 = vstv %s4497_s29  ;;  %v598_v44 = vstv %s4501_s15  ;;  %v632_v45 = vstv %s4503_s17  ;;  %v636_v46 = vstv %s4506_s6  ;;  %s4679_s10 = sld [smem:[#allocation10 + $0x18f]]  ;;  %s4693_s29 = sld [smem:[#allocation10 + $0x4]] }
 0x202   :  { %v670_v47 = vstv %s4508_s5  ;;  %v674_v48 = vstv %s4512_s16  ;;  %v708_v49 = vstv %s4514_s3  ;;  %v883_v50 = vmul.f32 %v882_v21, %v4488_v27  ;;  %s4697_s15 = sld [smem:[#allocation10 + $0x5]]  ;;  %s4701_s17 = sld [smem:[#allocation10 + $0x282]] }
 0x203   :  { %v429_v61 = vpop.permute.xlu1 %428  ;;  %v431_v4 = vpop.permute.xlu0 %430  ;;  %v596_v51 = vmul.f32 %v594_v43, %v4364_v13  ;;  %v712_v52 = vstv %s4516_s26  ;;  %v898_v53 = vmul.f32 %v896_v38, %v4486_v26  ;;  %v600_v54 = vmul.f32 %v598_v44, %v4366_v14  ;;  %s4703_s6 = sld [smem:[#allocation10 + $0x202]]  ;;  %s4707_s5 = sld [smem:[#allocation10 + $0x84]] }
 0x204   :  { %435 = vst.msk [vmem:[#allocation2 + $0x31] sm:$0xf] %vm221_vm1, %v429_v61  ;;  %436 = vst.msk [vmem:[#allocation2 + $0x39] sm:$0xf] %vm221_vm1, %v431_v4  ;;  %549 = vrot.lane.b32.xlu1 %v544_v62, %s4045_s8  ;;  %533 = vrot.lane.b32.xlu0 %v529_v63, %s4045_s8  ;;  %v634_v55 = vmul.f32 %v632_v45, %v4364_v13  ;;  %v638_v56 = vmul.f32 %v636_v46, %v4366_v14  ;;  %s4711_s16 = sld [smem:[#allocation10 + $0x382]]  ;;  %s4713_s3 = sld [smem:[#allocation10 + $0x85]] }
 0x205   :  { %v672_v61 = vmul.f32 %v670_v47, %v4364_v13  ;;  %v676_v62 = vmul.f32 %v674_v48, %v4366_v14  ;;  %v710_v63 = vmul.f32 %v708_v49, %v4364_v13  ;;  %v4553_v3 = vadd.f32 %v600_v54, %v596_v51  ;;  %s4715_s26 = sld [smem:[#allocation10 + $0x302]] }
 0x206   :  { %v4555_v4 = vadd.f32 %v638_v56, %v634_v55  ;;  %v714_v1 = vmul.f32 %v712_v52, %v4366_v14  ;;  %v595_v6 = vmul.f32 %v594_v43, %v4392_v36  ;;  %v817_v2 = vmul.f32 %v816_v31, %v4542_v57  ;;  %v4606_v43 = vld [vmem:[#allocation2 + $0x29] sm:$0x1f] }
 0x207   :  { %v4558_v5 = vadd.f32 %v676_v62, %v672_v61  ;;  %v671_v17 = vmul.f32 %v670_v47, %v4392_v36  ;;  %v675_v18 = vmul.f32 %v674_v48, %v4398_v39  ;;  %v713_v21 = vmul.f32 %v712_v52, %v4398_v39  ;;  %v4631_v61 = vld [vmem:[#allocation2 + $0x21] sm:$0x1f] }
 0x208   :  { %587 = vrot.lane.b32.xlu1 %v582_v7, %s4045_s8  ;;  %571 = vrot.lane.b32.xlu0 %v567_v8, %s4045_s8  ;;  %v777_v7 = vmul.f32 %v776_v28, %v4542_v57  ;;  %v4563_v8 = vadd.f32 %v714_v1, %v710_v63  ;;  %v897_v22 = vmul.f32 %v896_v38, %v4542_v57  ;;  %v4586_v28 = vld [vmem:[#allocation2 + $0x28] sm:$0x1f]  ;;  %v1140_v48 = vstv %s4600_s1  ;;  %s4754_s1 = sld [smem:[#allocation10 + $0x283]] }
 0x209   :  { %v1180_v51 = vstv %s4611_s22  ;;  %v1220_v54 = vstv %s3411_s23  ;;  %v1141_v62 = vmul.f32 %v1140_v48, %v4631_v61  ;;  %s4769_s22 = sld [smem:[#allocation10 + $0x303]] }
 0x20a   :  { %v1182_v52 = vmul.f32 %v1180_v51, %v4606_v43  ;;  %v1222_v55 = vmul.f32 %v1220_v54, %v4606_v43  ;;  %v1221_v1 = vmul.f32 %v1220_v54, %v4631_v61  ;;  %s4779_s23 = sld [smem:[#allocation10 + $0x383]] }
 0x20c   :  { %509 = vrot.lane.b32.xlu1 %v505_v10, %s4045_s8  ;;  %471 = vrot.lane.b32.xlu0 %v467_v11, %s4045_s8  ;;  %v599_v10 = vmul.f32 %v598_v44, %v4398_v39  ;;  %v633_v11 = vmul.f32 %v632_v45, %v4392_v36  ;;  %v4608_v44 = vld [vmem:[#allocation2 + $0x20] sm:$0x1f]  ;;  %v1100_v45 = vstv %s4590_s21  ;;  %s4750_s21 = sld [smem:[#allocation10 + $0x185]] }
 0x20d   :  { %v1101_v63 = vmul.f32 %v1100_v45, %v4631_v61 }
 0x210   :  { %585 = vrot.lane.b32.xlu1 %v581_v12, %s4045_s8  ;;  %547 = vrot.lane.b32.xlu0 %v543_v15, %s4045_s8  ;;  %v637_v12 = vmul.f32 %v636_v46, %v4398_v39  ;;  %v4574_v15 = vadd.f32 %v599_v10, %v595_v6  ;;  %v1102_v46 = vmul.f32 %v1100_v45, %v4606_v43  ;;  %v1410_v10 = vstv %s4635_s0  ;;  %s4836_s0 = sld [smem:[#allocation10 + $0x9]] }
 0x211   :  { %v1181_v6 = vmul.f32 %v1180_v51, %v4631_v61  ;;  %v4699_v51 = vld [vmem:[#allocation2 + $0x31] sm:$0x1f] }
 0x214   :  { %809 = vrot.lane.b32.xlu1 %v804_v19, %s4045_s8  ;;  %769 = vrot.lane.b32.xlu0 %v764_v20, %s4045_s8  ;;  %v4578_v19 = vadd.f32 %v637_v12, %v633_v11  ;;  %v709_v20 = vmul.f32 %v708_v49, %v4392_v36  ;;  %v1142_v49 = vmul.f32 %v1140_v48, %v4606_v43 }
 0x216   :  { %v4592_v31 = vadd.f32 %v713_v21, %v709_v20 }
 0x218   :  { %889 = vrot.lane.b32.xlu1 %v884_v23, %s4045_s8  ;;  %849 = vrot.lane.b32.xlu0 %v844_v24, %s4045_s8  ;;  %v857_v23 = vmul.f32 %v856_v34, %v4542_v57  ;;  %v4584_v24 = vadd.f32 %v675_v18, %v671_v17  ;;  %v1206_v34 = vstv %s4566_s19  ;;  %v1530_v17 = vstv %s4641_s24  ;;  %s4735_s19 = sld [smem:[#allocation10 + $0x203]]  ;;  %s4838_s24 = sld [smem:[#allocation10 + $0x286]] }
 0x219   :  { %v1207_v56 = vmul.f32 %v1206_v34, %v4608_v44  ;;  %v1490_v18 = vstv %s4643_s27  ;;  %s4840_s27 = sld [smem:[#allocation10 + $0x206]] }
 0x21c   :  { %783 = vrot.lane.b32.xlu1 %v778_v29, %s4045_s8  ;;  %767 = vrot.lane.b32.xlu0 %v763_v30, %s4045_s8  ;;  %v1126_v29 = vstv %s4544_s18  ;;  %v1086_v30 = vstv %s4546_s4  ;;  %s4720_s18 = sld [smem:[#allocation10 + $0x104]]  ;;  %s4728_s4 = sld [smem:[#allocation10 + $0x105]] }
 0x21d   :  { %v1087_v47 = vmul.f32 %v1086_v30, %v4608_v44 }
 0x220   :  { %823 = vrot.lane.b32.xlu1 %v818_v32, %s4045_s8  ;;  %807 = vrot.lane.b32.xlu0 %v803_v33, %s4045_s8  ;;  %v1128_v32 = vmul.f32 %v1126_v29, %v4586_v28  ;;  %v1088_v33 = vmul.f32 %v1086_v30, %v4586_v28 }
 0x224   :  { %863 = vrot.lane.b32.xlu1 %v858_v35, %s4045_s8  ;;  %847 = vrot.lane.b32.xlu0 %v843_v37, %s4045_s8  ;;  %v1166_v35 = vstv %s4568_s20  ;;  %v1208_v37 = vmul.f32 %v1206_v34, %v4586_v28  ;;  %s4740_s20 = sld [smem:[#allocation10 + $0x184]] }
 0x225   :  { %v1168_v38 = vmul.f32 %v1166_v35, %v4586_v28 }
 0x228   :  { %903 = vrot.lane.b32.xlu1 %v898_v53, %s4045_s8  ;;  %887 = vrot.lane.b32.xlu0 %v883_v50, %s4045_s8  ;;  %v1127_v50 = vmul.f32 %v1126_v29, %v4608_v44  ;;  %v1167_v53 = vmul.f32 %v1166_v35, %v4608_v44  ;;  %v1424_v29 = vstv %s4653_s28  ;;  %s4848_s28 = sld [smem:[#allocation10 + $0x88]] }
 0x22c   :  { %821 = vrot.lane.b32.xlu1 %v817_v2, %s4045_s8  ;;  %781 = vrot.lane.b32.xlu0 %v777_v7, %s4045_s8  ;;  %v4649_v2 = vld [vmem:[#allocation2 + $0x38] sm:$0x1f]  ;;  %v1450_v7 = vstv %s4633_s25  ;;  %s4828_s25 = sld [smem:[#allocation10 + $0x8]] }
 0x22d   :  { %v1452_v11 = vmul.f32 %v1450_v7, %v4649_v2  ;;  %v1412_v12 = vmul.f32 %v1410_v10, %v4649_v2  ;;  %v1532_v20 = vmul.f32 %v1530_v17, %v4649_v2  ;;  %v1492_v21 = vmul.f32 %v1490_v18, %v4649_v2 }
 0x230   :  { %901 = vrot.lane.b32.xlu1 %v897_v22, %s4045_s8  ;;  %861 = vrot.lane.b32.xlu0 %v857_v23, %s4045_s8  ;;  %v4667_v22 = vld [vmem:[#allocation2 + $0x39] sm:$0x1f]  ;;  %v4669_v23 = vld [vmem:[#allocation2 + $0x30] sm:$0x1f] }
 0x231   :  { %v1426_v30 = vmul.f32 %v1424_v29, %v4667_v22  ;;  %v1451_v35 = vmul.f32 %v1450_v7, %v4669_v23  ;;  %v1491_v45 = vmul.f32 %v1490_v18, %v4669_v23  ;;  %v604_v18 = vstv %s4703_s6  ;;  %s4883_s6 = sld [smem:[#allocation10 + $0x188]] }
 0x234   :  { %1133 = vrot.lane.b32.xlu1 %v1128_v32, %s4045_s8  ;;  %1093 = vrot.lane.b32.xlu0 %v1088_v33, %s4045_s8  ;;  %v1411_v32 = vmul.f32 %v1410_v10, %v4669_v23  ;;  %v1464_v33 = vstv %s4661_s30  ;;  %v756_v10 = vstv %s4697_s15  ;;  %s4854_s30 = sld [smem:[#allocation10 + $0x386]]  ;;  %s4871_s15 = sld [smem:[#allocation10 + $0x109]] }
 0x235   :  { %v1466_v34 = vmul.f32 %v1464_v33, %v4667_v22  ;;  %v1465_v54 = vmul.f32 %v1464_v33, %v4699_v51 }
 0x238   :  { %1213 = vrot.lane.b32.xlu1 %v1208_v37, %s4045_s8  ;;  %1173 = vrot.lane.b32.xlu0 %v1168_v38, %s4045_s8  ;;  %v1504_v37 = vstv %s4672_s14  ;;  %s4856_s14 = sld [smem:[#allocation10 + $0x89]] }
 0x239   :  { %v1506_v38 = vmul.f32 %v1504_v37, %v4667_v22  ;;  %v1505_v7 = vmul.f32 %v1504_v37, %v4699_v51  ;;  %v796_v37 = vstv %s4713_s3  ;;  %s4914_s3 = sld [smem:[#allocation10 + $0x307]] }
 0x23c   :  { %1107 = vrot.lane.b32.xlu1 %v1102_v46, %s4045_s8  ;;  %1091 = vrot.lane.b32.xlu0 %v1087_v47, %s4045_s8  ;;  %v1544_v46 = vstv %s4679_s10  ;;  %s4858_s10 = sld [smem:[#allocation10 + $0x306]] }
 0x240   :  { %1147 = vrot.lane.b32.xlu1 %v1142_v49, %s4045_s8  ;;  %1131 = vrot.lane.b32.xlu0 %v1127_v50, %s4045_s8  ;;  %v1546_v49 = vmul.f32 %v1544_v46, %v4667_v22  ;;  %v1531_v50 = vmul.f32 %v1530_v17, %v4669_v23  ;;  %v642_v17 = vstv %s4701_s17  ;;  %s4878_s17 = sld [smem:[#allocation10 + $0x207]] }
 0x241   :  { %v644_v33 = vmul.f32 %v642_v17, %v4364_v13 }
 0x244   :  { %1187 = vrot.lane.b32.xlu1 %v1182_v52, %s4045_s8  ;;  %1171 = vrot.lane.b32.xlu0 %v1167_v53, %s4045_s8 }
 0x248   :  { %1227 = vrot.lane.b32.xlu1 %v1222_v55, %s4045_s8  ;;  %1211 = vrot.lane.b32.xlu0 %v1207_v56, %s4045_s8  ;;  %v1425_v55 = vmul.f32 %v1424_v29, %v4699_v51  ;;  %v750_v56 = vstv %s4693_s29  ;;  %v758_v29 = vmul.f32 %v756_v10, %v4486_v26  ;;  %s4863_s29 = sld [smem:[#allocation10 + $0x108]] }
 0x24c   :  { %1145 = vrot.lane.b32.xlu1 %v1141_v62, %s4045_s8  ;;  %1105 = vrot.lane.b32.xlu0 %v1101_v63, %s4045_s8 }
 0x250   :  { %1225 = vrot.lane.b32.xlu1 %v1221_v1, %s4045_s8  ;;  %1185 = vrot.lane.b32.xlu0 %v1181_v6, %s4045_s8  ;;  %v1545_v6 = vmul.f32 %v1544_v46, %v4699_v51 }
 0x254   :  { %1457 = vrot.lane.b32.xlu1 %v1452_v11, %s4045_s8  ;;  %1417 = vrot.lane.b32.xlu0 %v1412_v12, %s4045_s8  ;;  %v752_v11 = vmul.f32 %v750_v56, %v4468_v16 }
 0x258   :  { %1537 = vrot.lane.b32.xlu1 %v1532_v20, %s4045_s8  ;;  %1497 = vrot.lane.b32.xlu0 %v1492_v21, %s4045_s8 }
 0x25c   :  { %1431 = vrot.lane.b32.xlu1 %v1426_v30, %s4045_s8  ;;  %1415 = vrot.lane.b32.xlu0 %v1411_v32, %s4045_s8 }
 0x260   :  { %1471 = vrot.lane.b32.xlu1 %v1466_v34, %s4045_s8  ;;  %1455 = vrot.lane.b32.xlu0 %v1451_v35, %s4045_s8  ;;  %v606_v34 = vmul.f32 %v604_v18, %v4364_v13  ;;  %v718_v35 = vstv %s4711_s16  ;;  %s4899_s16 = sld [smem:[#allocation10 + $0x287]] }
 0x264   :  { %1511 = vrot.lane.b32.xlu1 %v1506_v38, %s4045_s8  ;;  %1495 = vrot.lane.b32.xlu0 %v1491_v45, %s4045_s8  ;;  %v680_v45 = vstv %s4715_s26  ;;  %s4924_s26 = sld [smem:[#allocation10 + $0x387]] }
 0x266   :  { %v460_v47 = vpop.permute.xlu0 %459  ;;  %v498_v48 = vpop.permute.xlu1 %497 }
 0x267   :  { %v464_v62 = vadd.f32 %v460_v47, %v4402_v40  ;;  %v790_v40 = vstv %s4707_s5  ;;  %v502_v20 = vadd.f32 %v498_v48, %v4404_v41  ;;  %v830_v47 = vstv %s4720_s18  ;;  %s4895_s5 = sld [smem:[#allocation10 + $0x189]]  ;;  %s4975_s18 = sld [smem:[#allocation10 + $0xc]] }
 0x268   :  { %1551 = vrot.lane.b32.xlu1 %v1546_v49, %s4045_s8  ;;  %1535 = vrot.lane.b32.xlu0 %v1531_v50, %s4045_s8  ;;  %v792_v38 = vmul.f32 %v790_v40, %v4468_v16  ;;  %v798_v50 = vmul.f32 %v796_v37, %v4486_v26 }
 0x26a   :  { %v536_v52 = vpop.permute.xlu0 %535  ;;  %v574_v53 = vpop.permute.xlu1 %573 }
 0x26b   :  { %v540_v48 = vadd.f32 %v536_v52, %v4406_v42  ;;  %v618_v42 = vstv %s4735_s19  ;;  %s4985_s19 = sld [smem:[#allocation10 + $0x28a]] }
 0x26c   :  { %1469 = vrot.lane.b32.xlu1 %v1465_v54, %s4045_s8  ;;  %1429 = vrot.lane.b32.xlu0 %v1425_v55, %s4045_s8 }
 0x26e   :  { %v4723_v63 = vpop.permute.xlu0 %457  ;;  %v474_v1 = vpop.permute.xlu1 %473 }
 0x26f   :  { %v478_v12 = vadd.f32 %v474_v1, %v464_v62  ;;  %v720_v62 = vmul.f32 %v718_v35, %v4364_v13  ;;  %v682_v1 = vmul.f32 %v680_v45, %v4364_v13  ;;  %v578_v13 = vadd.f32 %v574_v53, %v4427_v58 }
 0x270   :  { %1549 = vrot.lane.b32.xlu1 %v1545_v6, %s4045_s8  ;;  %1509 = vrot.lane.b32.xlu0 %v1505_v7, %s4045_s8  ;;  %v836_v6 = vstv %s4728_s4  ;;  %v832_v7 = vmul.f32 %v830_v47, %v4468_v16  ;;  %v463_v58 = vadd.f32 %v4723_v63, %v4429_v59  ;;  %v791_v59 = vmul.f32 %v790_v40, %v4488_v27  ;;  %s4983_s4 = sld [smem:[#allocation10 + $0xd]] }
 0x271   :  { %v754_v21 = vadd.f32 %v752_v11, %v478_v12  ;;  %v870_v12 = vstv %s4740_s20  ;;  %s4987_s20 = sld [smem:[#allocation10 + $0x20a]] }
 0x272   :  { %v496_v30 = vpop.permute.xlu0 %495  ;;  %v512_v32 = vpop.permute.xlu1 %511 }
 0x273   :  { %v516_v41 = vadd.f32 %v512_v32, %v502_v20  ;;  %v4756_v46 = vadd.f32 %v758_v29, %v754_v21  ;;  %v838_v21 = vmul.f32 %v836_v6, %v4486_v26  ;;  %v605_v29 = vmul.f32 %v604_v18, %v4392_v36 }
 0x274   :  { %649 = vrot.lane.b32.xlu1 %v644_v33, %s4045_s8  ;;  %611 = vrot.lane.b32.xlu0 %v606_v34, %s4045_s8  ;;  %v620_v34 = vmul.f32 %v618_v42, %v4366_v14  ;;  %v501_v53 = vadd.f32 %v496_v30, %v4433_v60  ;;  %v757_v30 = vmul.f32 %v756_v10, %v4542_v57 }
 0x275   :  { %v794_v49 = vadd.f32 %v792_v38, %v516_v41  ;;  %v876_v38 = vstv %s4750_s21  ;;  %v872_v41 = vmul.f32 %v870_v12, %v4468_v16  ;;  %v681_v10 = vmul.f32 %v680_v45, %v4392_v36  ;;  %s4995_s21 = sld [smem:[#allocation10 + $0x8c]] }
 0x276   :  { %v534_v54 = vpop.permute.xlu0 %533  ;;  %v550_v55 = vpop.permute.xlu1 %549 }
 0x277   :  { %v554_v11 = vadd.f32 %v550_v55, %v540_v48  ;;  %v4774_v52 = vadd.f32 %v798_v50, %v794_v49  ;;  %v656_v49 = vstv %s4754_s1  ;;  %v878_v55 = vmul.f32 %v876_v38, %v4486_v26  ;;  %s5001_s1 = sld [smem:[#allocation10 + $0x30a]] }
 0x278   :  { %725 = vrot.lane.b32.xlu1 %v720_v62, %s4045_s8  ;;  %687 = vrot.lane.b32.xlu0 %v682_v1, %s4045_s8  ;;  %v643_v62 = vmul.f32 %v642_v17, %v4392_v36  ;;  %v732_v17 = vstv %s4779_s23  ;;  %s5005_s23 = sld [smem:[#allocation10 + $0x38a]] }
 0x279   :  { %v834_v20 = vadd.f32 %v832_v7, %v554_v11  ;;  %v751_v7 = vmul.f32 %v750_v56, %v4488_v27  ;;  %v797_v56 = vmul.f32 %v796_v37, %v4542_v57 }
 0x27a   :  { %v572_v32 = vpop.permute.xlu0 %571  ;;  %v588_v33 = vpop.permute.xlu1 %587 }
 0x27b   :  { %v592_v48 = vadd.f32 %v588_v33, %v578_v13  ;;  %v4790_v50 = vadd.f32 %v838_v21, %v834_v20  ;;  %v658_v13 = vmul.f32 %v656_v49, %v4366_v14  ;;  %v694_v20 = vstv %s4769_s22  ;;  %s5003_s22 = sld [smem:[#allocation10 + $0x8d]] }
 0x27c   :  { %625 = vrot.lane.b32.xlu1 %v620_v34, %s4045_s8  ;;  %609 = vrot.lane.b32.xlu0 %v605_v29, %s4045_s8  ;;  %v539_v29 = vadd.f32 %v534_v54, %v4452_v0  ;;  %v577_v33 = vadd.f32 %v572_v32, %v4454_v9  ;;  %v837_v54 = vmul.f32 %v836_v6, %v4542_v57 }
 0x27d   :  { %v874_v18 = vadd.f32 %v872_v41, %v592_v48  ;;  %v831_v48 = vmul.f32 %v830_v47, %v4488_v27 }
 0x27e   :  { %v472_v1 = vpop.permute.xlu0 %471  ;;  %v510_v11 = vpop.permute.xlu1 %509 }
 0x27f   :  { %v477_v21 = vadd.f32 %v472_v1, %v463_v58  ;;  %v515_v63 = vadd.f32 %v510_v11, %v501_v53  ;;  %v4805_v60 = vadd.f32 %v878_v55, %v874_v18  ;;  %v871_v58 = vmul.f32 %v870_v12, %v4488_v27 }
 0x280   :  { %663 = vrot.lane.b32.xlu1 %v658_v13, %s4045_s8  ;;  %647 = vrot.lane.b32.xlu0 %v643_v62, %s4045_s8  ;;  %v696_v18 = vmul.f32 %v694_v20, %v4366_v14  ;;  %v877_v12 = vmul.f32 %v876_v38, %v4542_v57  ;;  %v734_v1 = vmul.f32 %v732_v17, %v4366_v14  ;;  %v1074_v13 = vstv %s4828_s25  ;;  %s5010_s25 = sld [smem:[#allocation10 + $0x10c]] }
 0x281   :  { %v753_v34 = vadd.f32 %v751_v7, %v477_v21  ;;  %v793_v40 = vadd.f32 %v791_v59, %v515_v63  ;;  %v719_v7 = vmul.f32 %v718_v35, %v4392_v36  ;;  %v657_v35 = vmul.f32 %v656_v49, %v4398_v39 }
 0x282   :  { %v548_v41 = vpop.permute.xlu0 %547  ;;  %v586_v53 = vpop.permute.xlu1 %585  ;;  %v619_v38 = vmul.f32 %v618_v42, %v4398_v39  ;;  %v733_v59 = vmul.f32 %v732_v17, %v4398_v39  ;;  %v695_v63 = vmul.f32 %v694_v20, %v4398_v39  ;;  %v1114_v39 = vstv %s4848_s28  ;;  %s5042_s28 = sld [smem:[#allocation10 + $0x18d]] }
 0x283   :  { %v553_v55 = vadd.f32 %v548_v41, %v539_v29  ;;  %v591_v37 = vadd.f32 %v586_v53, %v577_v33  ;;  %v4822_v62 = vadd.f32 %v757_v30, %v753_v34  ;;  %v4824_v0 = vadd.f32 %v797_v56, %v793_v40 }
 0x284   :  { %701 = vrot.lane.b32.xlu1 %v696_v18, %s4045_s8  ;;  %685 = vrot.lane.b32.xlu0 %v681_v10, %s4045_s8  ;;  %v1080_v30 = vstv %s4836_s0  ;;  %v1076_v56 = vmul.f32 %v1074_v13, %v4586_v28  ;;  %v962_v33 = vstv %s4838_s24  ;;  %s5018_s0 = sld [smem:[#allocation10 + $0x10d]]  ;;  %s5025_s24 = sld [smem:[#allocation10 + $0x20b]] }
 0x285   :  { %v833_v9 = vadd.f32 %v831_v48, %v553_v55  ;;  %v873_v47 = vadd.f32 %v871_v58, %v591_v37  ;;  %v1082_v34 = vmul.f32 %v1080_v30, %v4606_v43  ;;  %v964_v48 = vmul.f32 %v962_v33, %v4468_v16 }
 0x286   :  { %v770_v45 = vpop.permute.xlu0 %769  ;;  %v810_v32 = vpop.permute.xlu1 %809  ;;  %v1042_v53 = vstv %s4854_s30  ;;  %v1120_v18 = vstv %s4856_s14  ;;  %v1002_v55 = vstv %s4858_s10  ;;  %s5046_s30 = sld [smem:[#allocation10 + $0x28b]] }
 0x287   :  { %v4842_v11 = vadd.f32 %v837_v54, %v833_v9  ;;  %v4844_v6 = vadd.f32 %v877_v12, %v873_v47  ;;  %v774_v49 = vadd.f32 %v770_v45, %v4756_v46  ;;  %v922_v46 = vstv %s4840_s27  ;;  %s5030_s27 = sld [smem:[#allocation10 + $0x18c]]  ;;  %s5061_s14 = sld [smem:[#allocation10 + $0x30b]] }
 0x288   :  { %739 = vrot.lane.b32.xlu1 %v734_v1, %s4045_s8  ;;  %723 = vrot.lane.b32.xlu0 %v719_v7, %s4045_s8  ;;  %v814_v20 = vadd.f32 %v810_v32, %v4774_v52  ;;  %v924_v58 = vmul.f32 %v922_v46, %v4468_v16  ;;  %v1116_v52 = vmul.f32 %v1114_v39, %v4586_v28  ;;  %v1154_v9 = vstv %s4863_s29  ;;  %s5071_s10 = sld [smem:[#allocation10 + $0x38b]]  ;;  %s5132_s29 = sld [smem:[#allocation10 + $0x20e]] }
 0x289   :  { %v1122_v12 = vmul.f32 %v1120_v18, %v4606_v43  ;;  %v1044_v1 = vmul.f32 %v1042_v53, %v4468_v16  ;;  %v1004_v7 = vmul.f32 %v1002_v55, %v4468_v16 }
 0x28a   :  { %v850_v14 = vpop.permute.xlu0 %849  ;;  %v890_v36 = vpop.permute.xlu1 %889 }
 0x28b   :  { %v854_v47 = vadd.f32 %v850_v14, %v4790_v50  ;;  %v936_v50 = vstv %s4878_s17  ;;  %v894_v16 = vadd.f32 %v890_v36, %v4805_v60  ;;  %s5150_s17 = sld [smem:[#allocation10 + $0x30e]] }
 0x28c   :  { %661 = vrot.lane.b32.xlu1 %v657_v35, %s4045_s8  ;;  %623 = vrot.lane.b32.xlu0 %v619_v38, %s4045_s8  ;;  %v1160_v35 = vstv %s4871_s15  ;;  %v1156_v38 = vmul.f32 %v1154_v9, %v4586_v28  ;;  %s5134_s15 = sld [smem:[#allocation10 + $0x28e]] }
 0x28e   :  { %v4866_v21 = vpop.permute.xlu0 %767  ;;  %v784_v42 = vpop.permute.xlu1 %783 }
 0x28f   :  { %v788_v29 = vadd.f32 %v784_v42, %v774_v49  ;;  %v1194_v42 = vstv %s4883_s6  ;;  %v773_v60 = vadd.f32 %v4866_v21, %v4822_v62  ;;  %v1115_v62 = vmul.f32 %v1114_v39, %v4608_v44  ;;  %s5152_s6 = sld [smem:[#allocation10 + $0x38e]] }
 0x290   :  { %737 = vrot.lane.b32.xlu1 %v733_v59, %s4045_s8  ;;  %699 = vrot.lane.b32.xlu0 %v695_v63, %s4045_s8  ;;  %v1162_v63 = vmul.f32 %v1160_v35, %v4606_v43 }
 0x291   :  { %v1078_v17 = vadd.f32 %v1076_v56, %v788_v29 }
 0x292   :  { %v808_v40 = vpop.permute.xlu0 %807  ;;  %v824_v41 = vpop.permute.xlu1 %823 }
 0x293   :  { %v828_v10 = vadd.f32 %v824_v41, %v814_v20  ;;  %v4901_v37 = vadd.f32 %v1082_v34, %v1078_v17  ;;  %v938_v20 = vmul.f32 %v936_v50, %v4486_v26  ;;  %v923_v17 = vmul.f32 %v922_v46, %v4488_v27 }
 0x294   :  { %969 = vrot.lane.b32.xlu1 %v964_v48, %s4045_s8  ;;  %929 = vrot.lane.b32.xlu0 %v924_v58, %s4045_s8  ;;  %v1200_v34 = vstv %s4895_s5  ;;  %v1196_v41 = vmul.f32 %v1194_v42, %v4586_v28  ;;  %v976_v58 = vstv %s4899_s16  ;;  %v813_v36 = vadd.f32 %v808_v40, %v4824_v0  ;;  %s5164_s5 = sld [smem:[#allocation10 + $0x20f]] }
 0x295   :  { %v1118_v54 = vadd.f32 %v1116_v52, %v828_v10  ;;  %v1202_v10 = vmul.f32 %v1200_v34, %v4606_v43  ;;  %v1056_v40 = vstv %s4924_s26  ;;  %s5176_s16 = sld [smem:[#allocation10 + $0x28f]] }
 0x296   :  { %v848_v45 = vpop.permute.xlu0 %847  ;;  %v864_v32 = vpop.permute.xlu1 %863  ;;  %s5198_s26 = sld [smem:[#allocation10 + $0x38f]] }
 0x297   :  { %v868_v49 = vadd.f32 %v864_v32, %v854_v47  ;;  %v4919_v14 = vadd.f32 %v1122_v12, %v1118_v54  ;;  %v1075_v54 = vmul.f32 %v1074_v13, %v4608_v44  ;;  %v978_v32 = vmul.f32 %v976_v58, %v4486_v26 }
 0x298   :  { %1049 = vrot.lane.b32.xlu1 %v1044_v1, %s4045_s8  ;;  %1009 = vrot.lane.b32.xlu0 %v1004_v7, %s4045_s8  ;;  %v963_v1 = vmul.f32 %v962_v33, %v4488_v27  ;;  %v1016_v7 = vstv %s4914_s3  ;;  %v1081_v13 = vmul.f32 %v1080_v30, %v4631_v61  ;;  %v853_v33 = vadd.f32 %v848_v45, %v4842_v11  ;;  %s5187_s3 = sld [smem:[#allocation10 + $0x30f]] }
 0x299   :  { %v1158_v59 = vadd.f32 %v1156_v38, %v868_v49  ;;  %v1121_v49 = vmul.f32 %v1120_v18, %v4631_v61  ;;  %v1003_v30 = vmul.f32 %v1002_v55, %v4488_v27  ;;  %v1161_v45 = vmul.f32 %v1160_v35, %v4631_v61 }
 0x29a   :  { %v888_v56 = vpop.permute.xlu0 %887  ;;  %v904_v29 = vpop.permute.xlu1 %903 }
 0x29b   :  { %v908_v48 = vadd.f32 %v904_v29, %v894_v16  ;;  %v4935_v52 = vadd.f32 %v1162_v63, %v1158_v59  ;;  %v893_v16 = vadd.f32 %v888_v56, %v4844_v6  ;;  %v1155_v29 = vmul.f32 %v1154_v9, %v4608_v44 }
 0x29c   :  { %943 = vrot.lane.b32.xlu1 %v938_v20, %s4045_s8  ;;  %927 = vrot.lane.b32.xlu0 %v923_v17, %s4045_s8  ;;  %v1195_v20 = vmul.f32 %v1194_v42, %v4608_v44  ;;  %v1201_v42 = vmul.f32 %v1200_v34, %v4631_v61  ;;  %v937_v34 = vmul.f32 %v936_v50, %v4542_v57 }
 0x29d   :  { %v1198_v46 = vadd.f32 %v1196_v41, %v908_v48  ;;  %v1018_v41 = vmul.f32 %v1016_v7, %v4486_v26 }
 0x29e   :  { %v782_v47 = vpop.permute.xlu0 %781  ;;  %v822_v12 = vpop.permute.xlu1 %821 }
 0x29f   :  { %v787_v38 = vadd.f32 %v782_v47, %v773_v60  ;;  %v827_v21 = vadd.f32 %v822_v12, %v813_v36  ;;  %v4952_v0 = vadd.f32 %v1202_v10, %v1198_v46  ;;  %v1058_v36 = vmul.f32 %v1056_v40, %v4486_v26 }
 0x2a0   :  { %983 = vrot.lane.b32.xlu1 %v978_v32, %s4045_s8  ;;  %967 = vrot.lane.b32.xlu0 %v963_v1, %s4045_s8  ;;  %v1043_v46 = vmul.f32 %v1042_v53, %v4488_v27  ;;  %v977_v53 = vmul.f32 %v976_v58, %v4542_v57  ;;  %v1398_v47 = vstv %s4975_s18  ;;  %v1057_v12 = vmul.f32 %v1056_v40, %v4542_v57  ;;  %s5220_s18 = sld [smem:[#allocation10 + $0x204]] }
 0x2a1   :  { %v1077_v59 = vadd.f32 %v1075_v54, %v787_v38  ;;  %v1117_v39 = vadd.f32 %v1115_v62, %v827_v21  ;;  %v1017_v32 = vmul.f32 %v1016_v7, %v4542_v57  ;;  %v1404_v1 = vstv %s4983_s4  ;;  %s5224_s4 = sld [smem:[#allocation10 + $0x205]] }
 0x2a2   :  { %v862_v63 = vpop.permute.xlu0 %861  ;;  %v902_v17 = vpop.permute.xlu1 %901  ;;  %v1400_v38 = vmul.f32 %v1398_v47, %v4649_v2  ;;  %v1286_v21 = vstv %s4985_s19  ;;  %v1438_v57 = vstv %s4995_s21  ;;  %s5230_s19 = sld [smem:[#allocation10 + $0x284]] }
 0x2a3   :  { %v867_v48 = vadd.f32 %v862_v63, %v853_v33  ;;  %v907_v18 = vadd.f32 %v902_v17, %v893_v16  ;;  %v4969_v60 = vadd.f32 %v1081_v13, %v1077_v59  ;;  %v4971_v11 = vadd.f32 %v1121_v49, %v1117_v39  ;;  %s5243_s21 = sld [smem:[#allocation10 + $0x304]] }
 0x2a4   :  { %1023 = vrot.lane.b32.xlu1 %v1018_v41, %s4045_s8  ;;  %1007 = vrot.lane.b32.xlu0 %v1003_v30, %s4045_s8  ;;  %v1406_v13 = vmul.f32 %v1404_v1, %v4667_v22  ;;  %v1288_v16 = vmul.f32 %v1286_v21, %v4586_v28  ;;  %v1326_v39 = vstv %s5001_s1  ;;  %v1444_v63 = vstv %s5003_s22  ;;  %s5248_s1 = sld [smem:[#allocation10 + $0x305]]  ;;  %s5262_s22 = sld [smem:[#allocation10 + $0x384]] }
 0x2a5   :  { %v1157_v6 = vadd.f32 %v1155_v29, %v867_v48  ;;  %v1197_v9 = vadd.f32 %v1195_v20, %v907_v18  ;;  %v1366_v20 = vstv %s5005_s23  ;;  %v1478_v41 = vstv %s5010_s25  ;;  %s5273_s23 = sld [smem:[#allocation10 + $0x385]]  ;;  %s5342_s25 = sld [smem:[#allocation10 + $0x208]] }
 0x2a6   :  { %v1094_v55 = vpop.permute.xlu0 %1093  ;;  %v1134_v56 = vpop.permute.xlu1 %1133  ;;  %v1446_v18 = vmul.f32 %v1444_v63, %v4667_v22 }
 0x2a7   :  { %v4989_v10 = vadd.f32 %v1161_v45, %v1157_v6  ;;  %v4991_v35 = vadd.f32 %v1201_v42, %v1197_v9  ;;  %v1098_v58 = vadd.f32 %v1094_v55, %v4901_v37  ;;  %v1246_v37 = vstv %s4987_s20  ;;  %s5234_s20 = sld [smem:[#allocation10 + $0x285]] }
 0x2a8   :  { %1063 = vrot.lane.b32.xlu1 %v1058_v36, %s4045_s8  ;;  %1047 = vrot.lane.b32.xlu0 %v1043_v46, %s4045_s8  ;;  %v1138_v7 = vadd.f32 %v1134_v56, %v4919_v14  ;;  %v1248_v59 = vmul.f32 %v1246_v37, %v4586_v28  ;;  %v1440_v14 = vmul.f32 %v1438_v57, %v4649_v2  ;;  %v1484_v55 = vstv %s5018_s0  ;;  %s5344_s0 = sld [smem:[#allocation10 + $0x209]] }
 0x2a9   :  { %v1328_v45 = vmul.f32 %v1326_v39, %v4586_v28  ;;  %v1368_v42 = vmul.f32 %v1366_v20, %v4586_v28  ;;  %v1480_v56 = vmul.f32 %v1478_v41, %v4649_v2 }
 0x2aa   :  { %v1174_v26 = vpop.permute.xlu0 %1173  ;;  %v1214_v27 = vpop.permute.xlu1 %1213 }
 0x2ab   :  { %v1178_v30 = vadd.f32 %v1174_v26, %v4935_v52  ;;  %v1260_v52 = vstv %s5025_s24  ;;  %v1518_v26 = vstv %s5030_s27  ;;  %v1218_v28 = vadd.f32 %v1214_v27, %v4952_v0  ;;  %s5350_s24 = sld [smem:[#allocation10 + $0x288]]  ;;  %s5352_s27 = sld [smem:[#allocation10 + $0x289]] }
 0x2ac   :  { %981 = vrot.lane.b32.xlu1 %v977_v53, %s4045_s8  ;;  %941 = vrot.lane.b32.xlu0 %v937_v34, %s4045_s8  ;;  %v1486_v34 = vmul.f32 %v1484_v55, %v4667_v22 }
 0x2ae   :  { %v5013_v54 = vpop.permute.xlu0 %1091  ;;  %v1108_v50 = vpop.permute.xlu1 %1107 }
 0x2af   :  { %v1112_v62 = vadd.f32 %v1108_v50, %v1098_v58  ;;  %v1097_v0 = vadd.f32 %v5013_v54, %v4969_v60  ;;  %v1439_v60 = vmul.f32 %v1438_v57, %v4669_v23 }
 0x2b0   :  { %1061 = vrot.lane.b32.xlu1 %v1057_v12, %s4045_s8  ;;  %1021 = vrot.lane.b32.xlu0 %v1017_v32, %s4045_s8  ;;  %v1247_v12 = vmul.f32 %v1246_v37, %v4608_v44  ;;  %v1262_v32 = vmul.f32 %v1260_v52, %v4606_v43 }
 0x2b1   :  { %v1402_v40 = vadd.f32 %v1400_v38, %v1112_v62  ;;  %v1524_v38 = vstv %s5042_s28  ;;  %v1520_v62 = vmul.f32 %v1518_v26, %v4649_v2  ;;  %s5355_s28 = sld [smem:[#allocation10 + $0x308]] }
 0x2b2   :  { %v1132_v49 = vpop.permute.xlu0 %1131  ;;  %v1148_v33 = vpop.permute.xlu1 %1147 }
 0x2b3   :  { %v1152_v29 = vadd.f32 %v1148_v33, %v1138_v7  ;;  %v5048_v17 = vadd.f32 %v1406_v13, %v1402_v40  ;;  %v1300_v40 = vstv %s5046_s30  ;;  %v1137_v27 = vadd.f32 %v1132_v49, %v4971_v11  ;;  %s5359_s30 = sld [smem:[#allocation10 + $0x309]] }
 0x2b4   :  { %1293 = vrot.lane.b32.xlu1 %v1288_v16, %s4045_s8  ;;  %1253 = vrot.lane.b32.xlu0 %v1248_v59, %s4045_s8  ;;  %v1526_v33 = vmul.f32 %v1524_v38, %v4667_v22  ;;  %v1399_v59 = vmul.f32 %v1398_v47, %v4669_v23  ;;  %v1380_v49 = vstv %s5071_s10  ;;  %v1405_v47 = vmul.f32 %v1404_v1, %v4699_v51  ;;  %s5366_s10 = sld [smem:[#allocation10 + $0x389]] }
 0x2b5   :  { %v1442_v48 = vadd.f32 %v1440_v14, %v1152_v29  ;;  %v1287_v29 = vmul.f32 %v1286_v21, %v4608_v44  ;;  %v1445_v21 = vmul.f32 %v1444_v63, %v4699_v51 }
 0x2b6   :  { %v1172_v6 = vpop.permute.xlu0 %1171  ;;  %v1188_v9 = vpop.permute.xlu1 %1187 }
 0x2b7   :  { %v1192_v36 = vadd.f32 %v1188_v9, %v1178_v30  ;;  %v5066_v46 = vadd.f32 %v1446_v18, %v1442_v48  ;;  %v1302_v30 = vmul.f32 %v1300_v40, %v4606_v43  ;;  %v1340_v48 = vstv %s5061_s14  ;;  %s5362_s14 = sld [smem:[#allocation10 + $0x388]] }
 0x2b8   :  { %1333 = vrot.lane.b32.xlu0 %v1328_v45, %s4045_s8  ;;  %1373 = vrot.lane.b32.xlu1 %v1368_v42, %s4045_s8  ;;  %v1177_v9 = vadd.f32 %v1172_v6, %v4989_v10  ;;  %v1342_v1 = vmul.f32 %v1340_v48, %v4606_v43  ;;  %v1485_v6 = vmul.f32 %v1484_v55, %v4699_v51 }
 0x2b9   :  { %v1482_v53 = vadd.f32 %v1480_v56, %v1192_v36  ;;  %v1479_v36 = vmul.f32 %v1478_v41, %v4669_v23 }
 0x2ba   :  { %v1212_v58 = vpop.permute.xlu0 %1211  ;;  %v1228_v50 = vpop.permute.xlu1 %1227 }
 0x2bb   :  { %v1232_v7 = vadd.f32 %v1228_v50, %v1218_v28  ;;  %v5082_v13 = vadd.f32 %v1486_v34, %v1482_v53  ;;  %v1217_v45 = vadd.f32 %v1212_v58, %v4991_v35  ;;  %v1519_v28 = vmul.f32 %v1518_v26, %v4669_v23 }
 0x2bc   :  { %1251 = vrot.lane.b32.xlu0 %v1247_v12, %s4045_s8  ;;  %1267 = vrot.lane.b32.xlu1 %v1262_v32, %s4045_s8  ;;  %v1327_v34 = vmul.f32 %v1326_v39, %v4608_v44  ;;  %v1525_v26 = vmul.f32 %v1524_v38, %v4699_v51  ;;  %v1367_v32 = vmul.f32 %v1366_v20, %v4608_v44 }
 0x2bd   :  { %v1522_v37 = vadd.f32 %v1520_v62, %v1232_v7  ;;  %v1382_v62 = vmul.f32 %v1380_v49, %v4606_v43  ;;  %v1261_v43 = vmul.f32 %v1260_v52, %v4631_v61  ;;  %v1301_v44 = vmul.f32 %v1300_v40, %v4631_v61 }
 0x2be   :  { %v1106_v16 = vpop.permute.xlu0 %1105  ;;  %v1146_v14 = vpop.permute.xlu1 %1145  ;;  %v1381_v52 = vmul.f32 %v1380_v49, %v4631_v61  ;;  %v1610_v40 = vstv %s5134_s15  ;;  %v1584_v49 = vstv %s5164_s5  ;;  %s5386_s15 = sld [smem:[#allocation10 + $0x20d]]  ;;  %s5397_s5 = sld [smem:[#allocation10 + $0x30c]] }
 0x2bf   :  { %v1111_v18 = vadd.f32 %v1106_v16, %v1097_v0  ;;  %v1151_v11 = vadd.f32 %v1146_v14, %v1137_v27  ;;  %v5099_v54 = vadd.f32 %v1526_v33, %v1522_v37  ;;  %v1341_v37 = vmul.f32 %v1340_v48, %v4631_v61 }
 0x2c0   :  { %1291 = vrot.lane.b32.xlu0 %v1287_v29, %s4045_s8  ;;  %1307 = vrot.lane.b32.xlu1 %v1302_v30, %s4045_s8  ;;  %v1570_v33 = vstv %s5132_s29  ;;  %v1612_v29 = vmul.f32 %v1610_v40, %v4649_v2  ;;  %v1650_v30 = vstv %s5150_s17  ;;  %s5384_s29 = sld [smem:[#allocation10 + $0x20c]] }
 0x2c1   :  { %v1401_v42 = vadd.f32 %v1399_v59, %v1111_v18  ;;  %v1441_v57 = vadd.f32 %v1439_v60, %v1151_v11  ;;  %v1572_v14 = vmul.f32 %v1570_v33, %v4649_v2  ;;  %v1690_v48 = vstv %s5152_s6  ;;  %s5392_s17 = sld [smem:[#allocation10 + $0x28c]]  ;;  %s5394_s6 = sld [smem:[#allocation10 + $0x28d]] }
 0x2c2   :  { %v1186_v56 = vpop.permute.xlu0 %1185  ;;  %v1226_v53 = vpop.permute.xlu1 %1225  ;;  %v1652_v60 = vmul.f32 %v1650_v30, %v4649_v2  ;;  %v1692_v11 = vmul.f32 %v1690_v48, %v4649_v2 }
 0x2c3   :  { %v1191_v50 = vadd.f32 %v1186_v56, %v1177_v9  ;;  %v1231_v63 = vadd.f32 %v1226_v53, %v1217_v45  ;;  %v5116_v12 = vadd.f32 %v1405_v47, %v1401_v42  ;;  %v5118_v10 = vadd.f32 %v1445_v21, %v1441_v57 }
 0x2c4   :  { %1331 = vrot.lane.b32.xlu0 %v1327_v34, %s4045_s8  ;;  %1347 = vrot.lane.b32.xlu1 %v1342_v1, %s4045_s8  ;;  %v1571_v9 = vmul.f32 %v1570_v33, %v4669_v23  ;;  %v1586_v45 = vmul.f32 %v1584_v49, %v4667_v22  ;;  %v1624_v42 = vstv %s5176_s16  ;;  %v1611_v56 = vmul.f32 %v1610_v40, %v4669_v23  ;;  %s5401_s16 = sld [smem:[#allocation10 + $0x30d]] }
 0x2c5   :  { %v1481_v35 = vadd.f32 %v1479_v36, %v1191_v50  ;;  %v1521_v41 = vadd.f32 %v1519_v28, %v1231_v63  ;;  %v1626_v36 = vmul.f32 %v1624_v42, %v4667_v22  ;;  %v1664_v28 = vstv %s5187_s3  ;;  %s5404_s3 = sld [smem:[#allocation10 + $0x38c]] }
 0x2c6   :  { %v5124_v39 = vpop.permute.xlu0 %1417  ;;  %v5126_v58 = vpop.permute.xlu1 %1457  ;;  %v1651_v1 = vmul.f32 %v1650_v30, %v4669_v23  ;;  %v1666_v50 = vmul.f32 %v1664_v28, %v4667_v22  ;;  %v1704_v63 = vstv %s5198_s26  ;;  %v1665_v40 = vmul.f32 %v1664_v28, %v4699_v51  ;;  %s5408_s26 = sld [smem:[#allocation10 + $0x38d]] }
 0x2c7   :  { %v5136_v7 = vadd.f32 %v1485_v6, %v1481_v35  ;;  %v5138_v0 = vadd.f32 %v1525_v26, %v1521_v41  ;;  %v1691_v6 = vmul.f32 %v1690_v48, %v4669_v23  ;;  %v1706_v26 = vmul.f32 %v1704_v63, %v4667_v22 }
 0x2c8   :  { %1371 = vrot.lane.b32.xlu0 %v1367_v32, %s4045_s8  ;;  %1387 = vrot.lane.b32.xlu1 %v1382_v62, %s4045_s8  ;;  %v1585_v23 = vmul.f32 %v1584_v49, %v4699_v51  ;;  %v1625_v22 = vmul.f32 %v1624_v42, %v4699_v51  ;;  %v3854_v49 = vld [vmem:[#allocation2 + $0x19] sm:$0x1f] }
 0x2ca   :  { %v5142_v55 = vpop.permute.xlu0 %1497  ;;  %v5144_v38 = vpop.permute.xlu1 %1537 }
 0x2cc   :  { %1265 = vrot.lane.b32.xlu0 %v1261_v43, %s4045_s8  ;;  %1305 = vrot.lane.b32.xlu1 %v1301_v44, %s4045_s8 }
 0x2ce   :  { %v5156_v20 = vpop.permute.xlu0 %1415  ;;  %v5158_v27 = vpop.permute.xlu1 %1431 }
 0x2d0   :  { %1345 = vrot.lane.b32.xlu0 %v1341_v37, %s4045_s8  ;;  %1385 = vrot.lane.b32.xlu1 %v1381_v52, %s4045_s8  ;;  %v910_v37 = vstv %s5220_s18  ;;  %s5442_s18 = sld [smem:[#allocation12]] }
 0x2d2   :  { %v5168_v16 = vpop.permute.xlu0 %1455  ;;  %v5170_v59 = vpop.permute.xlu1 %1471 }
 0x2d4   :  { %1577 = vrot.lane.b32.xlu0 %v1572_v14, %s4045_s8  ;;  %1617 = vrot.lane.b32.xlu1 %v1612_v29, %s4045_s8  ;;  %v1705_v14 = vmul.f32 %v1704_v63, %v4699_v51  ;;  %v916_v29 = vstv %s5224_s4  ;;  %v950_v51 = vstv %s5230_s19  ;;  %s5444_s4 = sld [smem:[#allocation12 + $0x1]]  ;;  %s5454_s19 = sld [smem:[#allocation12 + $0x2]] }
 0x2d6   :  { %v5180_v61 = vpop.permute.xlu0 %1495  ;;  %v5182_v18 = vpop.permute.xlu1 %1511 }
 0x2d8   :  { %1657 = vrot.lane.b32.xlu0 %v1652_v60, %s4045_s8  ;;  %1697 = vrot.lane.b32.xlu1 %v1692_v11, %s4045_s8  ;;  %v1422_v60 = vadd.f32 %v5124_v39, %v5048_v17  ;;  %v1462_v11 = vadd.f32 %v5126_v58, %v5066_v46  ;;  %v956_v58 = vstv %s5234_s20  ;;  %s5456_s20 = sld [smem:[#allocation12 + $0x3]] }
 0x2da   :  { %v5191_v47 = vpop.permute.xlu0 %1535  ;;  %v5193_v21 = vpop.permute.xlu1 %1551  ;;  %v5270_v17 = vadd.f32 %v5170_v59, %v1462_v11  ;;  %v990_v59 = vstv %s5243_s21  ;;  %s5534_s21 = sld [smem:[#allocation12 + $0x4]] }
 0x2dc   :  { %1575 = vrot.lane.b32.xlu0 %v1571_v9, %s4045_s8  ;;  %1591 = vrot.lane.b32.xlu1 %v1586_v45, %s4045_s8  ;;  %v918_v9 = vmul.f32 %v3854_v49, %v916_v29  ;;  %v5267_v45 = vadd.f32 %v5158_v27, %v1422_v60  ;;  %v1542_v27 = vadd.f32 %v5144_v38, %v5099_v54  ;;  %v996_v54 = vstv %s5248_s1  ;;  %s5537_s1 = sld [smem:[#allocation12 + $0x5]] }
 0x2de   :  { %v5202_v2 = vpop.permute.xlu0 %1429  ;;  %v5204_v57 = vpop.permute.xlu1 %1469 }
 0x2e0   :  { %1615 = vrot.lane.b32.xlu0 %v1611_v56, %s4045_s8  ;;  %1631 = vrot.lane.b32.xlu1 %v1626_v36, %s4045_s8 }
 0x2e2   :  { %v5211_v53 = vpop.permute.xlu0 %1509  ;;  %v5213_v34 = vpop.permute.xlu1 %1549 }
 0x2e4   :  { %1655 = vrot.lane.b32.xlu0 %v1651_v1, %s4045_s8  ;;  %1671 = vrot.lane.b32.xlu1 %v1666_v50, %s4045_s8  ;;  %v1502_v1 = vadd.f32 %v5142_v55, %v5082_v13  ;;  %v958_v50 = vmul.f32 %v3854_v49, %v956_v58 }
 0x2e6   :  { %v612_v35 = vpop.permute.xlu0 %611  ;;  %v650_v41 = vpop.permute.xlu1 %649  ;;  %v5288_v63 = vadd.f32 %v5182_v18, %v1502_v1  ;;  %v1461_v18 = vadd.f32 %v5168_v16, %v5118_v10 }
 0x2e7   :  { %v616_v32 = vadd.f32 %v612_v35, %v4553_v3  ;;  %v654_v62 = vadd.f32 %v650_v41, %v4555_v4  ;;  %v5291_v35 = vadd.f32 %v5193_v21, %v1542_v27  ;;  %v1030_v21 = vstv %s5262_s22  ;;  %s5539_s22 = sld [smem:[#allocation12 + $0x6]] }
 0x2e8   :  { %1695 = vrot.lane.b32.xlu0 %v1691_v6, %s4045_s8  ;;  %1711 = vrot.lane.b32.xlu1 %v1706_v26, %s4045_s8 }
 0x2ea   :  { %v688_v43 = vpop.permute.xlu0 %687  ;;  %v726_v44 = vpop.permute.xlu1 %725 }
 0x2eb   :  { %v692_v3 = vadd.f32 %v688_v43, %v4558_v5  ;;  %v5238_v4 = vadd.f32 %v726_v44, %v4563_v8  ;;  %v3853_v8 = vld [vmem:[#allocation2 + $0x18] sm:$0x1f]  ;;  %v998_v43 = vmul.f32 %v3854_v49, %v996_v54  ;;  %v5310_v44 = vadd.f32 %v5204_v57, %v1461_v18 }
 0x2ec   :  { %1589 = vrot.lane.b32.xlu0 %v1585_v23, %s4045_s8  ;;  %1629 = vrot.lane.b32.xlu1 %v1625_v22, %s4045_s8  ;;  %v912_v30 = vmul.f32 %v3853_v8, %v910_v37  ;;  %v952_v56 = vmul.f32 %v3853_v8, %v950_v51  ;;  %v992_v41 = vmul.f32 %v3853_v8, %v990_v59 }
 0x2ed   :  { %v1032_v16 = vmul.f32 %v3853_v8, %v1030_v21 }
 0x2ee   :  { %v610_v52 = vpop.permute.xlu0 %609  ;;  %v626_v33 = vpop.permute.xlu1 %625 }
 0x2ef   :  { %v5251_v5 = vadd.f32 %v610_v52, %v4574_v15  ;;  %v630_v48 = vadd.f32 %v626_v33, %v616_v32  ;;  %v1421_v32 = vadd.f32 %v5156_v20, %v5116_v12  ;;  %v1036_v20 = vstv %s5273_s23  ;;  %s5542_s23 = sld [smem:[#allocation12 + $0x7]] }
 0x2f0   :  { %1669 = vrot.lane.b32.xlu0 %v1665_v40, %s4045_s8  ;;  %1709 = vrot.lane.b32.xlu1 %v1705_v14, %s4045_s8  ;;  %s4048_s8 = smov 126   ;;  %v1501_v52 = vadd.f32 %v5180_v61, %v5136_v7  ;;  %v1038_v33 = vmul.f32 %v3854_v49, %v1036_v20  ;;  %v3855_v40 = vld [vmem:[#allocation2 + $0x10] sm:$0x1f] }
 0x2f1   :  { %v914_v15 = vadd.f32 %v912_v30, %v630_v48  ;;  %v911_v7 = vmul.f32 %v3855_v40, %v910_v37  ;;  %v951_v14 = vmul.f32 %v3855_v40, %v950_v51  ;;  %v3856_v48 = vld [vmem:[#allocation2 + $0x11] sm:$0x1f]  ;;  %v991_v11 = vmul.f32 %v3855_v40, %v990_v59 }
 0x2f2   :  { %v648_v39 = vpop.permute.xlu0 %647  ;;  %v664_v46 = vpop.permute.xlu1 %663  ;;  %v917_v60 = vmul.f32 %v3856_v48, %v916_v29  ;;  %v957_v37 = vmul.f32 %v3856_v48, %v956_v58  ;;  %v1031_v49 = vmul.f32 %v3855_v40, %v1030_v21  ;;  %v1037_v1 = vmul.f32 %v3856_v48, %v1036_v20 }
 0x2f3   :  { %v653_v42 = vadd.f32 %v648_v39, %v4578_v19  ;;  %v668_v36 = vadd.f32 %v664_v46, %v654_v62  ;;  %v5276_v28 = vadd.f32 %v918_v9, %v914_v15  ;;  %v1274_v21 = vstv %s5350_s24 }
 0x2f4   :  { %1722 = vrot.lane.b32.xlu0 %v5267_v45, %s4048_s8  ;;  %1790 = vrot.lane.b32.xlu1 %v5270_v17, %s4048_s8 }
 0x2f5   :  { %v954_v19 = vadd.f32 %v952_v56, %v668_v36  ;;  %v997_v36 = vmul.f32 %v3856_v48, %v996_v54 }
 0x2f6   :  { %v686_v13 = vpop.permute.xlu0 %685  ;;  %v702_v55 = vpop.permute.xlu1 %701 }
 0x2f7   :  { %v691_v38 = vadd.f32 %v686_v13, %v4584_v24  ;;  %v706_v6 = vadd.f32 %v702_v55, %v692_v3  ;;  %v5295_v26 = vadd.f32 %v958_v50, %v954_v19  ;;  %v5307_v24 = vadd.f32 %v5202_v2, %v1421_v32 }
 0x2f8   :  { %1850 = vrot.lane.b32.xlu0 %v5288_v63, %s4048_s8  ;;  %1910 = vrot.lane.b32.xlu1 %v5291_v35, %s4048_s8  ;;  %v1541_v2 = vadd.f32 %v5191_v47, %v5138_v0  ;;  %v1234_v13 = vstv %s5342_s25 }
 0x2f9   :  { %v994_v62 = vadd.f32 %v992_v41, %v706_v6  ;;  %v1240_v41 = vstv %s5344_s0  ;;  %v3857_v6 = vld [vmem:[#allocation2 + $0x28] sm:$0x1f] }
 0x2fa   :  { %v724_v23 = vpop.permute.xlu0 %723  ;;  %v740_v12 = vpop.permute.xlu1 %739  ;;  %v1236_v32 = vmul.f32 %v3857_v6, %v1234_v13 }
 0x2fb   :  { %v729_v10 = vadd.f32 %v724_v23, %v4592_v31  ;;  %v744_v22 = vadd.f32 %v740_v12, %v5238_v4  ;;  %v5315_v3 = vadd.f32 %v998_v43, %v994_v62  ;;  %v5326_v31 = vadd.f32 %v5211_v53, %v1501_v52  ;;  %v3858_v23 = vld [vmem:[#allocation2 + $0x29] sm:$0x1f] }
 0x2fc   :  { %1720 = vrot.lane.b32.xlu0 %v5307_v24, %s4048_s8  ;;  %1788 = vrot.lane.b32.xlu1 %v5310_v44, %s4048_s8  ;;  %v5329_v4 = vadd.f32 %v5213_v34, %v1541_v2  ;;  %v1242_v12 = vmul.f32 %v3858_v23, %v1240_v41  ;;  %v1314_v2 = vstv %s5355_s28 }
 0x2fd   :  { %v1034_v57 = vadd.f32 %v1032_v16, %v744_v22  ;;  %v1276_v16 = vmul.f32 %v3857_v6, %v1274_v21 }
 0x2fe   :  { %v624_v61 = vpop.permute.xlu0 %623  ;;  %v662_v0 = vpop.permute.xlu1 %661 }
 0x2ff   :  { %v629_v47 = vadd.f32 %v624_v61, %v5251_v5  ;;  %v667_v8 = vadd.f32 %v662_v0, %v653_v42  ;;  %v5334_v30 = vadd.f32 %v1038_v33, %v1034_v57  ;;  %v1320_v61 = vstv %s5359_s30 }
 0x300   :  { %1848 = vrot.lane.b32.xlu0 %v5326_v31, %s4048_s8  ;;  %1908 = vrot.lane.b32.xlu1 %v5329_v4, %s4048_s8  ;;  %v1316_v0 = vmul.f32 %v3857_v6, %v1314_v2  ;;  %v1322_v48 = vmul.f32 %v3858_v23, %v1320_v61 }
 0x301   :  { %v913_v53 = vadd.f32 %v911_v7, %v629_v47  ;;  %v953_v34 = vadd.f32 %v951_v14, %v667_v8  ;;  %v1354_v8 = vstv %s5362_s14 }
 0x302   :  { %v700_v15 = vpop.permute.xlu0 %699  ;;  %v738_v5 = vpop.permute.xlu1 %737 }
 0x303   :  { %v705_v51 = vadd.f32 %v700_v15, %v691_v38  ;;  %v743_v9 = vadd.f32 %v738_v5, %v729_v10  ;;  %v919_v39 = vadd.f32 %v917_v60, %v913_v53  ;;  %v959_v46 = vadd.f32 %v957_v37, %v953_v34 }
 0x304   :  { %v1280_v10 = vstv %s5352_s27  ;;  %v1356_v15 = vmul.f32 %v3857_v6, %v1354_v8 }
 0x305   :  { %v993_v42 = vadd.f32 %v991_v11, %v705_v51  ;;  %v1033_v56 = vadd.f32 %v1031_v49, %v743_v9  ;;  %v1360_v11 = vstv %s5366_s10 }
 0x306   :  { %v930_v27 = vpop.permute.xlu0 %929  ;;  %v970_v19 = vpop.permute.xlu1 %969 }
 0x307   :  { %v5346_v29 = vadd.f32 %v997_v36, %v993_v42  ;;  %v5348_v58 = vadd.f32 %v1037_v1, %v1033_v56  ;;  %v934_v55 = vadd.f32 %v930_v27, %v5276_v28  ;;  %v974_v62 = vadd.f32 %v970_v19, %v5295_v26  ;;  %v3859_v56 = vld [vmem:[#allocation2 + $0x20] sm:$0x1f] }
 0x308   :  { %v1282_v26 = vmul.f32 %v3858_v23, %v1280_v10  ;;  %v1362_v42 = vmul.f32 %v3858_v23, %v1360_v11  ;;  %v1235_v36 = vmul.f32 %v3859_v56, %v1234_v13 }
 0x30a   :  { %v1010_v59 = vpop.permute.xlu0 %1009  ;;  %v1050_v50 = vpop.permute.xlu1 %1049 }
 0x30b   :  { %v1014_v57 = vadd.f32 %v1010_v59, %v5315_v3  ;;  %v1054_v53 = vadd.f32 %v1050_v50, %v5334_v30  ;;  %v1275_v59 = vmul.f32 %v3859_v56, %v1274_v21 }
 0x30e   :  { %v928_v54 = vpop.permute.xlu0 %927  ;;  %v944_v38 = vpop.permute.xlu1 %943 }
 0x30f   :  { %v948_v18 = vadd.f32 %v944_v38, %v934_v55  ;;  %v933_v5 = vadd.f32 %v928_v54, %v919_v39  ;;  %v3860_v55 = vld [vmem:[#allocation2 + $0x21] sm:$0x1f]  ;;  %v1315_v54 = vmul.f32 %v3859_v56, %v1314_v2 }
 0x310   :  { %v1241_v38 = vmul.f32 %v3860_v55, %v1240_v41 }
 0x311   :  { %v1238_v43 = vadd.f32 %v1236_v32, %v948_v18  ;;  %v1281_v32 = vmul.f32 %v3860_v55, %v1280_v10  ;;  %v1321_v10 = vmul.f32 %v3860_v55, %v1320_v61 }
 0x312   :  { %v968_v28 = vpop.permute.xlu0 %967  ;;  %v984_v20 = vpop.permute.xlu1 %983 }
 0x313   :  { %v988_v22 = vadd.f32 %v984_v20, %v974_v62  ;;  %v5368_v52 = vadd.f32 %v1242_v12, %v1238_v43  ;;  %v973_v51 = vadd.f32 %v968_v28, %v959_v46  ;;  %v1355_v43 = vmul.f32 %v3859_v56, %v1354_v8 }
 0x315   :  { %v1278_v33 = vadd.f32 %v1276_v16, %v988_v22  ;;  %v1361_v16 = vmul.f32 %v3860_v55, %v1360_v11 }
 0x316   :  { %v1008_v40 = vpop.permute.xlu0 %1007  ;;  %v1024_v7 = vpop.permute.xlu1 %1023 }
 0x317   :  { %v1028_v47 = vadd.f32 %v1024_v7, %v1014_v57  ;;  %v5373_v14 = vadd.f32 %v1282_v26, %v1278_v33  ;;  %v1013_v6 = vadd.f32 %v1008_v40, %v5346_v29  ;;  %v1558_v26 = vstv %s5384_s29 }
 0x319   :  { %v1318_v34 = vadd.f32 %v1316_v0, %v1028_v47  ;;  %v1564_v0 = vstv %s5386_s15  ;;  %v3861_v47 = vld [vmem:[#allocation2 + $0x38] sm:$0x1f] }
 0x31a   :  { %v1048_v60 = vpop.permute.xlu0 %1047  ;;  %v1064_v37 = vpop.permute.xlu1 %1063  ;;  %v1560_v8 = vmul.f32 %v3861_v47, %v1558_v26 }
 0x31b   :  { %v1068_v49 = vadd.f32 %v1064_v37, %v1054_v53  ;;  %v5378_v3 = vadd.f32 %v1322_v48, %v1318_v34  ;;  %v1053_v18 = vadd.f32 %v1048_v60, %v5348_v58  ;;  %v1598_v34 = vstv %s5392_s17  ;;  %v3862_v37 = vld [vmem:[#allocation2 + $0x39] sm:$0x1f] }
 0x31c   :  { %v1566_v11 = vmul.f32 %v3862_v37, %v1564_v0 }
 0x31d   :  { %v1358_v9 = vadd.f32 %v1356_v15, %v1068_v49  ;;  %v1604_v49 = vstv %s5394_s6 }
 0x31e   :  { %v942_v1 = vpop.permute.xlu0 %941  ;;  %v982_v27 = vpop.permute.xlu1 %981 }
 0x31f   :  { %v947_v19 = vadd.f32 %v942_v1, %v933_v5  ;;  %v987_v30 = vadd.f32 %v982_v27, %v973_v51  ;;  %v5380_v50 = vadd.f32 %v1362_v42, %v1358_v9  ;;  %v1600_v5 = vmul.f32 %v3861_v47, %v1598_v34 }
 0x320   :  { %v1638_v42 = vstv %s5397_s5  ;;  %v1606_v1 = vmul.f32 %v3862_v37, %v1604_v49 }
 0x321   :  { %v1237_v39 = vadd.f32 %v1235_v36, %v947_v19  ;;  %v1277_v46 = vadd.f32 %v1275_v59, %v987_v30  ;;  %v1644_v19 = vstv %s5401_s16  ;;  %v1640_v59 = vmul.f32 %v3861_v47, %v1638_v42 }
 0x322   :  { %v1022_v62 = vpop.permute.xlu0 %1021  ;;  %v1062_v13 = vpop.permute.xlu1 %1061 }
 0x323   :  { %v1027_v23 = vadd.f32 %v1022_v62, %v1013_v6  ;;  %v1067_v12 = vadd.f32 %v1062_v13, %v1053_v18  ;;  %v1243_v28 = vadd.f32 %v1241_v38, %v1237_v39  ;;  %v1283_v21 = vadd.f32 %v1281_v32, %v1277_v46 }
 0x324   :  { %v1678_v38 = vstv %s5404_s3  ;;  %v1646_v18 = vmul.f32 %v3862_v37, %v1644_v19 }
 0x325   :  { %v1317_v20 = vadd.f32 %v1315_v54, %v1027_v23  ;;  %v1357_v41 = vadd.f32 %v1355_v43, %v1067_v12  ;;  %v1684_v54 = vstv %s5408_s26  ;;  %v1680_v62 = vmul.f32 %v3861_v47, %v1678_v38 }
 0x326   :  { %v1254_v29 = vpop.permute.xlu0 %1253  ;;  %v1294_v22 = vpop.permute.xlu1 %1293 }
 0x327   :  { %v5388_v58 = vadd.f32 %v1321_v10, %v1317_v20  ;;  %v5390_v2 = vadd.f32 %v1361_v16, %v1357_v41  ;;  %v1258_v40 = vadd.f32 %v1254_v29, %v5368_v52  ;;  %v1298_v48 = vadd.f32 %v1294_v22, %v5373_v14  ;;  %v3863_v41 = vld [vmem:[#allocation2 + $0x30] sm:$0x1f] }
 0x328   :  { %v1686_v20 = vmul.f32 %v3862_v37, %v1684_v54  ;;  %v1559_v10 = vmul.f32 %v3863_v41, %v1558_v26 }
 0x32a   :  { %v1334_v57 = vpop.permute.xlu0 %1333  ;;  %v1374_v33 = vpop.permute.xlu1 %1373 }
 0x32b   :  { %v1338_v56 = vadd.f32 %v1334_v57, %v5378_v3  ;;  %v1378_v32 = vadd.f32 %v1374_v33, %v5380_v50  ;;  %v1599_v57 = vmul.f32 %v3863_v41, %v1598_v34  ;;  %v3864_v33 = vld [vmem:[#allocation2 + $0x31] sm:$0x1f] }
 0x32e   :  { %v1252_v7 = vpop.permute.xlu0 %1251  ;;  %v1268_v61 = vpop.permute.xlu1 %1267 }
 0x32f   :  { %v1272_v53 = vadd.f32 %v1268_v61, %v1258_v40  ;;  %v1257_v3 = vadd.f32 %v1252_v7, %v1243_v28  ;;  %v1565_v61 = vmul.f32 %v3864_v33, %v1564_v0 }
 0x331   :  { %v1562_v60 = vadd.f32 %v1560_v8, %v1272_v53  ;;  %v1605_v8 = vmul.f32 %v3864_v33, %v1604_v49 }
 0x332   :  { %v1292_v52 = vpop.permute.xlu0 %1291  ;;  %v1308_v15 = vpop.permute.xlu1 %1307 }
 0x333   :  { %v1312_v51 = vadd.f32 %v1308_v15, %v1298_v48  ;;  %v1568_v9 = vadd.f32 %v1566_v11, %v1562_v60  ;;  %v1297_v23 = vadd.f32 %v1292_v52, %v1283_v21  ;;  %v1639_v21 = vmul.f32 %v3863_v41, %v1638_v42 }
 0x334   :  { %v1679_v60 = vmul.f32 %v3863_v41, %v1678_v38 }
 0x335   :  { %v1602_v36 = vadd.f32 %v1600_v5, %v1312_v51  ;;  %v1645_v51 = vmul.f32 %v3864_v33, %v1644_v19 }
 0x336   :  { %v1332_v14 = vpop.permute.xlu0 %1331  ;;  %v1348_v27 = vpop.permute.xlu1 %1347 }
 0x337   :  { %v1352_v30 = vadd.f32 %v1348_v27, %v1338_v56  ;;  %v1608_v55 = vadd.f32 %v1606_v1, %v1602_v36  ;;  %v1337_v53 = vadd.f32 %v1332_v14, %v5388_v58  ;;  %v1685_v56 = vmul.f32 %v3864_v33, %v1684_v54 }
 0x339   :  { %v1642_v6 = vadd.f32 %v1640_v59, %v1352_v30 }
 0x33a   :  { %v1372_v39 = vpop.permute.xlu0 %1371  ;;  %v1388_v46 = vpop.permute.xlu1 %1387 }
 0x33b   :  { %v1392_v43 = vadd.f32 %v1388_v46, %v1378_v32  ;;  %v1648_v13 = vadd.f32 %v1646_v18, %v1642_v6  ;;  %v1377_v47 = vadd.f32 %v1372_v39, %v5390_v2 }
 0x33d   :  { %v1682_v12 = vadd.f32 %v1680_v62, %v1392_v43 }
 0x33e   :  { %v1266_v16 = vpop.permute.xlu0 %1265  ;;  %v1306_v29 = vpop.permute.xlu1 %1305 }
 0x33f   :  { %v1271_v22 = vadd.f32 %v1266_v16, %v1257_v3  ;;  %v1311_v40 = vadd.f32 %v1306_v29, %v1297_v23  ;;  %v1688_v50 = vadd.f32 %v1686_v20, %v1682_v12 }
 0x341   :  { %v1561_v48 = vadd.f32 %v1559_v10, %v1271_v22  ;;  %v1601_v28 = vadd.f32 %v1599_v57, %v1311_v40  ;;  %v4049_v22 = vmov 1983009808   ;;  %v1744_v40 = vlaneseq }
 0x342   :  { %v1346_v7 = vpop.permute.xlu0 %1345  ;;  %v1386_v37 = vpop.permute.xlu1 %1385  ;;  %v1742_v57 = vunpack.c.l.s4 %v4049_v22 }
 0x343   :  { %v1351_v26 = vadd.f32 %v1346_v7, %v1337_v53  ;;  %v1391_v11 = vadd.f32 %v1386_v37, %v1377_v47  ;;  %v1567_v52 = vadd.f32 %v1565_v61, %v1561_v48  ;;  %v1607_v15 = vadd.f32 %v1605_v8, %v1601_v28  ;;  %v3751_v61 = vld [vmem:[#allocation14 + $0x40] sm:$0xff]  }
 0x344   :  { %v3752_v8 = vld [vmem:[#allocation14] sm:$0xff]   ;;  %v1743_v47 = vunpack.c.0.s8 %v1742_v57  ;;  %v1745_v48 = vshrl.u32 %v1744_v40, 7  ;;  %3559 = vmatprep.subr.bf16.mxu0 %v3751_v61 }
 0x345   :  { %v1641_v34 = vadd.f32 %v1639_v21, %v1351_v26  ;;  %v1681_v5 = vadd.f32 %v1679_v60, %v1391_v11  ;;  %v3753_v53 = vld [vmem:[#allocation14 + $0xc0] sm:$0xff]   ;;  %3560 = vmatpush3.bf16.msra.mxu0 %v3752_v8 }
 0x346   :  { %v1578_v0 = vpop.permute.xlu0 %1577  ;;  %v1618_v49 = vpop.permute.xlu1 %1617  ;;  %v3754_v7 = vld [vmem:[#allocation14 + $0x80] sm:$0xff]   ;;  %3581 = vmatprep.subr.bf16.mxu1 %v3753_v53 }
 0x347   :  { %v1647_v36 = vadd.f32 %v1645_v51, %v1641_v34  ;;  %v1687_v58 = vadd.f32 %v1685_v56, %v1681_v5  ;;  %v1582_v14 = vadd.f32 %v1578_v0, %v1568_v9  ;;  %v1622_v30 = vadd.f32 %v1618_v49, %v1608_v55  ;;  %3582 = vmatpush3.bf16.msra.mxu1 %v3754_v7  ;;  %v3757_v34 = vld [vmem:[#allocation14 + $0xc8] sm:$0xff]   ;;  %v3764_v7 = vld [vmem:[#allocation14 + $0x18] sm:$0xff]  }
 0x348   :  { %v1736_v5 = vstv %s5442_s18  ;;  %v5461_v51 = vsub.s32 %v1743_v47, %v1745_v48  ;;  %v1804_v56 = vstv %s5444_s4  ;;  %3583 = vmatprep.subr.bf16.mxu1 %v3757_v34 }
 0x34a   :  { %v1658_v1 = vpop.permute.xlu0 %1657  ;;  %v1698_v2 = vpop.permute.xlu1 %1697 }
 0x34b   :  { %v1662_v19 = vadd.f32 %v1658_v1, %v1648_v13  ;;  %v1702_v9 = vadd.f32 %v1698_v2, %v1688_v50 }
 0x34e   :  { %v1576_v27 = vpop.permute.xlu0 %1575  ;;  %v1592_v42 = vpop.permute.xlu1 %1591 }
 0x34f   :  { %v5418_v59 = vadd.f32 %v1592_v42, %v1582_v14  ;;  %v1581_v43 = vadd.f32 %v1576_v27, %v1567_v52  ;;  %v3755_v52 = vld [vmem:[#allocation14 + $0x48] sm:$0xff]   ;;  %v3761_v14 = vld [vmem:[#allocation14 + $0xd0] sm:$0xff]  }
 0x350   :  { %3561 = vmatprep.subr.bf16.mxu0 %v3755_v52  ;;  %v3760_v27 = vld [vmem:[#allocation14 + $0x10] sm:$0xff]  }
 0x351   :  { %1970 = vrot.lane.b32.xlu0 %v5418_v59, %s4048_s8 }
 0x352   :  { %v1616_v38 = vpop.permute.xlu0 %1615  ;;  %v1632_v32 = vpop.permute.xlu1 %1631 }
 0x353   :  { %v5422_v6 = vadd.f32 %v1632_v32, %v1622_v30  ;;  %v1621_v3 = vadd.f32 %v1616_v38, %v1607_v15  ;;  %v3756_v15 = vld [vmem:[#allocation14 + $0x8] sm:$0xff]  }
 0x354   :  { %3562 = vmatpush3.bf16.msra.mxu0 %v3756_v15 }
 0x355   :  { %2030 = vrot.lane.b32.xlu1 %v5422_v6, %s4048_s8 }
 0x356   :  { %v1656_v18 = vpop.permute.xlu0 %1655  ;;  %v1672_v39 = vpop.permute.xlu1 %1671 }
 0x357   :  { %v5426_v46 = vadd.f32 %v1672_v39, %v1662_v19  ;;  %v1661_v41 = vadd.f32 %v1656_v18, %v1647_v36  ;;  %v3759_v36 = vld [vmem:[#allocation14 + $0x50] sm:$0xff]   ;;  %v3763_v18 = vld [vmem:[#allocation14 + $0x58] sm:$0xff]   ;;  %v1864_v39 = vstv %s5454_s19  ;;  %s4051_s19 = smov [#allocation20]  }
 0x358   :  { %3563 = vmatprep.subr.bf16.mxu0 %v3759_v36  ;;  %v3762_v19 = vld [vmem:[#allocation14 + $0x90] sm:$0xff]  }
 0x359   :  { %2090 = vrot.lane.b32.xlu0 %v5426_v46, %s4048_s8  ;;  %3564 = vmatpush3.bf16.msra.mxu0 %v3760_v27  ;;  %v3770_v27 = vld [vmem:[#allocation14 + $0xa0] sm:$0xff]  }
 0x35a   :  { %v1696_v55 = vpop.permute.xlu0 %1695  ;;  %v1712_v54 = vpop.permute.xlu1 %1711  ;;  %3565 = vmatprep.subr.bf16.mxu0 %v3763_v18 }
 0x35b   :  { %v5430_v62 = vadd.f32 %v1712_v54, %v1702_v9  ;;  %v1701_v10 = vadd.f32 %v1696_v55, %v1687_v58 }
 0x35d   :  { %2150 = vrot.lane.b32.xlu1 %v5430_v62, %s4048_s8  ;;  %3566 = vmatpush3.bf16.msra.mxu0 %v3764_v7  ;;  %v3776_v7 = vld [vmem:[#allocation14 + $0x30] sm:$0xff]  }
 0x35e   :  { %v1590_v13 = vpop.permute.xlu0 %1589  ;;  %v1630_v23 = vpop.permute.xlu1 %1629 }
 0x35f   :  { %v5434_v12 = vadd.f32 %v1590_v13, %v1581_v43  ;;  %v5436_v20 = vadd.f32 %v1630_v23, %v1621_v3 }
 0x361   :  { %1968 = vrot.lane.b32.xlu0 %v5434_v12, %s4048_s8  ;;  %2028 = vrot.lane.b32.xlu1 %v5436_v20, %s4048_s8 }
 0x362   :  { %v1670_v16 = vpop.permute.xlu0 %1669  ;;  %v1710_v29 = vpop.permute.xlu1 %1709 }
 0x363   :  { %v5446_v50 = vadd.f32 %v1670_v16, %v1661_v41  ;;  %v5448_v33 = vadd.f32 %v1710_v29, %v1701_v10 }
 0x365   :  { %2088 = vrot.lane.b32.xlu0 %v5446_v50, %s4048_s8  ;;  %2148 = vrot.lane.b32.xlu1 %v5448_v33, %s4048_s8 }
 0x366   :  { %v1723_v28 = vpop.permute.xlu0 %1722  ;;  %v1791_v21 = vpop.permute.xlu1 %1790 }
 0x367   :  { %v1727_v60 = vmax.f32 %v5267_v45, %v1723_v28  ;;  %v1795_v37 = vmax.f32 %v5270_v17, %v1791_v21  ;;  %v3758_v45 = vld [vmem:[#allocation14 + $0x88] sm:$0xff]  }
 0x368   :  { %3584 = vmatpush3.bf16.msra.mxu1 %v3758_v45 }
 0x369   :  { %v1731_v26 = vrot.slane %v1727_v60, 2  ;;  %v1799_v11 = vrot.slane %v1795_v37, 2  ;;  %3585 = vmatprep.subr.bf16.mxu1 %v3761_v14  ;;  %v3768_v14 = vld [vmem:[#allocation14 + $0x20] sm:$0xff]  }
 0x36a   :  { %v1851_v0 = vpop.permute.xlu0 %1850  ;;  %v1911_v49 = vpop.permute.xlu1 %1910 }
 0x36b   :  { %v1735_v17 = vmax.f32 %v1727_v60, %v1731_v26  ;;  %v1803_v58 = vmax.f32 %v1795_v37, %v1799_v11  ;;  %v1855_v1 = vmax.f32 %v5288_v63, %v1851_v0  ;;  %v1915_v2 = vmax.f32 %v5291_v35, %v1911_v49  ;;  %v3765_v60 = vld [vmem:[#allocation14 + $0xd8] sm:$0xff]  }
 0x36c   :  { %v1924_v63 = vstv %s5456_s20  ;;  %3586 = vmatpush3.bf16.msra.mxu1 %v3762_v19  ;;  %v3766_v37 = vld [vmem:[#allocation14 + $0x98] sm:$0xff]   ;;  %s3300_s20 = sshll.u32 %s4051_s19, 4  ;;  %s3301_s20 = int_to_ptr.vmem [resolvable:$true] %s3300_s20 }
 0x36d   :  { %v1738_v42 = vadd.f32 %v1736_v5, %v1735_v17  ;;  %v1806_v30 = vadd.f32 %v1804_v56, %v1803_v58  ;;  %v1859_v38 = vrot.slane %v1855_v1, 2  ;;  %v1919_v32 = vrot.slane %v1915_v2, 2  ;;  %3587 = vmatprep.subr.bf16.mxu1 %v3765_v60  ;;  %v3777_v60 = vld [vmem:[#allocation14 + $0xf0] sm:$0xff]   ;;  %p4002_p7 = scmp.lt.s32.totalorder %s3301_s20, %s3301_s20 }
 0x36e   :  { %v1721_v9 = vpop.permute.xlu0 %1720  ;;  %v1789_v55 = vpop.permute.xlu1 %1788 }
 0x36f   :  { %v1754_v35 = vrot.slane %v1738_v42, %v5461_v51  ;;  %v1822_v54 = vrot.slane %v1806_v30, %v5461_v51  ;;  %v1863_v43 = vmax.f32 %v1855_v1, %v1859_v38  ;;  %v1923_v3 = vmax.f32 %v1915_v2, %v1919_v32  ;;  %v3771_v32 = vld [vmem:[#allocation14 + $0x68] sm:$0xff]  }
 0x370   :  { %v1726_v13 = vmax.f32 %v5307_v24, %v1721_v9  ;;  %v1794_v23 = vmax.f32 %v5310_v44, %v1789_v55  ;;  %3588 = vmatpush3.bf16.msra.mxu1 %v3766_v37 }
 0x371   :  { %v1866_v41 = vadd.f32 %v1864_v39, %v1863_v43  ;;  %v1926_v10 = vadd.f32 %v1924_v63, %v1923_v3  ;;  %v1772_v40 = vcombine.high %v1754_v35, %v1754_v35  ;;  %v1833_v61 = vcombine.high %v1822_v54, %v1822_v54  ;;  %v3773_v3 = vld [vmem:[#allocation14 + $0xe8] sm:$0xff]  }
 0x372   :  { %v1730_v16 = vrot.slane %v1726_v13, 2  ;;  %v1798_v29 = vrot.slane %v1794_v23, 2  ;;  %v1849_v22 = vpop.permute.xlu0 %1848  ;;  %v1909_v57 = vpop.permute.xlu1 %1908  ;;  %v1759_v0 = vrot.slane %v1754_v35, 7  ;;  %v1825_v45 = vrot.slane %v1822_v54, 7  ;;  %v3772_v35 = vld [vmem:[#allocation14 + $0x28] sm:$0xff]  }
 0x373   :  { %v1854_v8 = vmax.f32 %v5326_v31, %v1849_v22  ;;  %v1914_v53 = vmax.f32 %v5329_v4, %v1909_v57  ;;  %v1882_v24 = vrot.slane %v1866_v41, %v5461_v51  ;;  %v1942_v44 = vrot.slane %v1926_v10, %v5461_v51  ;;  %v3767_v31 = vld [vmem:[#allocation14 + $0x60] sm:$0xff]  }
 0x374   :  { %v1734_v47 = vmax.f32 %v1726_v13, %v1730_v16  ;;  %v1802_v48 = vmax.f32 %v1794_v23, %v1798_v29  ;;  %v1775_v49 = vrot.slane %v1772_v40, 7  ;;  %v1836_v36 = vrot.slane %v1833_v61, 7  ;;  %3567 = vmatprep.subr.bf16.mxu0 %v3767_v31  ;;  %v3774_v16 = vld [vmem:[#allocation14 + $0xa8] sm:$0xff]  }
 0x375   :  { %v1858_v28 = vrot.slane %v1854_v8, 2  ;;  %v1918_v21 = vrot.slane %v1914_v53, 2  ;;  %v1893_v26 = vcombine.high %v1882_v24, %v1882_v24  ;;  %v1953_v11 = vcombine.high %v1942_v44, %v1942_v44  ;;  %3568 = vmatpush3.bf16.msra.mxu0 %v3768_v14  ;;  %v3780_v14 = vld [vmem:[#allocation14 + $0x38] sm:$0xff]  }
 0x376   :  { %v1737_v4 = vadd.f32 %v1736_v5, %v1734_v47  ;;  %v1805_v52 = vadd.f32 %v1804_v56, %v1802_v48  ;;  %v3769_v5 = vld [vmem:[#allocation14 + $0xe0] sm:$0xff]   ;;  %v1885_v56 = vrot.slane %v1882_v24, 7  ;;  %v5486_v30 = vrot.slane %v1942_v44, 7  ;;  %3569 = vmatprep.subr.bf16.mxu0 %v3771_v32  ;;  %v3775_v44 = vld [vmem:[#allocation14 + $0x70] sm:$0xff]  }
 0x377   :  { %v1862_v15 = vmax.f32 %v1854_v8, %v1858_v28  ;;  %v1922_v34 = vmax.f32 %v1914_v53, %v1918_v21  ;;  %v1896_v42 = vrot.slane %v1893_v26, 7  ;;  %v1956_v38 = vrot.slane %v1953_v11, 7  ;;  %3589 = vmatprep.subr.bf16.mxu1 %v3769_v5 }
 0x378   :  { %v1747_v17 = vrot.slane %v1737_v4, %v5461_v51  ;;  %v1815_v58 = vrot.slane %v1805_v52, %v5461_v51  ;;  %3590 = vmatpush3.bf16.msra.mxu1 %v3770_v27  ;;  %v3778_v4 = vld [vmem:[#allocation14 + $0xb0] sm:$0xff]   ;;  %v3779_v52 = vld [vmem:[#allocation14 + $0x78] sm:$0xff]  }
 0x379   :  { %v1865_v1 = vadd.f32 %v1864_v39, %v1862_v15  ;;  %v1925_v2 = vadd.f32 %v1924_v63, %v1922_v34  ;;  %3570 = vmatpush3.bf16.msra.mxu0 %v3772_v35  ;;  %3591 = vmatprep.subr.bf16.mxu1 %v3773_v3  ;;  %v3782_v27 = vld [vmem:[#allocation14 + $0xb8] sm:$0xff]  }
 0x37a   :  { %v1761_v19 = vsel %vm1760_vm2, %v1759_v0, %v1747_v17  ;;  %v1771_v18 = vcombine.high %v1747_v17, %v1747_v17  ;;  %v1826_v9 = vsel %vm1760_vm2, %v1825_v45, %v1815_v58  ;;  %v1832_v55 = vcombine.high %v1815_v58, %v1815_v58  ;;  %3571 = vmatprep.subr.bf16.mxu0 %v3775_v44  ;;  %v3781_v58 = vld [vmem:[#allocation14 + $0xf8] sm:$0xff]  }
 0x37b   :  { %v1875_v39 = vrot.slane %v1865_v1, %v5461_v51  ;;  %v1935_v63 = vrot.slane %v1925_v2, %v5461_v51  ;;  %v1763_v54 = vsel %vm1762_vm3, %v1759_v0, %v1761_v19  ;;  %v1827_v43 = vsel %vm1762_vm3, %v1825_v45, %v1826_v9 }
 0x37c   :  { %v1776_v13 = vsel %vm1760_vm2, %v1775_v49, %v1771_v18  ;;  %v1837_v23 = vsel %vm1760_vm2, %v1836_v36, %v1832_v55  ;;  %v1765_v41 = vsel %vm1764_vm4, %v1759_v0, %v1763_v54  ;;  %v1828_v10 = vsel %vm1764_vm4, %v1825_v45, %v1827_v43  ;;  %3592 = vmatpush3.bf16.msra.mxu1 %v3774_v16 }
 0x37d   :  { %v1886_v29 = vsel %vm1760_vm2, %v1885_v56, %v1875_v39  ;;  %v1892_v22 = vcombine.high %v1875_v39, %v1875_v39  ;;  %v1946_v57 = vsel %vm1760_vm2, %v5486_v30, %v1935_v63  ;;  %v1952_v40 = vcombine.high %v1935_v63, %v1935_v63  ;;  %3572 = vmatpush3.bf16.msra.mxu0 %v3776_v7 }
 0x37e   :  { %v1777_v61 = vsel %vm1762_vm3, %v1775_v49, %v1776_v13  ;;  %v1838_v8 = vsel %vm1762_vm3, %v1836_v36, %v1837_v23  ;;  %v1767_v53 = vsel %vm1766_vm5, %v1759_v0, %v1765_v41  ;;  %v1829_v24 = vsel %vm1766_vm5, %v1825_v45, %v1828_v10  ;;  %3593 = vmatprep.subr.bf16.mxu1 %v3777_v60 }
 0x37f   :  { %v1778_v47 = vsel %vm1764_vm4, %v1775_v49, %v1777_v61  ;;  %v1839_v48 = vsel %vm1764_vm4, %v1836_v36, %v1838_v8  ;;  %v1897_v28 = vsel %vm1760_vm2, %v1896_v42, %v1892_v22  ;;  %v1957_v21 = vsel %vm1760_vm2, %v1956_v38, %v1952_v40  ;;  %1770 = vst.msk [vmem:[#allocation3] sm:$0x3] %vm1769_vm6, %v1767_v53 }
 0x380   :  { %1831 = vst.msk [vmem:[#allocation3 + $0x2] sm:$0x3] %vm1769_vm6, %v1829_v24  ;;  %v1779_v37 = vsel %vm1766_vm5, %v1775_v49, %v1778_v47  ;;  %v1840_v26 = vsel %vm1766_vm5, %v1836_v36, %v1839_v48  ;;  %v1898_v11 = vsel %vm1762_vm3, %v1896_v42, %v1897_v28  ;;  %v1958_v31 = vsel %vm1762_vm3, %v1956_v38, %v1957_v21 }
 0x381   :  { %1780 = vrot.lane.b32.xlu0 %v1779_v37, %s4041_s2  ;;  %1841 = vrot.lane.b32.xlu1 %v1840_v26, %s4041_s2  ;;  %v1899_v15 = vsel %vm1764_vm4, %v1896_v42, %v1898_v11  ;;  %v1959_v34 = vsel %vm1764_vm4, %v1956_v38, %v1958_v31  ;;  %v1887_v0 = vsel %vm1762_vm3, %v1885_v56, %v1886_v29  ;;  %v1984_v39 = vstv %s5534_s21  ;;  %s3997_s21 = scalar_lea.vmem %s3301_s20, 32 }
 0x382   :  { %v1900_v49 = vsel %vm1766_vm5, %v1896_v42, %v1899_v15  ;;  %v1960_v45 = vsel %vm1766_vm5, %v1956_v38, %v1959_v34  ;;  %v1888_v36 = vsel %vm1764_vm4, %v1885_v56, %v1887_v0  ;;  %v1947_v17 = vsel %vm1762_vm3, %v5486_v30, %v1946_v57  ;;  %3594 = vmatpush3.bf16.msra.mxu1 %v3778_v4  ;;  %v3786_v42 = vld [vmem:[#allocation14 + $0x1c0] sm:$0xff]   ;;  %p3998_p6 = scmp.ne.s32.totalorder %s3301_s20, %s3997_s21  ;;  %p4003_p8 = scmp.lt.s32.totalorder %s3997_s21, %s3997_s21 }
 0x383   :  { %v1889_v1 = vsel %vm1766_vm5, %v1885_v56, %v1888_v36  ;;  %v1948_v2 = vsel %vm1764_vm4, %v5486_v30, %v1947_v17  ;;  %3573 = vmatprep.subr.bf16.mxu0 %v3779_v52  ;;  %3595 = vmatprep.subr.bf16.mxu1 %v3781_v58  ;;  %v3784_v56 = vld [vmem:[#allocation14 + $0x140] sm:$0xff]   ;;  %v2044_v54 = vstv %s5537_s1  ;;  %v2104_v13 = vstv %s5539_s22 }
 0x384   :  { %1891 = vst.msk [vmem:[#allocation3 + $0x4] sm:$0x3] %vm1769_vm6, %v1889_v1  ;;  %v1949_v5 = vsel %vm1766_vm5, %v5486_v30, %v1948_v2  ;;  %3574 = vmatpush3.bf16.msra.mxu0 %v3780_v14  ;;  %v2164_v57 = vstv %s5542_s23  ;;  %p4004_p9 = por %p4003_p8, %p4002_p7 }
 0x385   :  { %1901 = vrot.lane.b32.xlu0 %v1900_v49, %s4041_s2  ;;  %1961 = vrot.lane.b32.xlu1 %v1960_v45, %s4041_s2  ;;  %1951 = vst.msk [vmem:[#allocation3 + $0x6] sm:$0x3] %vm1769_vm6, %v1949_v5 }
 0x386   :  { %3596 = vmatpush3.bf16.msra.mxu1 %v3782_v27  ;;  %3603 = vmatprep.subr.bf16.mxu0 %v3784_v56  ;;  %p4005_p10 = pnand %p4004_p9, %p3998_p6 }
 0x387   :  { %3625 = vmatprep.subr.bf16.mxu1 %v3786_v42 }
 0x3c3   :  { %v1971_v38 = vpop.permute.xlu0 %1970 }
 0x3c4   :  { %v1975_v30 = vmax.f32 %v5418_v59, %v1971_v38 }
 0x3c6   :  { %v1979_v32 = vrot.slane %v1975_v30, 2 }
 0x3c7   :  { %v2031_v19 = vpop.permute.xlu1 %2030 }
 0x3c8   :  { %v2035_v18 = vmax.f32 %v5422_v6, %v2031_v19  ;;  %v1983_v55 = vmax.f32 %v1975_v30, %v1979_v32 }
 0x3ca   :  { %v2039_v9 = vrot.slane %v2035_v18, 2  ;;  %v1986_v3 = vadd.f32 %v1984_v39, %v1983_v55 }
 0x3cb   :  { %v2091_v35 = vpop.permute.xlu0 %2090 }
 0x3cc   :  { %v2043_v63 = vmax.f32 %v2035_v18, %v2039_v9  ;;  %v2095_v59 = vmax.f32 %v5426_v46, %v2091_v35  ;;  %v2002_v22 = vrot.slane %v1986_v3, %v5461_v51 }
 0x3ce   :  { %v2099_v43 = vrot.slane %v2095_v59, 2  ;;  %v2046_v41 = vadd.f32 %v2044_v54, %v2043_v63  ;;  %v2013_v28 = vcombine.high %v2002_v22, %v2002_v22  ;;  %v2005_v52 = vrot.slane %v2002_v22, 7 }
 0x3cf   :  { %v2151_v23 = vpop.permute.xlu1 %2150 }
 0x3d0   :  { %v2103_v10 = vmax.f32 %v2095_v59, %v2099_v43  ;;  %v2155_v16 = vmax.f32 %v5430_v62, %v2151_v23  ;;  %v2062_v8 = vrot.slane %v2046_v41, %v5461_v51  ;;  %v2016_v0 = vrot.slane %v2013_v28, 7 }
 0x3d2   :  { %v2106_v6 = vadd.f32 %v2104_v13, %v2103_v10  ;;  %v2159_v29 = vrot.slane %v2155_v16, 2  ;;  %v2073_v60 = vcombine.high %v2062_v8, %v2062_v8  ;;  %v2065_v49 = vrot.slane %v2062_v8, 7 }
 0x3d3   :  { %v1969_v40 = vpop.permute.xlu0 %1968  ;;  %v2029_v61 = vpop.permute.xlu1 %2028 }
 0x3d4   :  { %v2163_v53 = vmax.f32 %v2155_v16, %v2159_v29  ;;  %v1974_v46 = vmax.f32 %v5434_v12, %v1969_v40  ;;  %v2122_v24 = vrot.slane %v2106_v6, %v5461_v51  ;;  %v2034_v44 = vmax.f32 %v5436_v20, %v2029_v61 }
 0x3d5   :  { %v2076_v17 = vrot.slane %v2073_v60, 7 }
 0x3d6   :  { %v2166_v47 = vadd.f32 %v2164_v57, %v2163_v53  ;;  %v1978_v48 = vrot.slane %v1974_v46, 2  ;;  %v2038_v62 = vrot.slane %v2034_v44, 2  ;;  %v2133_v31 = vcombine.high %v2122_v24, %v2122_v24 }
 0x3d7   :  { %v2089_v21 = vpop.permute.xlu0 %2088  ;;  %v2149_v7 = vpop.permute.xlu1 %2148  ;;  %v2125_v58 = vrot.slane %v2122_v24, 7 }
 0x3d8   :  { %v2182_v37 = vrot.slane %v2166_v47, %v5461_v51  ;;  %v1982_v26 = vmax.f32 %v1974_v46, %v1978_v48  ;;  %v2094_v11 = vmax.f32 %v5446_v50, %v2089_v21  ;;  %v2042_v4 = vmax.f32 %v2034_v44, %v2038_v62 }
 0x3d9   :  { %v2154_v12 = vmax.f32 %v5448_v33, %v2149_v7  ;;  %v2136_v14 = vrot.slane %v2133_v31, 7 }
 0x3da   :  { %v2193_v15 = vcombine.high %v2182_v37, %v2182_v37  ;;  %v1985_v34 = vadd.f32 %v1984_v39, %v1982_v26  ;;  %v2098_v20 = vrot.slane %v2094_v11, 2  ;;  %v2045_v45 = vadd.f32 %v2044_v54, %v2042_v4 }
 0x3db   :  { %v2158_v36 = vrot.slane %v2154_v12, 2  ;;  %v2185_v5 = vrot.slane %v2182_v37, 7 }
 0x3dc   :  { %v1995_v1 = vrot.slane %v1985_v34, %v5461_v51  ;;  %v2102_v2 = vmax.f32 %v2094_v11, %v2098_v20  ;;  %v2055_v50 = vrot.slane %v2045_v45, %v5461_v51  ;;  %v2196_v56 = vrot.slane %v2193_v15, 7  ;;  %v3785_v45 = vld [vmem:[#allocation14 + $0x100] sm:$0xff]  }
 0x3dd   :  { %v2162_v27 = vmax.f32 %v2154_v12, %v2158_v36 }
 0x3de   :  { %v2006_v33 = vsel %vm1760_vm2, %v2005_v52, %v1995_v1  ;;  %v2012_v42 = vcombine.high %v1995_v1, %v1995_v1  ;;  %v2105_v38 = vadd.f32 %v2104_v13, %v2102_v2  ;;  %v2066_v30 = vsel %vm1760_vm2, %v2065_v49, %v2055_v50  ;;  %v3787_v1 = vld [vmem:[#allocation14 + $0x180] sm:$0xff]  }
 0x3df   :  { %v2072_v32 = vcombine.high %v2055_v50, %v2055_v50  ;;  %v2165_v19 = vadd.f32 %v2164_v57, %v2162_v27  ;;  %v2007_v18 = vsel %vm1762_vm3, %v2005_v52, %v2006_v33  ;;  %v2067_v39 = vsel %vm1762_vm3, %v2065_v49, %v2066_v30  ;;  %v3792_v50 = vld [vmem:[#allocation14 + $0x150] sm:$0xff]   ;;  %v3791_v27 = vld [vmem:[#allocation14 + $0x188] sm:$0xff]   ;;  %v3798_v30 = vld [vmem:[#allocation14 + $0x1d8] sm:$0xff]  }
 0x3e0   :  { %v2115_v9 = vrot.slane %v2105_v38, %v5461_v51  ;;  %v2017_v55 = vsel %vm1760_vm2, %v2016_v0, %v2012_v42  ;;  %v2008_v35 = vsel %vm1764_vm4, %v2005_v52, %v2007_v18  ;;  %v2068_v40 = vsel %vm1764_vm4, %v2065_v49, %v2067_v39  ;;  %v3793_v33 = vld [vmem:[#allocation14 + $0x110] sm:$0xff]   ;;  %v3796_v42 = vld [vmem:[#allocation14 + $0x158] sm:$0xff]   ;;  %v3803_v39 = vld [vmem:[#allocation14 + $0x1a0] sm:$0xff]  }
 0x3e1   :  { %v2175_v63 = vrot.slane %v2165_v19, %v5461_v51  ;;  %v2018_v59 = vsel %vm1762_vm3, %v2016_v0, %v2017_v55  ;;  %v2077_v54 = vsel %vm1760_vm2, %v2076_v17, %v2072_v32  ;;  %v2009_v43 = vsel %vm1766_vm5, %v2005_v52, %v2008_v35  ;;  %v3795_v38 = vld [vmem:[#allocation14 + $0x190] sm:$0xff]   ;;  %v3797_v32 = vld [vmem:[#allocation14 + $0x118] sm:$0xff]   ;;  %v3800_v19 = vld [vmem:[#allocation14 + $0x160] sm:$0xff]  }
 0x3e2   :  { %v2126_v3 = vsel %vm1760_vm2, %v2125_v58, %v2115_v9  ;;  %v2132_v13 = vcombine.high %v2115_v9, %v2115_v9  ;;  %v2019_v23 = vsel %vm1764_vm4, %v2016_v0, %v2018_v59  ;;  %v2078_v41 = vsel %vm1762_vm3, %v2076_v17, %v2077_v54  ;;  %2011 = vst.msk [vmem:[#allocation3 + $0x8] sm:$0x3] %vm1769_vm6, %v2009_v43  ;;  %v3799_v18 = vld [vmem:[#allocation14 + $0x198] sm:$0xff]   ;;  %v3802_v9 = vld [vmem:[#allocation14 + $0x1e0] sm:$0xff]   ;;  %v3804_v35 = vld [vmem:[#allocation14 + $0x168] sm:$0xff]  }
 0x3e3   :  { %v2186_v10 = vsel %vm1760_vm2, %v2185_v5, %v2175_v63  ;;  %v2192_v16 = vcombine.high %v2175_v63, %v2175_v63  ;;  %v2020_v6 = vsel %vm1766_vm5, %v2016_v0, %v2019_v23  ;;  %v2079_v29 = vsel %vm1764_vm4, %v2076_v17, %v2078_v41  ;;  %v3801_v55 = vld [vmem:[#allocation14 + $0x120] sm:$0xff]   ;;  %v3806_v63 = vld [vmem:[#allocation14 + $0x1e8] sm:$0xff]   ;;  %v3808_v54 = vld [vmem:[#allocation14 + $0x170] sm:$0xff]  }
 0x3e4   :  { %2021 = vrot.lane.b32.xlu0 %v2020_v6, %s4041_s2  ;;  %v2080_v22 = vsel %vm1766_vm5, %v2076_v17, %v2079_v29  ;;  %v2137_v57 = vsel %vm1760_vm2, %v2136_v14, %v2132_v13  ;;  %v2127_v61 = vsel %vm1762_vm3, %v2125_v58, %v2126_v3  ;;  %v2069_v46 = vsel %vm1766_vm5, %v2065_v49, %v2068_v40  ;;  %v3788_v17 = vld [vmem:[#allocation14 + $0x148] sm:$0xff]   ;;  %v3810_v3 = vld [vmem:[#allocation14 + $0x1f0] sm:$0xff]   ;;  %v3812_v23 = vld [vmem:[#allocation14 + $0x178] sm:$0xff]  }
 0x3e5   :  { %2081 = vrot.lane.b32.xlu1 %v2080_v22, %s4041_s2  ;;  %v2138_v8 = vsel %vm1762_vm3, %v2136_v14, %v2137_v57  ;;  %v2197_v53 = vsel %vm1760_vm2, %v2196_v56, %v2192_v16  ;;  %v2128_v24 = vsel %vm1764_vm4, %v2125_v58, %v2127_v61  ;;  %2071 = vst.msk [vmem:[#allocation3 + $0xa] sm:$0x3] %vm1769_vm6, %v2069_v46  ;;  %v3805_v59 = vld [vmem:[#allocation14 + $0x128] sm:$0xff]   ;;  %v3809_v13 = vld [vmem:[#allocation14 + $0x130] sm:$0xff]   ;;  %v3813_v16 = vld [vmem:[#allocation14 + $0x138] sm:$0xff]  }
 0x3e6   :  { %v2139_v44 = vsel %vm1764_vm4, %v2136_v14, %v2138_v8  ;;  %v2198_v47 = vsel %vm1762_vm3, %v2196_v56, %v2197_v53  ;;  %v2129_v48 = vsel %vm1766_vm5, %v2125_v58, %v2128_v24  ;;  %v2187_v28 = vsel %vm1762_vm3, %v2185_v5, %v2186_v10  ;;  %v3807_v43 = vld [vmem:[#allocation14 + $0x1a8] sm:$0xff]   ;;  %v3811_v41 = vld [vmem:[#allocation14 + $0x1b0] sm:$0xff]   ;;  %v3814_v10 = vld [vmem:[#allocation14 + $0x1f8] sm:$0xff]  }
 0x3e7   :  { %v2140_v62 = vsel %vm1766_vm5, %v2136_v14, %v2139_v44  ;;  %v2199_v21 = vsel %vm1764_vm4, %v2196_v56, %v2198_v47  ;;  %2131 = vst.msk [vmem:[#allocation3 + $0xc] sm:$0x3] %vm1769_vm6, %v2129_v48  ;;  %v2188_v7 = vsel %vm1764_vm4, %v2185_v5, %v2187_v28  ;;  %v3790_v14 = vld [vmem:[#allocation14 + $0x1c8] sm:$0xff]   ;;  %v3815_v6 = vld [vmem:[#allocation14 + $0x1b8] sm:$0xff]  }
 0x3e8   :  { %2141 = vrot.lane.b32.xlu0 %v2140_v62, %s4041_s2  ;;  %v2200_v60 = vsel %vm1766_vm5, %v2196_v56, %v2199_v21  ;;  %v2189_v37 = vsel %vm1766_vm5, %v2185_v5, %v2188_v7  ;;  %v3789_v5 = vld [vmem:[#allocation14 + $0x108] sm:$0xff]   ;;  %v3794_v56 = vld [vmem:[#allocation14 + $0x1d0] sm:$0xff]  }
 0x3e9   :  { %2201 = vrot.lane.b32.xlu1 %v2200_v60, %s4041_s2  ;;  %2191 = vst.msk [vmem:[#allocation3 + $0xe] sm:$0x3] %vm1769_vm6, %v2189_v37  ;;  %v3817_v21 = vld [vmem:[%s5738_s7] sm:$0xff]   ;;  %v3467_v60 = vld [vmem:[#allocation15] ss:$0 sm:$0xff] }
 0x3f3   :  { %v1781_v26 = vpop.permute.xlu0 %1780  ;;  %v1842_v11 = vpop.permute.xlu1 %1841 }
 0x3f4   :  { %1784 = vst.msk [vmem:[#allocation3] sm:$0x3] %vm1783_vm7, %v1781_v26  ;;  %1844 = vst.msk [vmem:[#allocation3 + $0x2] sm:$0x3] %vm1783_vm7, %v1842_v11 }
 0x3f7   :  { %v1902_v31 = vpop.permute.xlu0 %1901  ;;  %v1962_v4 = vpop.permute.xlu1 %1961 }
 0x3f8   :  { %1904 = vst.msk [vmem:[#allocation3 + $0x4] sm:$0x3] %vm1783_vm7, %v1902_v31  ;;  %1964 = vst.msk [vmem:[#allocation3 + $0x6] sm:$0x3] %vm1783_vm7, %v1962_v4  ;;  %v3819_v4 = vld [vmem:[%s5738_s7 + $0x10] sm:$0xff]  }
 0x3ff   :  { %v2205_v12 = vld [vmem:[#allocation3] sm:$0xff] }
 0x400   :  { %v2216_v52 = vrot.slane %v2205_v12, %v5461_v51  ;;  %v2209_v15 = vcombine.high %v2205_v12, %v2205_v12 }
 0x402   :  { %v2224_v34 = vcombine.high %v2216_v52, %v2216_v52  ;;  %v2223_v20 = vrot.slane %v2209_v15, %v5461_v51  ;;  %v2251_v36 = vpack.c.bf16 %v2216_v52, %v2216_v52 }
 0x404   :  { %v2252_v0 = vpack.c.bf16 %v2224_v34, %v2224_v34  ;;  %v2225_v49 = vcombine.high %v2223_v20, %v2223_v20  ;;  %v2253_v2 = vpack.c.bf16 %v2223_v20, %v2223_v20 }
 0x406   :  { %2810 = vmatprep.mubr.bf16.mxu0 %v2252_v0  ;;  %v2254_v58 = vpack.c.bf16 %v2225_v49, %v2225_v49 }
 0x407   :  { %2811 = vmatmul.mubr.bf16.vlgmr.msra.gmra.mrb[0].mxu0 %v2251_v36  ;;  %v3821_v36 = vld [vmem:[%s5738_s7 + $0x20] sm:$0xff]  }
 0x408   :  { %2850 = vmatprep.mubr.bf16.mxu1 %v2254_v58  ;;  %3604 = vmatpush3.bf16.msra.mxu0 %v3785_v45  ;;  %v3820_v45 = vld [vmem:[%s5738_s7 + $0x18] sm:$0xff]   ;;  %v3823_v58 = vld [vmem:[%s5738_s7 + $0x30] sm:$0xff]  }
 0x409   :  { %2851 = vmatmul.mubr.bf16.vlgmr.msra.gmra.mrb[0].mxu1 %v2253_v2  ;;  %3605 = vmatprep.subr.bf16.mxu0 %v3788_v17  ;;  %v3822_v17 = vld [vmem:[%s5738_s7 + $0x28] sm:$0xff]  }
 0x40a   :  { %3626 = vmatpush3.bf16.msra.mxu1 %v3787_v1  ;;  %v3824_v1 = vld [vmem:[%s5738_s7 + $0x38] sm:$0xff]  }
 0x40b   :  { %3627 = vmatprep.subr.bf16.mxu1 %v3790_v14 }
 0x40c   :  { %3606 = vmatpush3.bf16.msra.mxu0 %v3789_v5 }
 0x40d   :  { %3607 = vmatprep.subr.bf16.mxu0 %v3792_v50 }
 0x40e   :  { %3628 = vmatpush3.bf16.msra.mxu1 %v3791_v27 }
 0x40f   :  { %3629 = vmatprep.subr.bf16.mxu1 %v3794_v56 }
 0x410   :  { %3608 = vmatpush3.bf16.msra.mxu0 %v3793_v33 }
 0x411   :  { %3609 = vmatprep.subr.bf16.mxu0 %v3796_v42 }
 0x412   :  { %3630 = vmatpush3.bf16.msra.mxu1 %v3795_v38 }
 0x413   :  { %3631 = vmatprep.subr.bf16.mxu1 %v3798_v30 }
 0x414   :  { %3610 = vmatpush3.bf16.msra.mxu0 %v3797_v32 }
 0x415   :  { %3611 = vmatprep.subr.bf16.mxu0 %v3800_v19 }
 0x416   :  { %3632 = vmatpush3.bf16.msra.mxu1 %v3799_v18 }
 0x417   :  { %3633 = vmatprep.subr.bf16.mxu1 %v3802_v9 }
 0x418   :  { %3612 = vmatpush3.bf16.msra.mxu0 %v3801_v55 }
 0x419   :  { %3613 = vmatprep.subr.bf16.mxu0 %v3804_v35 }
 0x41a   :  { %3634 = vmatpush3.bf16.msra.mxu1 %v3803_v39 }
 0x41b   :  { %3635 = vmatprep.subr.bf16.mxu1 %v3806_v63 }
 0x41c   :  { %3614 = vmatpush3.bf16.msra.mxu0 %v3805_v59  ;;  %v3825_v59 = vld [vmem:[%s5740_s9] sm:$0xff]  }
 0x41d   :  { %3615 = vmatprep.subr.bf16.mxu0 %v3808_v54  ;;  %v3826_v54 = vld [vmem:[%s5740_s9 + $0x8] sm:$0xff]  }
 0x41e   :  { %3636 = vmatpush3.bf16.msra.mxu1 %v3807_v43  ;;  %v3827_v43 = vld [vmem:[%s5740_s9 + $0x10] sm:$0xff]  }
 0x41f   :  { %3637 = vmatprep.subr.bf16.mxu1 %v3810_v3  ;;  %v3828_v3 = vld [vmem:[%s5740_s9 + $0x18] sm:$0xff]  }
 0x420   :  { %3616 = vmatpush3.bf16.msra.mxu0 %v3809_v13  ;;  %v3829_v13 = vld [vmem:[%s5740_s9 + $0x20] sm:$0xff]  }
 0x421   :  { %3617 = vmatprep.subr.bf16.mxu0 %v3812_v23  ;;  %v3830_v23 = vld [vmem:[%s5740_s9 + $0x28] sm:$0xff]  }
 0x422   :  { %3638 = vmatpush3.bf16.msra.mxu1 %v3811_v41  ;;  %v3831_v41 = vld [vmem:[%s5740_s9 + $0x30] sm:$0xff]  }
 0x423   :  { %3639 = vmatprep.subr.bf16.mxu1 %v3814_v10  ;;  %v3832_v10 = vld [vmem:[%s5740_s9 + $0x38] sm:$0xff]  }
 0x424   :  { %3618 = vmatpush3.bf16.msra.mxu0 %v3813_v16  ;;  %v3532_v16 = vld [vmem:[#allocation17] ss:$0 sm:$0xff] }
 0x425   :  { %3674 = vmatprep.subr.bf16.mxu0 %v4046_v25 }
 0x426   :  { %3640 = vmatpush3.bf16.msra.mxu1 %v3815_v6 }
 0x427   :  { %3694 = vmatprep.subr.bf16.mxu1 %v4046_v25 }
 0x456   :  { %v2022_v29 = vpop.permute.xlu0 %2021 }
 0x457   :  { %2024 = vst.msk [vmem:[#allocation3 + $0x8] sm:$0x3] %vm1783_vm7, %v2022_v29  ;;  %v2082_v22 = vpop.permute.xlu1 %2081 }
 0x458   :  { %2084 = vst.msk [vmem:[#allocation3 + $0xa] sm:$0x3] %vm1783_vm7, %v2082_v22 }
 0x45a   :  { %v2142_v57 = vpop.permute.xlu0 %2141 }
 0x45b   :  { %2144 = vst.msk [vmem:[#allocation3 + $0xc] sm:$0x3] %vm1783_vm7, %v2142_v57  ;;  %v2202_v40 = vpop.permute.xlu1 %2201 }
 0x45c   :  { %2204 = vst.msk [vmem:[#allocation3 + $0xe] sm:$0x3] %vm1783_vm7, %v2202_v40 }
 0x463   :  { %v2206_v61 = vld [vmem:[#allocation3 + $0x8] sm:$0xff] }
 0x464   :  { %v2233_v8 = vrot.slane %v2206_v61, %v5461_v51  ;;  %v2226_v53 = vcombine.high %v2206_v61, %v2206_v61 }
 0x466   :  { %v2241_v46 = vcombine.high %v2233_v8, %v2233_v8  ;;  %v2240_v24 = vrot.slane %v2226_v53, %v5461_v51  ;;  %v2255_v48 = vpack.c.bf16 %v2233_v8, %v2233_v8  ;;  %v3818_v51 = vld [vmem:[%s5738_s7 + $0x8] sm:$0xff]  }
 0x468   :  { %v2256_v44 = vpack.c.bf16 %v2241_v46, %v2241_v46  ;;  %v2242_v47 = vcombine.high %v2240_v24, %v2240_v24  ;;  %v2257_v62 = vpack.c.bf16 %v2240_v24, %v2240_v24 }
 0x46a   :  { %2890 = vmatprep.mubr.bf16.mxu0 %v2256_v44  ;;  %v2258_v28 = vpack.c.bf16 %v2242_v47, %v2242_v47  ;;  %v3833_v47 = vld [vmem:[%s5742_s11] sm:$0xff]  }
 0x46b   :  { %2891 = vmatmul.mubr.bf16.vlgmr.msra.gmra.mrb[4].mxu0 %v2255_v48  ;;  %v3834_v48 = vld [vmem:[%s5742_s11 + $0x8] sm:$0xff]  }
 0x46c   :  { %2930 = vmatprep.mubr.bf16.mxu1 %v2258_v28  ;;  %3690 = vmatprep.mubr.msk.bf16.mxu0 %vm4050_vm8, %v4046_v25  ;;  %v3835_v28 = vld [vmem:[%s5742_s11 + $0x10] sm:$0xff]  }
 0x46d   :  { %2931 = vmatmul.mubr.bf16.vlgmr.msra.gmra.mrb[4].mxu1 %v2257_v62  ;;  %3675 = vmatpush3.bf16.msra.mxu0 %v3817_v21  ;;  %v3836_v62 = vld [vmem:[%s5742_s11 + $0x18] sm:$0xff]   ;;  %v3837_v21 = vld [vmem:[%s5742_s11 + $0x20] sm:$0xff]  }
 0x46e   :  { %3710 = vmatprep.mubr.msk.bf16.mxu1 %vm4050_vm8, %v4046_v25  ;;  %3676 = vmatprep.subr.bf16.mxu0 %v4046_v25 }
 0x46f   :  { %3695 = vmatpush3.bf16.msra.mxu1 %v3825_v59 }
 0x470   :  { %3696 = vmatprep.subr.bf16.mxu1 %v4046_v25 }
 0x471   :  { %3677 = vmatpush3.bf16.msra.mxu0 %v3818_v51  ;;  %v3838_v51 = vld [vmem:[%s5742_s11 + $0x28] sm:$0xff]  }
 0x472   :  { %3678 = vmatprep.subr.bf16.mxu0 %v4046_v25 }
 0x473   :  { %3697 = vmatpush3.bf16.msra.mxu1 %v3826_v54 }
 0x474   :  { %3698 = vmatprep.subr.bf16.mxu1 %v4046_v25 }
 0x475   :  { %3679 = vmatpush3.bf16.msra.mxu0 %v3819_v4 }
 0x476   :  { %3680 = vmatprep.subr.bf16.mxu0 %v4046_v25 }
 0x477   :  { %3699 = vmatpush3.bf16.msra.mxu1 %v3827_v43 }
 0x478   :  { %3700 = vmatprep.subr.bf16.mxu1 %v4046_v25 }
 0x479   :  { %3681 = vmatpush3.bf16.msra.mxu0 %v3820_v45 }
 0x47a   :  { %3682 = vmatprep.subr.bf16.mxu0 %v4046_v25 }
 0x47b   :  { %3701 = vmatpush3.bf16.msra.mxu1 %v3828_v3 }
 0x47c   :  { %3702 = vmatprep.subr.bf16.mxu1 %v4046_v25 }
 0x47d   :  { %3683 = vmatpush3.bf16.msra.mxu0 %v3821_v36 }
 0x47e   :  { %3684 = vmatprep.subr.bf16.mxu0 %v4046_v25 }
 0x47f   :  { %3703 = vmatpush3.bf16.msra.mxu1 %v3829_v13 }
 0x480   :  { %3704 = vmatprep.subr.bf16.mxu1 %v4046_v25 }
 0x481   :  { %3685 = vmatpush3.bf16.msra.mxu0 %v3822_v17 }
 0x482   :  { %3686 = vmatprep.subr.bf16.mxu0 %v4046_v25 }
 0x483   :  { %3705 = vmatpush3.bf16.msra.mxu1 %v3830_v23 }
 0x484   :  { %3706 = vmatprep.subr.bf16.mxu1 %v4046_v25 }
 0x485   :  { %3687 = vmatpush3.bf16.msra.mxu0 %v3823_v58 }
 0x486   :  { %3688 = vmatprep.subr.bf16.mxu0 %v4046_v25 }
 0x487   :  { %3707 = vmatpush3.bf16.msra.mxu1 %v3831_v41 }
 0x488   :  { %3708 = vmatprep.subr.bf16.mxu1 %v4046_v25 }
 0x489   :  { %3689 = vmatpush3.bf16.msra.mxu0 %v3824_v1 }
 0x48a   :  { %3714 = vmatprep.subr.bf16.mxu0 %v4046_v25 }
 0x48b   :  { %3709 = vmatpush3.bf16.msra.mxu1 %v3832_v10 }
 0x4da   :  { %v3575_v7 = vpop.f32.mrb[0].mxu0 }
 0x4db   :  { %v3576_v37 = vpop.f32.mrb[1].mxu0 }
 0x4dc   :  { %v3577_v26 = vadd.f32 %v3576_v37, %v3575_v7  ;;  %v3578_v11 = vpop.f32.mrb[2].mxu0  ;;  %v3597_v31 = vpop.f32.mrb[0].mxu1  ;;  %v3839_v7 = vld [vmem:[%s5742_s11 + $0x30] sm:$0xff]  }
 0x4dd   :  { %v3579_v12 = vpop.f32.mrb[3].mxu0  ;;  %v3598_v52 = vpop.f32.mrb[1].mxu1  ;;  %v3541_v37 = vld [vmem:[#allocation18] ss:$0 sm:$0xff] }
 0x4de   :  { %v2813_v15 = vadd.f32 %v3577_v26, %v3467_v60  ;;  %v3599_v34 = vadd.f32 %v3598_v52, %v3597_v31  ;;  %v3600_v20 = vpop.f32.mrb[2].mxu1  ;;  %v3840_v60 = vld [vmem:[%s5742_s11 + $0x38] sm:$0xff]  }
 0x4df   :  { %v3601_v0 = vpop.f32.mrb[3].mxu1 }
 0x4e0   :  { %v2853_v49 = vadd.f32 %v3599_v34, %v2813_v15 }
 0x53e   :  { %v3619_v2 = vpop.f32.mrb[4].mxu0 }
 0x53f   :  { %v3620_v14 = vpop.f32.mrb[5].mxu0 }
 0x540   :  { %v3621_v5 = vadd.f32 %v3620_v14, %v3619_v2  ;;  %v3622_v50 = vpop.f32.mrb[6].mxu0  ;;  %v3641_v27 = vpop.f32.mrb[4].mxu1 }
 0x541   :  { %v3623_v56 = vpop.f32.mrb[7].mxu0  ;;  %v3642_v33 = vpop.f32.mrb[5].mxu1 }
 0x542   :  { %v2893_v42 = vadd.f32 %v3621_v5, %v2853_v49  ;;  %v3643_v38 = vadd.f32 %v3642_v33, %v3641_v27  ;;  %v3644_v30 = vpop.f32.mrb[6].mxu1 }
 0x543   :  { %v3645_v32 = vpop.f32.mrb[7].mxu1 }
 0x544   :  { %v2933_v19 = vadd.f32 %v3643_v38, %v2893_v42 }
 0x546   :  { %v2938_v18 = vsub.f32 0.0, %v2933_v19 }
 0x548   :  { %v2939_v9 = vmul.f32 1.442695, %v2938_v18 }
 0x54a   :  { %3841 = vpow2.f32 %v2939_v9 }
 0x554   :  { %v3842_v55 = vpop.eup %3841 }
 0x555   :  { %v2941_v35 = vadd.f32 1.0, %v3842_v55 }
 0x557   :  { %3843 = vrcp.f32 %v2941_v35 }
 0x561   :  { %v3844_v39 = vpop.eup %3843 }
 0x562   :  { %v2944_v63 = vpack.c.bf16 %v3844_v39, %v3844_v39 }
 0x564   :  { %3691 = vmatmul.mubr.bf16.vlgmr.msra.gmra.mrb[8].mxu0 %v2944_v63 }
 0x565   :  { %3730 = vmatprep.mubr.msk.bf16.mxu0 %vm4050_vm8, %v4046_v25  ;;  %3715 = vmatpush3.bf16.msra.mxu0 %v3833_v47 }
 0x566   :  { %3716 = vmatprep.subr.bf16.mxu0 %v4046_v25 }
 0x569   :  { %3717 = vmatpush3.bf16.msra.mxu0 %v3834_v48 }
 0x56a   :  { %3718 = vmatprep.subr.bf16.mxu0 %v4046_v25 }
 0x56d   :  { %3719 = vmatpush3.bf16.msra.mxu0 %v3835_v28 }
 0x56e   :  { %3720 = vmatprep.subr.bf16.mxu0 %v4046_v25 }
 0x571   :  { %3721 = vmatpush3.bf16.msra.mxu0 %v3836_v62 }
 0x572   :  { %3722 = vmatprep.subr.bf16.mxu0 %v4046_v25 }
 0x575   :  { %3723 = vmatpush3.bf16.msra.mxu0 %v3837_v21 }
 0x576   :  { %3724 = vmatprep.subr.bf16.mxu0 %v4046_v25 }
 0x579   :  { %3725 = vmatpush3.bf16.msra.mxu0 %v3838_v51 }
 0x57a   :  { %3726 = vmatprep.subr.bf16.mxu0 %v4046_v25 }
 0x57d   :  { %3727 = vmatpush3.bf16.msra.mxu0 %v3839_v7 }
 0x57e   :  { %3728 = vmatprep.subr.bf16.mxu0 %v4046_v25  ;;  %v3550_v25 = vld [vmem:[%s5743_s12] ss:$0 sm:$0xff] }
 0x581   :  { %3729 = vmatpush3.bf16.msra.mxu0 %v3840_v60 }
 0x637   :  { %v3050_v6 = vpop.f32.mrb[8].mxu0 }
 0x638   :  { %v3051_v29 = vadd.f32 %v3532_v16, %v3050_v6  ;;  %v3692_v22 = vpop.f32.mrb[9].mxu0 }
 0x639   :  { %v3053_v57 = vpop.f32.mrb[10].mxu0 }
 0x63a   :  { %v3056_v40 = vsub.f32 0.0, %v3051_v29  ;;  %v3693_v61 = vpop.f32.mrb[11].mxu0 }
 0x63c   :  { %v3057_v8 = vmul.f32 1.442695, %v3056_v40 }
 0x63e   :  { %3845 = vpow2.f32 %v3057_v8 }
 0x648   :  { %v3846_v53 = vpop.eup %3845 }
 0x649   :  { %v3059_v46 = vadd.f32 1.0, %v3846_v53 }
 0x64b   :  { %3847 = vrcp.f32 %v3059_v46 }
 0x655   :  { %v3848_v24 = vpop.eup %3847 }
 0x656   :  { %v3062_v44 = vpack.c.bf16 %v3848_v24, %v3848_v24 }
 0x658   :  { %3711 = vmatmul.mubr.bf16.vlgmr.msra.gmra.mrb[8].mxu1 %v3062_v44 }
 0x72b   :  { %v3168_v26 = vpop.f32.mrb[8].mxu1 }
 0x72c   :  { %v3169_v11 = vadd.f32 %v3541_v37, %v3168_v26  ;;  %v3712_v31 = vpop.f32.mrb[9].mxu1 }
 0x72d   :  { %v3171_v4 = vpop.f32.mrb[10].mxu1 }
 0x72e   :  { %v3174_v12 = vsub.f32 0.0, %v3169_v11  ;;  %v3713_v52 = vpop.f32.mrb[11].mxu1 }
 0x730   :  { %v3175_v15 = vmul.f32 1.442695, %v3174_v12 }
 0x732   :  { %3849 = vpow2.f32 %v3175_v15 }
 0x73c   :  { %v3850_v34 = vpop.eup %3849 }
 0x73d   :  { %v3177_v20 = vadd.f32 1.0, %v3850_v34 }
 0x73f   :  { %3851 = vrcp.f32 %v3177_v20 }
 0x749   :  { %v3852_v0 = vpop.eup %3851 }
 0x74a   :  { %v3180_v49 = vpack.c.bf16 %v3852_v0, %v3852_v0 }
 0x74c   :  { %3731 = vmatmul.mubr.bf16.vlgmr.msra.gmra.mrb[12].mxu0 %v3180_v49 }
 0x81f   :  { %v3286_v45 = vpop.f32.mrb[12].mxu0 }
 0x820   :  { %v3287_v36 = vadd.f32 %v3550_v25, %v3286_v45  ;;  %v3732_v17 = vpop.f32.mrb[13].mxu0 }
 0x821   :  { %v3289_v58 = vpop.f32.mrb[14].mxu0 }
 0x822   :  { %v3733_v1 = vpop.f32.mrb[15].mxu0  ;;  %3293 = vst.msk [vmem:[#allocation20] sm:$0x3] %vm3292_vm9, %v3287_v36 }
 0x823   :  { %4008 = shalt.err (!%p4005_p10)
}
 0x824   :  { %s4009_s12 = scalar_lea.hbm %s5744_s13, 32 }
 0x825   :  { %p4010_p11 = scmp.ne.s32.totalorder %s5744_s13, %s4009_s12  ;;  %p4013_p12 = scmp.lt.u32.totalorder %s4009_s12, %s5744_s13 }
 0x827   :  { %p4015_p13 = pnand %p4013_p12, %p4010_p11 }
 0x829   :  { %4018 = shalt.err (!%p4015_p13)
}
 0x82a   :  { %3303 = dma.vmem_to_hbm [thread:$0]  %s3301_s20, 32, %s5744_s13, [#allocation6]  }
 0x82b   :  { %4033 = dma.done.wait [#allocation6], 32  }
 0x82c   :  { %4034 = vsyncadd [#allocation6], 4294967264 }
 0x82d   :  { %3307 = vsyncpa [#allocation5], 1 }
 0x82e   :  { %3308 = vsyncpa [#allocation16], 1 }
 0x82f   :  { %3309 = vsyncpa [#allocation19], 1 }
 0x830   :  { %3310 = vsyncpa [#allocation6], 1 }
 0x831   :  { %3311 = vsyncpa [#allocation7], 1 }
 0x832   :  { %3312 = vsyncpa [#allocation11], 1 }
 0x833   :  { %3313 = vsyncpa [#allocation8], 1 }
 0x834   :  { %3314 = vsyncpa [#allocation13], 1 }

</bundles_post_ra>
